<compile_context>
chip_gen: v6e
topology: v6e:2x2x1
jax: 0.10.0
libtpu: 0.0.40
codegen_flags: <defaults>
</compile_context>

<pallas_src>
import functools

import jax
import jax.numpy as jnp
from jax.experimental import pallas as pl
from jax.experimental.pallas import tpu as pltpu

# ---------------- scaled-down synthetic HuBERT config (shapes only) ----------
CFG = dict(
    conv_dim=(32, 32, 32),
    conv_kernel=(10, 3, 2),
    conv_stride=(5, 2, 2),
    hidden=32,
    heads=4,
    intermediate=64,
    layers=2,
    pos_kernel=4,
    pos_groups=4,
)

BF16 = jnp.bfloat16


# TODO(synk): torch nn.GELU() / HF "gelu" is erf-exact; tanh-approx GELU is used
# in-kernel because erf lowering availability on Mosaic varies across versions.
def _gelu(x):
    return jax.nn.gelu(x, approximate=True)


def _mxu(a, b):
    # all projection matmuls: bf16 operands, f32 accumulation on the MXU
    return jnp.dot(a.astype(BF16), b.astype(BF16), preferred_element_type=jnp.float32)


def _layernorm(x, g, b, eps):
    mu = jnp.mean(x, axis=-1, keepdims=True)
    var = jnp.mean((x - mu) ** 2, axis=-1, keepdims=True)
    return (x - mu) * jax.lax.rsqrt(var + eps) * g + b


# ----------------------------- Pallas kernel bodies --------------------------
def _front_kernel(x_ref, w_ref, g_ref, b_ref, o_ref, *, T, L_out, q_max, gn_eps):
    # fused: Wav2Vec2FeatureExtractor zero-mean/unit-var norm -> conv0 -> GroupNorm -> GELU
    x = x_ref[0]                                   # (rows, stride*Cin) phase-folded wave
    # phase padding is zero and never touched by a valid tap, so sums over the
    # whole block divided by the true sample count T give the exact statistics.
    mu = jnp.sum(x, keepdims=True) / T             # (1, 1)
    ms = jnp.sum(x * x, keepdims=True) / T
    var = jnp.maximum(ms - mu * mu, 0.0)
    xn = (x - mu) * jax.lax.rsqrt(var + 1e-7)
    # conv0 as one matmul against the in-VMEM im2col patch (no HBM blow-up)
    patches = jnp.concatenate([xn[q:q + L_out, :] for q in range(q_max + 1)], axis=1)
    y = _mxu(patches, w_ref[...])                  # (L_out, C0), conv_bias=False
    # GroupNorm with num_groups == num_channels: per-channel stats over time
    mu_c = jnp.mean(y, axis=0, keepdims=True)
    var_c = jnp.mean((y - mu_c) ** 2, axis=0, keepdims=True)
    y = (y - mu_c) * jax.lax.rsqrt(var_c + gn_eps) * g_ref[...] + b_ref[...]
    o_ref[0] = _gelu(y)


def _conv_gelu_kernel(x_ref, w_ref, o_ref, *, L_out, q_max):
    # strided Conv1d (channels-last, phase-folded input) + GELU, one matmul
    x = x_ref[0]                                   # (rows, stride*Cin)
    patches = jnp.concatenate([x[q:q + L_out, :] for q in range(q_max + 1)], axis=1)
    o_ref[0] = _gelu(_mxu(patches, w_ref[...]))


def _conv_fp_kernel(x_ref, w_ref, lng_ref, lnb_ref, fpw_ref, fpb_ref, o_ref,
                    *, L_out, q_max, eps):
    # fused: last conv + GELU + HubertFeatureProjection (LayerNorm -> Linear)
    x = x_ref[0]
    patches = jnp.concatenate([x[q:q + L_out, :] for q in range(q_max + 1)], axis=1)
    y = _gelu(_mxu(patches, w_ref[...]))
    yn = _layernorm(y, lng_ref[...], lnb_ref[...], eps)
    o_ref[0] = _mxu(yn, fpw_ref[...]) + fpb_ref[...]


def _encoder_kernel(hp_ref, posw_ref, posb_ref, encg_ref, encb_ref,
                    wqkv_ref, bqkv_ref, wo_ref, bo_ref, ln1g_ref, ln1b_ref,
                    w1_ref, b1_ref, w2_ref, b2_ref, ln2g_ref, ln2b_ref,
                    o_ref, *, S, H, nh, dh, pos_k, nlayers, eps):
    # fused HubertEncoder: pos-conv-embed + residual + LayerNorm + all transformer
    # layers, one batch element per grid step; everything stays resident in VMEM.
    hp = hp_ref[0]                                 # (S + pos_k - 1, H) zero-padded hidden
    h = hp[pos_k // 2: pos_k // 2 + S, :]          # (S, H) unpadded hidden states

    # positional conv (grouped Conv1d + SamePad + GELU) as ONE matmul against a
    # block-diagonal (pos_k*H, H) weight.
    # TODO(synk): at real scale keep the grouped structure / tile the K*H reduction.
    patches = jnp.concatenate([hp[k:k + S, :] for k in range(pos_k)], axis=1)
    pos = _gelu(_mxu(patches, posw_ref[...]) + posb_ref[...])
    y = _layernorm(h + pos, encg_ref[...], encb_ref[...], eps)

    scale = dh ** -0.5
    for l in range(nlayers):                       # static unroll; weights in VMEM
        # --- self-attention block (post-norm) ---
        qkv = _mxu(y, wqkv_ref[l]) + bqkv_ref[l]   # (S, 3H)
        q = qkv[:, :H] * scale
        k = qkv[:, H:2 * H]
        v = qkv[:, 2 * H:]
        # stack heads -> (nh, S, dh); two batched bf16 matmuls, f32 accumulate
        q3 = jnp.stack([q[:, hd * dh:(hd + 1) * dh] for hd in range(nh)], 0).astype(BF16)
        k3 = jnp.stack([k[:, hd * dh:(hd + 1) * dh] for hd in range(nh)], 0).astype(BF16)
        v3 = jnp.stack([v[:, hd * dh:(hd + 1) * dh] for hd in range(nh)], 0).astype(BF16)
        s = jnp.einsum('nqd,nkd->nqk', q3, k3,
                       preferred_element_type=jnp.float32)         # (nh, S, S)
        s = s - jnp.max(s, axis=-1, keepdims=True)
        p = jnp.exp(s)
        p = p * pl.reciprocal(jnp.sum(p, axis=-1, keepdims=True), approx=True)
        a3 = jnp.einsum('nqk,nkd->nqd', p.astype(BF16), v3,
                        preferred_element_type=jnp.float32)         # (nh, S, dh)
        a = jnp.concatenate([a3[hd] for hd in range(nh)], axis=-1)  # (S, H)
        y = _layernorm(y + _mxu(a, wo_ref[l]) + bo_ref[l],
                       ln1g_ref[l], ln1b_ref[l], eps)
        # --- feed-forward block ---
        ff = _gelu(_mxu(y, w1_ref[l]) + b1_ref[l])
        y = _layernorm(y + _mxu(ff, w2_ref[l]) + b2_ref[l],
                       ln2g_ref[l], ln2b_ref[l], eps)

    o_ref[0] = y
    # TODO(synk): at real S this needs a KV-block online-softmax (flash) loop instead
    # of the full (S, S) score tensor; trivial at S=19.


# ----------------------------- wrapper-side glue ------------------------------
def _bcast_spec(shape):
    nd = len(shape)
    return pl.BlockSpec(shape, lambda b, _nd=nd: (0,) * _nd)


def _phase_for_conv(x, K, stride):
    # (B, L, Cin) -> (B, rows, stride*Cin) "phase-folded" view such that the conv's
    # im2col patch for output j is the concat of rows j..j+q_max (built in-kernel).
    # Pure pad/slice + reshape: ~1x the original data (no K-fold HBM blow-up).
    B, L, Cin = x.shape
    L_out = (L - K) // stride + 1
    q_max = (K - 1) // stride
    rows = L_out + q_max
    need = rows * stride
    if need > L:
        x = jnp.pad(x, ((0, 0), (0, need - L), (0, 0)))
    elif need < L:
        x = x[:, :need, :]
    return x.reshape(B, rows, stride * Cin), L_out, q_max


def _conv_weight_matrix(w, stride):
    # torch Conv1d weight (Cout, Cin, K) -> ((q_max+1)*stride*Cin, Cout) matrix whose
    # row ordering matches the in-kernel patch concat; phantom taps (>= K) are zero.
    Cout, Cin, K = w.shape
    q_max = (K - 1) // stride
    wmat = jnp.zeros(((q_max + 1) * stride * Cin, Cout), jnp.float32)
    for k in range(K):
        wmat = wmat.at[k * Cin:(k + 1) * Cin, :].set(jnp.transpose(w[:, :, k]))
    return wmat


def _pos_conv_block_diag(w, groups):
    # grouped conv weight (H, H//groups, K) -> dense block-diagonal (K*H, H) so the
    # whole positional conv is ONE lane-dense matmul (fine at H=32; see TODO above).
    H, Cg, K = w.shape
    blocks = []
    for k in range(K):
        wk = jnp.zeros((H, H), jnp.float32)
        for g in range(groups):
            blk = jnp.transpose(w[g * Cg:(g + 1) * Cg, :, k])       # (Cg_in, Cg_out)
            wk = wk.at[g * Cg:(g + 1) * Cg, g * Cg:(g + 1) * Cg].set(blk)
        blocks.append(wk)
    return jnp.concatenate(blocks, axis=0)          # rows ordered (k, cin)


# ----------------------------- Pallas wrappers --------------------------------
def pallas_front(wav, w0mat, gn_g, gn_b, K, stride):
    B, T = wav.shape
    xp, L_out, q_max = _phase_for_conv(wav[:, :, None], K, stride)
    rows, pc = xp.shape[1], xp.shape[2]
    C0 = w0mat.shape[1]
    return pl.pallas_call(
        functools.partial(_front_kernel, T=T, L_out=L_out, q_max=q_max, gn_eps=1e-5),
        out_shape=jax.ShapeDtypeStruct((B, L_out, C0), jnp.float32),
        grid=(B,),
        in_specs=[pl.BlockSpec((1, rows, pc), lambda b: (b, 0, 0)),
                  _bcast_spec(w0mat.shape),
                  _bcast_spec(gn_g.shape),
                  _bcast_spec(gn_b.shape)],
        out_specs=pl.BlockSpec((1, L_out, C0), lambda b: (b, 0, 0)),
        compiler_params=pltpu.CompilerParams(dimension_semantics=("parallel",)),
    )(xp, w0mat, gn_g, gn_b)


def pallas_conv_gelu(h, wmat, K, stride):
    B = h.shape[0]
    xp, L_out, q_max = _phase_for_conv(h, K, stride)
    rows, pc = xp.shape[1], xp.shape[2]
    Cout = wmat.shape[1]
    return pl.pallas_call(
        functools.partial(_conv_gelu_kernel, L_out=L_out, q_max=q_max),
        out_shape=jax.ShapeDtypeStruct((B, L_out, Cout), jnp.float32),
        grid=(B,),
        in_specs=[pl.BlockSpec((1, rows, pc), lambda b: (b, 0, 0)),
                  _bcast_spec(wmat.shape)],
        out_specs=pl.BlockSpec((1, L_out, Cout), lambda b: (b, 0, 0)),
        compiler_params=pltpu.CompilerParams(dimension_semantics=("parallel",)),
    )(xp, wmat)


def pallas_conv_fp(h, wmat, ln_g, ln_b, fp_w, fp_b2d, K, stride, eps=1e-5):
    B = h.shape[0]
    xp, L_out, q_max = _phase_for_conv(h, K, stride)
    rows, pc = xp.shape[1], xp.shape[2]
    Hout = fp_w.shape[1]
    return pl.pallas_call(
        functools.partial(_conv_fp_kernel, L_out=L_out, q_max=q_max, eps=eps),
        out_shape=jax.ShapeDtypeStruct((B, L_out, Hout), jnp.float32),
        grid=(B,),
        in_specs=[pl.BlockSpec((1, rows, pc), lambda b: (b, 0, 0)),
                  _bcast_spec(wmat.shape),
                  _bcast_spec(ln_g.shape),
                  _bcast_spec(ln_b.shape),
                  _bcast_spec(fp_w.shape),
                  _bcast_spec(fp_b2d.shape)],
        out_specs=pl.BlockSpec((1, L_out, Hout), lambda b: (b, 0, 0)),
        compiler_params=pltpu.CompilerParams(dimension_semantics=("parallel",)),
    )(xp, wmat, ln_g, ln_b, fp_w, fp_b2d)


def pallas_encoder(h, pos_wfull, pos_b2d, enc_g, enc_b, stacked, nh, pos_k, eps=1e-5):
    B, S, H = h.shape
    pad_l = pos_k // 2
    pad_r = pos_k - 1 - pad_l          # even K: SamePad drops the last conv output
    hp = jnp.pad(h, ((0, 0), (pad_l, pad_r), (0, 0)))
    Sp = S + pos_k - 1
    nlayers = stacked[0].shape[0]
    dh = H // nh
    weights = [pos_wfull, pos_b2d, enc_g, enc_b] + list(stacked)
    in_specs = [pl.BlockSpec((1, Sp, H), lambda b: (b, 0, 0))]
    in_specs += [_bcast_spec(w.shape) for w in weights]
    return pl.pallas_call(
        functools.partial(_encoder_kernel, S=S, H=H, nh=nh, dh=dh,
                          pos_k=pos_k, nlayers=nlayers, eps=eps),
        out_shape=jax.ShapeDtypeStruct((B, S, H), jnp.float32),
        grid=(B,),
        in_specs=in_specs,
        out_specs=pl.BlockSpec((1, S, H), lambda b: (b, 0, 0)),
        compiler_params=pltpu.CompilerParams(dimension_semantics=("parallel",)),
    )(hp, *weights)


# ----------------------------- parameters ------------------------------------
def init_params(key):
    keys = iter(jax.random.split(key, 128))

    def nrm(shape, s=0.05):
        return (s * jax.random.normal(next(keys), shape)).astype(jnp.float32)

    H, I = CFG["hidden"], CFG["intermediate"]
    p = {}

    convs, cin = [], 1
    for cout, k in zip(CFG["conv_dim"], CFG["conv_kernel"]):
        convs.append({"w": nrm((cout, cin, k))})          # conv_bias=False (HuBERT base)
        cin = cout
    p["convs"] = convs

    C0 = CFG["conv_dim"][0]
    p["gn_g"] = jnp.ones((1, C0), jnp.float32)
    p["gn_b"] = jnp.zeros((1, C0), jnp.float32)

    C = CFG["conv_dim"][-1]
    p["fp_ln_g"] = jnp.ones((1, C), jnp.float32)
    p["fp_ln_b"] = jnp.zeros((1, C), jnp.float32)
    p["fp_w"] = nrm((C, H))
    p["fp_b"] = nrm((H,))

    Kp, G = CFG["pos_kernel"], CFG["pos_groups"]
    # weight-norm reparameterization folded directly into the synthetic weight
    p["pos_w"] = nrm((H, H // G, Kp))
    p["pos_b"] = nrm((H,))

    p["enc_ln_g"] = jnp.ones((1, H), jnp.float32)
    p["enc_ln_b"] = jnp.zeros((1, H), jnp.float32)

    layers = []
    for _ in range(CFG["layers"]):
        layers.append({
            "q_w": nrm((H, H)), "q_b": nrm((H,)),
            "k_w": nrm((H, H)), "k_b": nrm((H,)),
            "v_w": nrm((H, H)), "v_b": nrm((H,)),
            "o_w": nrm((H, H)), "o_b": nrm((H,)),
            "ln1_g": jnp.ones((1, H), jnp.float32), "ln1_b": jnp.zeros((1, H), jnp.float32),
            "ff1_w": nrm((H, I)), "ff1_b": nrm((I,)),
            "ff2_w": nrm((I, H)), "ff2_b": nrm((H,)),
            "ln2_g": jnp.ones((1, H), jnp.float32), "ln2_b": jnp.zeros((1, H), jnp.float32),
        })
    p["layers"] = layers
    return p


def _stack_layers(layers):
    # per-layer weights stacked along a leading layer axis; fused QKV.
    wqkv = jnp.stack([jnp.concatenate([l["q_w"], l["k_w"], l["v_w"]], axis=1)
                      for l in layers], 0)                                    # (L, H, 3H)
    bqkv = jnp.stack([jnp.concatenate([l["q_b"], l["k_b"], l["v_b"]])[None, :]
                      for l in layers], 0)                                    # (L, 1, 3H)
    wo = jnp.stack([l["o_w"] for l in layers], 0)
    bo = jnp.stack([l["o_b"][None, :] for l in layers], 0)
    ln1g = jnp.stack([l["ln1_g"] for l in layers], 0)
    ln1b = jnp.stack([l["ln1_b"] for l in layers], 0)
    w1 = jnp.stack([l["ff1_w"] for l in layers], 0)
    b1 = jnp.stack([l["ff1_b"][None, :] for l in layers], 0)
    w2 = jnp.stack([l["ff2_w"] for l in layers], 0)
    b2 = jnp.stack([l["ff2_b"][None, :] for l in layers], 0)
    ln2g = jnp.stack([l["ln2_g"] for l in layers], 0)
    ln2b = jnp.stack([l["ln2_b"] for l in layers], 0)
    return (wqkv, bqkv, wo, bo, ln1g, ln1b, w1, b1, w2, b2, ln2g, ln2b)


# ----------------------------- forward pass -----------------------------------
def cnhubert_forward(params, wav):
    nh = CFG["heads"]
    strides = CFG["conv_stride"]
    kernels = CFG["conv_kernel"]

    # kernel-ready weight matrices (constants under jit; folded at trace time)
    w0m = _conv_weight_matrix(params["convs"][0]["w"], strides[0])
    w1m = _conv_weight_matrix(params["convs"][1]["w"], strides[1])
    w2m = _conv_weight_matrix(params["convs"][2]["w"], strides[2])
    pos_wfull = _pos_conv_block_diag(params["pos_w"], CFG["pos_groups"])
    stacked = _stack_layers(params["layers"])

    # 1) waveform zero-mean/unit-var norm + conv0 + GroupNorm + GELU
    h = pallas_front(wav, w0m, params["gn_g"], params["gn_b"], kernels[0], strides[0])
    # 2) conv1 + GELU
    h = pallas_conv_gelu(h, w1m, kernels[1], strides[1])
    # 3) conv2 + GELU + feature projection (LayerNorm + Linear)
    h = pallas_conv_fp(h, w2m, params["fp_ln_g"], params["fp_ln_b"],
                       params["fp_w"], params["fp_b"].reshape(1, -1),
                       kernels[2], strides[2])
    # 4) encoder: pos conv + residual + LayerNorm + both transformer layers, fused
    out = pallas_encoder(h, pos_wfull, params["pos_b"].reshape(1, -1),
                         params["enc_ln_g"], params["enc_ln_b"],
                         stacked, nh, CFG["pos_kernel"])
    return out  # last_hidden_state: (B, S, hidden)


# ----------------------------- main --------------------------------------------
if __name__ == "__main__":
    key = jax.random.PRNGKey(0)
    pkey, xkey = jax.random.split(key)
    params = init_params(pkey)

    B, T = 2, 400
    wav = jax.random.normal(xkey, (B, T), jnp.float32)

    feats = jax.jit(lambda w: cnhubert_forward(params, w))(wav)
    feats = jax.block_until_ready(feats)

    # expected sequence length from the conv stack
    L = T
    for k, s in zip(CFG["conv_kernel"], CFG["conv_stride"]):
        L = (L - k) // s + 1
    assert feats.shape == (B, L, CFG["hidden"]), feats.shape
    assert feats.dtype == jnp.float32
    assert bool(jnp.all(jnp.isfinite(feats)))
    print("KERNEL_OK")
</pallas_src>

<mosaic_0001>
module attributes {stable_mosaic.version = 11 : i64} {
  func.func @_front_kernel(%arg0: i32, %arg1: memref<1x80x5xf32, #tpu.memory_space<vmem>>, %arg2: memref<10x32xf32, #tpu.memory_space<vmem>>, %arg3: memref<1x32xf32, #tpu.memory_space<vmem>>, %arg4: memref<1x32xf32, #tpu.memory_space<vmem>>, %arg5: memref<1x79x32xf32, #tpu.memory_space<vmem>>) attributes {dimension_semantics = [#tpu.dimension_semantics<parallel>], iteration_bounds = array<i64: 2>, scalar_prefetch = 0 : i64, scratch_operands = 0 : i64, tpu.core_type = #tpu.core_type<tc>, window_params = [{transform_indices = @transform_0, window_bounds = array<i64: 1, 80, 5>}, {pipeline_mode = #tpu.pipeline_mode<synchronous>, transform_indices = @transform_1, window_bounds = array<i64: 10, 32>}, {pipeline_mode = #tpu.pipeline_mode<synchronous>, transform_indices = @transform_2, window_bounds = array<i64: 1, 32>}, {pipeline_mode = #tpu.pipeline_mode<synchronous>, transform_indices = @transform_3, window_bounds = array<i64: 1, 32>}, {transform_indices = @transform_4, window_bounds = array<i64: 1, 79, 32>}]} {
    %c0 = arith.constant 0 : index
    %c0_0 = arith.constant 0 : index
    %c0_1 = arith.constant 0 : index
    %0 = vector.load %arg1[%c0, %c0_0, %c0_1] : memref<1x80x5xf32, #tpu.memory_space<vmem>>, vector<1x80x5xf32>
    %1 = vector.shape_cast %0 : vector<1x80x5xf32> to vector<80x5xf32>
    %2 = vector.shape_cast %1 : vector<80x5xf32> to vector<1x80x5xf32>
    %cst = arith.constant dense<0.000000e+00> : vector<1xf32>
    %3 = vector.multi_reduction <add>, %2, %cst [1, 2] : vector<1x80x5xf32> to vector<1xf32>
    %4 = vector.shape_cast %3 : vector<1xf32> to vector<1x1x1xf32>
    %5 = vector.extract %4[0, 0, 0] : f32 from vector<1x1x1xf32>
    %6 = vector.broadcast %5 : f32 to vector<1x1xf32>
    %cst_2 = arith.constant 4.000000e+02 : f32
    %7 = vector.broadcast %cst_2 : f32 to vector<1x1xf32>
    %8 = arith.divf %6, %7 : vector<1x1xf32>
    %9 = arith.mulf %1, %1 : vector<80x5xf32>
    %10 = vector.shape_cast %9 : vector<80x5xf32> to vector<1x80x5xf32>
    %cst_3 = arith.constant dense<0.000000e+00> : vector<1xf32>
    %11 = vector.multi_reduction <add>, %10, %cst_3 [1, 2] : vector<1x80x5xf32> to vector<1xf32>
    %12 = vector.shape_cast %11 : vector<1xf32> to vector<1x1x1xf32>
    %13 = vector.extract %12[0, 0, 0] : f32 from vector<1x1x1xf32>
    %14 = vector.broadcast %13 : f32 to vector<1x1xf32>
    %cst_4 = arith.constant 4.000000e+02 : f32
    %15 = vector.broadcast %cst_4 : f32 to vector<1x1xf32>
    %16 = arith.divf %14, %15 : vector<1x1xf32>
    %17 = arith.mulf %8, %8 : vector<1x1xf32>
    %18 = arith.subf %16, %17 : vector<1x1xf32>
    %cst_5 = arith.constant 0.000000e+00 : f32
    %19 = vector.broadcast %cst_5 : f32 to vector<1x1xf32>
    %20 = arith.maximumf %18, %19 : vector<1x1xf32>
    %21 = vector.broadcast %8 : vector<1x1xf32> to vector<80x5xf32>
    %22 = arith.subf %1, %21 : vector<80x5xf32>
    %cst_6 = arith.constant 1.000000e-07 : f32
    %23 = vector.broadcast %cst_6 : f32 to vector<1x1xf32>
    %24 = arith.addf %20, %23 : vector<1x1xf32>
    %25 = math.rsqrt %24 : vector<1x1xf32>
    %26 = vector.broadcast %25 : vector<1x1xf32> to vector<80x5xf32>
    %27 = arith.mulf %22, %26 : vector<80x5xf32>
    %28 = vector.extract_strided_slice %27 {offsets = [0, 0], sizes = [79, 5], strides = [1, 1]} : vector<80x5xf32> to vector<79x5xf32>
    %29 = vector.extract_strided_slice %27 {offsets = [1, 0], sizes = [79, 5], strides = [1, 1]} : vector<80x5xf32> to vector<79x5xf32>
    %30 = tpu.concatenate %28, %29 in 1 : vector<79x5xf32>, vector<79x5xf32> -> vector<79x10xf32>
    %c0_7 = arith.constant 0 : index
    %c0_8 = arith.constant 0 : index
    %31 = vector.load %arg2[%c0_7, %c0_8] : memref<10x32xf32, #tpu.memory_space<vmem>>, vector<10x32xf32>
    %32 = arith.truncf %30 : vector<79x10xf32> to vector<79x10xbf16>
    %33 = arith.truncf %31 : vector<10x32xf32> to vector<10x32xbf16>
    %cst_9 = arith.constant dense<0.000000e+00> : vector<79x32xf32>
    %34 = tpu.matmul %32, %33, %cst_9 {dimension_numbers = #tpu.dot_dimension_numbers<[1], [0], [0], [1], [0, 0, 1, 1], [], []>} : vector<79x10xbf16>, vector<10x32xbf16>, vector<79x32xf32> -> vector<79x32xf32>
    %cst_10 = arith.constant dense<0.000000e+00> : vector<32xf32>
    %35 = vector.multi_reduction <add>, %34, %cst_10 [0] : vector<79x32xf32> to vector<32xf32>
    %36 = vector.shape_cast %35 : vector<32xf32> to vector<1x32xf32>
    %cst_11 = arith.constant 7.900000e+01 : f32
    %37 = vector.broadcast %cst_11 : f32 to vector<1x32xf32>
    %38 = arith.divf %36, %37 : vector<1x32xf32>
    %39 = vector.broadcast %38 : vector<1x32xf32> to vector<79x32xf32>
    %40 = arith.subf %34, %39 : vector<79x32xf32>
    %41 = arith.mulf %40, %40 : vector<79x32xf32>
    %cst_12 = arith.constant dense<0.000000e+00> : vector<32xf32>
    %42 = vector.multi_reduction <add>, %41, %cst_12 [0] : vector<79x32xf32> to vector<32xf32>
    %43 = vector.shape_cast %42 : vector<32xf32> to vector<1x32xf32>
    %cst_13 = arith.constant 7.900000e+01 : f32
    %44 = vector.broadcast %cst_13 : f32 to vector<1x32xf32>
    %45 = arith.divf %43, %44 : vector<1x32xf32>
    %46 = vector.broadcast %38 : vector<1x32xf32> to vector<79x32xf32>
    %47 = arith.subf %34, %46 : vector<79x32xf32>
    %cst_14 = arith.constant 9.99999974E-6 : f32
    %48 = vector.broadcast %cst_14 : f32 to vector<1x32xf32>
    %49 = arith.addf %45, %48 : vector<1x32xf32>
    %50 = math.rsqrt %49 : vector<1x32xf32>
    %51 = vector.broadcast %50 : vector<1x32xf32> to vector<79x32xf32>
    %52 = arith.mulf %47, %51 : vector<79x32xf32>
    %c0_15 = arith.constant 0 : index
    %c0_16 = arith.constant 0 : index
    %53 = vector.load %arg3[%c0_15, %c0_16] : memref<1x32xf32, #tpu.memory_space<vmem>>, vector<1x32xf32>
    %54 = vector.broadcast %53 : vector<1x32xf32> to vector<79x32xf32>
    %55 = arith.mulf %52, %54 : vector<79x32xf32>
    %c0_17 = arith.constant 0 : index
    %c0_18 = arith.constant 0 : index
    %56 = vector.load %arg4[%c0_17, %c0_18] : memref<1x32xf32, #tpu.memory_space<vmem>>, vector<1x32xf32>
    %57 = vector.broadcast %56 : vector<1x32xf32> to vector<79x32xf32>
    %58 = arith.addf %55, %57 : vector<79x32xf32>
    %59 = arith.mulf %58, %58 : vector<79x32xf32>
    %60 = arith.mulf %58, %59 : vector<79x32xf32>
    %cst_19 = arith.constant 4.471500e-02 : f32
    %61 = vector.broadcast %cst_19 : f32 to vector<79x32xf32>
    %62 = arith.mulf %61, %60 : vector<79x32xf32>
    %63 = arith.addf %58, %62 : vector<79x32xf32>
    %cst_20 = arith.constant 0.797884583 : f32
    %64 = vector.broadcast %cst_20 : f32 to vector<79x32xf32>
    %65 = arith.mulf %64, %63 : vector<79x32xf32>
    %66 = math.tanh %65 : vector<79x32xf32>
    %cst_21 = arith.constant 1.000000e+00 : f32
    %67 = vector.broadcast %cst_21 : f32 to vector<79x32xf32>
    %68 = arith.addf %67, %66 : vector<79x32xf32>
    %cst_22 = arith.constant 5.000000e-01 : f32
    %69 = vector.broadcast %cst_22 : f32 to vector<79x32xf32>
    %70 = arith.mulf %69, %68 : vector<79x32xf32>
    %71 = arith.mulf %58, %70 : vector<79x32xf32>
    %c0_23 = arith.constant 0 : index
    %c0_24 = arith.constant 0 : index
    %c0_25 = arith.constant 0 : index
    %72 = vector.load %arg5[%c0_23, %c0_24, %c0_25] : memref<1x79x32xf32, #tpu.memory_space<vmem>>, vector<1x79x32xf32>
    %73 = vector.shape_cast %72 : vector<1x79x32xf32> to vector<79x32xf32>
    %74 = vector.shape_cast %71 : vector<79x32xf32> to vector<1x79x32xf32>
    tpu.vector_store %arg5[%c0_23, %c0_24, %c0_25], %74 {strides = array<i32>} : memref<1x79x32xf32, #tpu.memory_space<vmem>>, vector<1x79x32xf32>,
    return
  }
  func.func @transform_0(%arg0: i32) -> (i32, i32, i32) {
    %c0_i32 = arith.constant 0 : i32
    %c0_i32_0 = arith.constant 0 : i32
    %c0_i32_1 = arith.constant 0 : i32
    return %arg0, %c0_i32, %c0_i32_0 : i32, i32, i32
  }
  func.func @transform_1(%arg0: i32) -> (i32, i32) {
    %c0_i32 = arith.constant 0 : i32
    %c0_i32_0 = arith.constant 0 : i32
    %c0_i32_1 = arith.constant 0 : i32
    return %c0_i32, %c0_i32_0 : i32, i32
  }
  func.func @transform_2(%arg0: i32) -> (i32, i32) {
    %c0_i32 = arith.constant 0 : i32
    %c0_i32_0 = arith.constant 0 : i32
    %c0_i32_1 = arith.constant 0 : i32
    return %c0_i32, %c0_i32_0 : i32, i32
  }
  func.func @transform_3(%arg0: i32) -> (i32, i32) {
    %c0_i32 = arith.constant 0 : i32
    %c0_i32_0 = arith.constant 0 : i32
    %c0_i32_1 = arith.constant 0 : i32
    return %c0_i32, %c0_i32_0 : i32, i32
  }
  func.func @transform_4(%arg0: i32) -> (i32, i32, i32) {
    %c0_i32 = arith.constant 0 : i32
    %c0_i32_0 = arith.constant 0 : i32
    %c0_i32_1 = arith.constant 0 : i32
    return %arg0, %c0_i32, %c0_i32_0 : i32, i32, i32
  }
}

module attributes {stable_mosaic.version = 11 : i64} {
  func.func @_conv_gelu_kernel(%arg0: i32, %arg1: memref<1x40x64xf32, #tpu.memory_space<vmem>>, %arg2: memref<128x32xf32, #tpu.memory_space<vmem>>, %arg3: memref<1x39x32xf32, #tpu.memory_space<vmem>>) attributes {dimension_semantics = [#tpu.dimension_semantics<parallel>], iteration_bounds = array<i64: 2>, scalar_prefetch = 0 : i64, scratch_operands = 0 : i64, tpu.core_type = #tpu.core_type<tc>, window_params = [{transform_indices = @transform_0, window_bounds = array<i64: 1, 40, 64>}, {pipeline_mode = #tpu.pipeline_mode<synchronous>, transform_indices = @transform_1, window_bounds = array<i64: 128, 32>}, {transform_indices = @transform_2, window_bounds = array<i64: 1, 39, 32>}]} {
    %c0 = arith.constant 0 : index
    %c0_0 = arith.constant 0 : index
    %c0_1 = arith.constant 0 : index
    %0 = vector.load %arg1[%c0, %c0_0, %c0_1] : memref<1x40x64xf32, #tpu.memory_space<vmem>>, vector<1x40x64xf32>
    %1 = vector.shape_cast %0 : vector<1x40x64xf32> to vector<40x64xf32>
    %2 = vector.extract_strided_slice %1 {offsets = [0, 0], sizes = [39, 64], strides = [1, 1]} : vector<40x64xf32> to vector<39x64xf32>
    %3 = vector.extract_strided_slice %1 {offsets = [1, 0], sizes = [39, 64], strides = [1, 1]} : vector<40x64xf32> to vector<39x64xf32>
    %4 = tpu.concatenate %2, %3 in 1 : vector<39x64xf32>, vector<39x64xf32> -> vector<39x128xf32>
    %c0_2 = arith.constant 0 : index
    %c0_3 = arith.constant 0 : index
    %5 = vector.load %arg2[%c0_2, %c0_3] : memref<128x32xf32, #tpu.memory_space<vmem>>, vector<128x32xf32>
    %6 = arith.truncf %4 : vector<39x128xf32> to vector<39x128xbf16>
    %7 = arith.truncf %5 : vector<128x32xf32> to vector<128x32xbf16>
    %cst = arith.constant dense<0.000000e+00> : vector<39x32xf32>
    %8 = tpu.matmul %6, %7, %cst {dimension_numbers = #tpu.dot_dimension_numbers<[1], [0], [0], [1], [0, 0, 1, 1], [], []>} : vector<39x128xbf16>, vector<128x32xbf16>, vector<39x32xf32> -> vector<39x32xf32>
    %9 = arith.mulf %8, %8 : vector<39x32xf32>
    %10 = arith.mulf %8, %9 : vector<39x32xf32>
    %cst_4 = arith.constant 4.471500e-02 : f32
    %11 = vector.broadcast %cst_4 : f32 to vector<39x32xf32>
    %12 = arith.mulf %11, %10 : vector<39x32xf32>
    %13 = arith.addf %8, %12 : vector<39x32xf32>
    %cst_5 = arith.constant 0.797884583 : f32
    %14 = vector.broadcast %cst_5 : f32 to vector<39x32xf32>
    %15 = arith.mulf %14, %13 : vector<39x32xf32>
    %16 = math.tanh %15 : vector<39x32xf32>
    %cst_6 = arith.constant 1.000000e+00 : f32
    %17 = vector.broadcast %cst_6 : f32 to vector<39x32xf32>
    %18 = arith.addf %17, %16 : vector<39x32xf32>
    %cst_7 = arith.constant 5.000000e-01 : f32
    %19 = vector.broadcast %cst_7 : f32 to vector<39x32xf32>
    %20 = arith.mulf %19, %18 : vector<39x32xf32>
    %21 = arith.mulf %8, %20 : vector<39x32xf32>
    %c0_8 = arith.constant 0 : index
    %c0_9 = arith.constant 0 : index
    %c0_10 = arith.constant 0 : index
    %22 = vector.load %arg3[%c0_8, %c0_9, %c0_10] : memref<1x39x32xf32, #tpu.memory_space<vmem>>, vector<1x39x32xf32>
    %23 = vector.shape_cast %22 : vector<1x39x32xf32> to vector<39x32xf32>
    %24 = vector.shape_cast %21 : vector<39x32xf32> to vector<1x39x32xf32>
    tpu.vector_store %arg3[%c0_8, %c0_9, %c0_10], %24 {strides = array<i32>} : memref<1x39x32xf32, #tpu.memory_space<vmem>>, vector<1x39x32xf32>,
    return
  }
  func.func @transform_0(%arg0: i32) -> (i32, i32, i32) {
    %c0_i32 = arith.constant 0 : i32
    %c0_i32_0 = arith.constant 0 : i32
    %c0_i32_1 = arith.constant 0 : i32
    return %arg0, %c0_i32, %c0_i32_0 : i32, i32, i32
  }
  func.func @transform_1(%arg0: i32) -> (i32, i32) {
    %c0_i32 = arith.constant 0 : i32
    %c0_i32_0 = arith.constant 0 : i32
    %c0_i32_1 = arith.constant 0 : i32
    return %c0_i32, %c0_i32_0 : i32, i32
  }
  func.func @transform_2(%arg0: i32) -> (i32, i32, i32) {
    %c0_i32 = arith.constant 0 : i32
    %c0_i32_0 = arith.constant 0 : i32
    %c0_i32_1 = arith.constant 0 : i32
    return %arg0, %c0_i32, %c0_i32_0 : i32, i32, i32
  }
}

module attributes {stable_mosaic.version = 11 : i64} {
  func.func @_conv_fp_kernel(%arg0: i32, %arg1: memref<1x19x64xf32, #tpu.memory_space<vmem>>, %arg2: memref<64x32xf32, #tpu.memory_space<vmem>>, %arg3: memref<1x32xf32, #tpu.memory_space<vmem>>, %arg4: memref<1x32xf32, #tpu.memory_space<vmem>>, %arg5: memref<32x32xf32, #tpu.memory_space<vmem>>, %arg6: memref<1x32xf32, #tpu.memory_space<vmem>>, %arg7: memref<1x19x32xf32, #tpu.memory_space<vmem>>) attributes {dimension_semantics = [#tpu.dimension_semantics<parallel>], iteration_bounds = array<i64: 2>, scalar_prefetch = 0 : i64, scratch_operands = 0 : i64, tpu.core_type = #tpu.core_type<tc>, window_params = [{transform_indices = @transform_0, window_bounds = array<i64: 1, 19, 64>}, {pipeline_mode = #tpu.pipeline_mode<synchronous>, transform_indices = @transform_1, window_bounds = array<i64: 64, 32>}, {pipeline_mode = #tpu.pipeline_mode<synchronous>, transform_indices = @transform_2, window_bounds = array<i64: 1, 32>}, {pipeline_mode = #tpu.pipeline_mode<synchronous>, transform_indices = @transform_3, window_bounds = array<i64: 1, 32>}, {pipeline_mode = #tpu.pipeline_mode<synchronous>, transform_indices = @transform_4, window_bounds = array<i64: 32, 32>}, {pipeline_mode = #tpu.pipeline_mode<synchronous>, transform_indices = @transform_5, window_bounds = array<i64: 1, 32>}, {transform_indices = @transform_6, window_bounds = array<i64: 1, 19, 32>}]} {
    %c0 = arith.constant 0 : index
    %c0_0 = arith.constant 0 : index
    %c0_1 = arith.constant 0 : index
    %0 = vector.load %arg1[%c0, %c0_0, %c0_1] : memref<1x19x64xf32, #tpu.memory_space<vmem>>, vector<1x19x64xf32>
    %1 = vector.shape_cast %0 : vector<1x19x64xf32> to vector<19x64xf32>
    %c0_2 = arith.constant 0 : index
    %c0_3 = arith.constant 0 : index
    %2 = vector.load %arg2[%c0_2, %c0_3] : memref<64x32xf32, #tpu.memory_space<vmem>>, vector<64x32xf32>
    %3 = arith.truncf %1 : vector<19x64xf32> to vector<19x64xbf16>
    %4 = arith.truncf %2 : vector<64x32xf32> to vector<64x32xbf16>
    %cst = arith.constant dense<0.000000e+00> : vector<19x32xf32>
    %5 = tpu.matmul %3, %4, %cst {dimension_numbers = #tpu.dot_dimension_numbers<[1], [0], [0], [1], [0, 0, 1, 1], [], []>} : vector<19x64xbf16>, vector<64x32xbf16>, vector<19x32xf32> -> vector<19x32xf32>
    %6 = arith.mulf %5, %5 : vector<19x32xf32>
    %7 = arith.mulf %5, %6 : vector<19x32xf32>
    %cst_4 = arith.constant 4.471500e-02 : f32
    %8 = vector.broadcast %cst_4 : f32 to vector<19x32xf32>
    %9 = arith.mulf %8, %7 : vector<19x32xf32>
    %10 = arith.addf %5, %9 : vector<19x32xf32>
    %cst_5 = arith.constant 0.797884583 : f32
    %11 = vector.broadcast %cst_5 : f32 to vector<19x32xf32>
    %12 = arith.mulf %11, %10 : vector<19x32xf32>
    %13 = math.tanh %12 : vector<19x32xf32>
    %cst_6 = arith.constant 1.000000e+00 : f32
    %14 = vector.broadcast %cst_6 : f32 to vector<19x32xf32>
    %15 = arith.addf %14, %13 : vector<19x32xf32>
    %cst_7 = arith.constant 5.000000e-01 : f32
    %16 = vector.broadcast %cst_7 : f32 to vector<19x32xf32>
    %17 = arith.mulf %16, %15 : vector<19x32xf32>
    %18 = arith.mulf %5, %17 : vector<19x32xf32>
    %c0_8 = arith.constant 0 : index
    %c0_9 = arith.constant 0 : index
    %19 = vector.load %arg3[%c0_8, %c0_9] : memref<1x32xf32, #tpu.memory_space<vmem>>, vector<1x32xf32>
    %c0_10 = arith.constant 0 : index
    %c0_11 = arith.constant 0 : index
    %20 = vector.load %arg4[%c0_10, %c0_11] : memref<1x32xf32, #tpu.memory_space<vmem>>, vector<1x32xf32>
    %cst_12 = arith.constant dense<0.000000e+00> : vector<19xf32>
    %21 = vector.multi_reduction <add>, %18, %cst_12 [1] : vector<19x32xf32> to vector<19xf32>
    %22 = vector.shape_cast %21 : vector<19xf32> to vector<19x1xf32>
    %cst_13 = arith.constant 3.200000e+01 : f32
    %23 = vector.broadcast %cst_13 : f32 to vector<19x1xf32>
    %24 = arith.divf %22, %23 : vector<19x1xf32>
    %25 = vector.broadcast %24 : vector<19x1xf32> to vector<19x32xf32>
    %26 = arith.subf %18, %25 : vector<19x32xf32>
    %27 = arith.mulf %26, %26 : vector<19x32xf32>
    %cst_14 = arith.constant dense<0.000000e+00> : vector<19xf32>
    %28 = vector.multi_reduction <add>, %27, %cst_14 [1] : vector<19x32xf32> to vector<19xf32>
    %29 = vector.shape_cast %28 : vector<19xf32> to vector<19x1xf32>
    %cst_15 = arith.constant 3.200000e+01 : f32
    %30 = vector.broadcast %cst_15 : f32 to vector<19x1xf32>
    %31 = arith.divf %29, %30 : vector<19x1xf32>
    %32 = vector.broadcast %24 : vector<19x1xf32> to vector<19x32xf32>
    %33 = arith.subf %18, %32 : vector<19x32xf32>
    %cst_16 = arith.constant 9.99999974E-6 : f32
    %34 = vector.broadcast %cst_16 : f32 to vector<19x1xf32>
    %35 = arith.addf %31, %34 : vector<19x1xf32>
    %36 = math.rsqrt %35 : vector<19x1xf32>
    %37 = vector.broadcast %36 : vector<19x1xf32> to vector<19x32xf32>
    %38 = arith.mulf %33, %37 : vector<19x32xf32>
    %39 = vector.broadcast %19 : vector<1x32xf32> to vector<19x32xf32>
    %40 = arith.mulf %38, %39 : vector<19x32xf32>
    %41 = vector.broadcast %20 : vector<1x32xf32> to vector<19x32xf32>
    %42 = arith.addf %40, %41 : vector<19x32xf32>
    %c0_17 = arith.constant 0 : index
    %c0_18 = arith.constant 0 : index
    %43 = vector.load %arg5[%c0_17, %c0_18] : memref<32x32xf32, #tpu.memory_space<vmem>>, vector<32x32xf32>
    %44 = arith.truncf %42 : vector<19x32xf32> to vector<19x32xbf16>
    %45 = arith.truncf %43 : vector<32x32xf32> to vector<32x32xbf16>
    %cst_19 = arith.constant dense<0.000000e+00> : vector<19x32xf32>
    %46 = tpu.matmul %44, %45, %cst_19 {dimension_numbers = #tpu.dot_dimension_numbers<[1], [0], [0], [1], [0, 0, 1, 1], [], []>} : vector<19x32xbf16>, vector<32x32xbf16>, vector<19x32xf32> -> vector<19x32xf32>
    %c0_20 = arith.constant 0 : index
    %c0_21 = arith.constant 0 : index
    %47 = vector.load %arg6[%c0_20, %c0_21] : memref<1x32xf32, #tpu.memory_space<vmem>>, vector<1x32xf32>
    %48 = vector.broadcast %47 : vector<1x32xf32> to vector<19x32xf32>
    %49 = arith.addf %46, %48 : vector<19x32xf32>
    %c0_22 = arith.constant 0 : index
    %c0_23 = arith.constant 0 : index
    %c0_24 = arith.constant 0 : index
    %50 = vector.load %arg7[%c0_22, %c0_23, %c0_24] : memref<1x19x32xf32, #tpu.memory_space<vmem>>, vector<1x19x32xf32>
    %51 = vector.shape_cast %50 : vector<1x19x32xf32> to vector<19x32xf32>
    %52 = vector.shape_cast %49 : vector<19x32xf32> to vector<1x19x32xf32>
    tpu.vector_store %arg7[%c0_22, %c0_23, %c0_24], %52 {strides = array<i32>} : memref<1x19x32xf32, #tpu.memory_space<vmem>>, vector<1x19x32xf32>,
    return
  }
  func.func @transform_0(%arg0: i32) -> (i32, i32, i32) {
    %c0_i32 = arith.constant 0 : i32
    %c0_i32_0 = arith.constant 0 : i32
    %c0_i32_1 = arith.constant 0 : i32
    return %arg0, %c0_i32, %c0_i32_0 : i32, i32, i32
  }
  func.func @transform_1(%arg0: i32) -> (i32, i32) {
    %c0_i32 = arith.constant 0 : i32
    %c0_i32_0 = arith.constant 0 : i32
    %c0_i32_1 = arith.constant 0 : i32
    return %c0_i32, %c0_i32_0 : i32, i32
  }
  func.func @transform_2(%arg0: i32) -> (i32, i32) {
    %c0_i32 = arith.constant 0 : i32
    %c0_i32_0 = arith.constant 0 : i32
    %c0_i32_1 = arith.constant 0 : i32
    return %c0_i32, %c0_i32_0 : i32, i32
  }
  func.func @transform_3(%arg0: i32) -> (i32, i32) {
    %c0_i32 = arith.constant 0 : i32
    %c0_i32_0 = arith.constant 0 : i32
    %c0_i32_1 = arith.constant 0 : i32
    return %c0_i32, %c0_i32_0 : i32, i32
  }
  func.func @transform_4(%arg0: i32) -> (i32, i32) {
    %c0_i32 = arith.constant 0 : i32
    %c0_i32_0 = arith.constant 0 : i32
    %c0_i32_1 = arith.constant 0 : i32
    return %c0_i32, %c0_i32_0 : i32, i32
  }
  func.func @transform_5(%arg0: i32) -> (i32, i32) {
    %c0_i32 = arith.constant 0 : i32
    %c0_i32_0 = arith.constant 0 : i32
    %c0_i32_1 = arith.constant 0 : i32
    return %c0_i32, %c0_i32_0 : i32, i32
  }
  func.func @transform_6(%arg0: i32) -> (i32, i32, i32) {
    %c0_i32 = arith.constant 0 : i32
    %c0_i32_0 = arith.constant 0 : i32
    %c0_i32_1 = arith.constant 0 : i32
    return %arg0, %c0_i32, %c0_i32_0 : i32, i32, i32
  }
}

module attributes {stable_mosaic.version = 11 : i64} {
  func.func @_encoder_kernel(%arg0: i32, %arg1: memref<1x22x32xf32, #tpu.memory_space<vmem>>, %arg2: memref<128x32xf32, #tpu.memory_space<vmem>>, %arg3: memref<1x32xf32, #tpu.memory_space<vmem>>, %arg4: memref<1x32xf32, #tpu.memory_space<vmem>>, %arg5: memref<1x32xf32, #tpu.memory_space<vmem>>, %arg6: memref<2x32x96xf32, #tpu.memory_space<vmem>>, %arg7: memref<2x1x96xf32, #tpu.memory_space<vmem>>, %arg8: memref<2x32x32xf32, #tpu.memory_space<vmem>>, %arg9: memref<2x1x32xf32, #tpu.memory_space<vmem>>, %arg10: memref<2x1x32xf32, #tpu.memory_space<vmem>>, %arg11: memref<2x1x32xf32, #tpu.memory_space<vmem>>, %arg12: memref<2x32x64xf32, #tpu.memory_space<vmem>>, %arg13: memref<2x1x64xf32, #tpu.memory_space<vmem>>, %arg14: memref<2x64x32xf32, #tpu.memory_space<vmem>>, %arg15: memref<2x1x32xf32, #tpu.memory_space<vmem>>, %arg16: memref<2x1x32xf32, #tpu.memory_space<vmem>>, %arg17: memref<2x1x32xf32, #tpu.memory_space<vmem>>, %arg18: memref<1x19x32xf32, #tpu.memory_space<vmem>>) attributes {dimension_semantics = [#tpu.dimension_semantics<parallel>], iteration_bounds = array<i64: 2>, scalar_prefetch = 0 : i64, scratch_operands = 0 : i64, tpu.core_type = #tpu.core_type<tc>, window_params = [{transform_indices = @transform_0, window_bounds = array<i64: 1, 22, 32>}, {pipeline_mode = #tpu.pipeline_mode<synchronous>, transform_indices = @transform_1, window_bounds = array<i64: 128, 32>}, {pipeline_mode = #tpu.pipeline_mode<synchronous>, transform_indices = @transform_2, window_bounds = array<i64: 1, 32>}, {pipeline_mode = #tpu.pipeline_mode<synchronous>, transform_indices = @transform_3, window_bounds = array<i64: 1, 32>}, {pipeline_mode = #tpu.pipeline_mode<synchronous>, transform_indices = @transform_4, window_bounds = array<i64: 1, 32>}, {pipeline_mode = #tpu.pipeline_mode<synchronous>, transform_indices = @transform_5, window_bounds = array<i64: 2, 32, 96>}, {pipeline_mode = #tpu.pipeline_mode<synchronous>, transform_indices = @transform_6, window_bounds = array<i64: 2, 1, 96>}, {pipeline_mode = #tpu.pipeline_mode<synchronous>, transform_indices = @transform_7, window_bounds = array<i64: 2, 32, 32>}, {pipeline_mode = #tpu.pipeline_mode<synchronous>, transform_indices = @transform_8, window_bounds = array<i64: 2, 1, 32>}, {pipeline_mode = #tpu.pipeline_mode<synchronous>, transform_indices = @transform_9, window_bounds = array<i64: 2, 1, 32>}, {pipeline_mode = #tpu.pipeline_mode<synchronous>, transform_indices = @transform_10, window_bounds = array<i64: 2, 1, 32>}, {pipeline_mode = #tpu.pipeline_mode<synchronous>, transform_indices = @transform_11, window_bounds = array<i64: 2, 32, 64>}, {pipeline_mode = #tpu.pipeline_mode<synchronous>, transform_indices = @transform_12, window_bounds = array<i64: 2, 1, 64>}, {pipeline_mode = #tpu.pipeline_mode<synchronous>, transform_indices = @transform_13, window_bounds = array<i64: 2, 64, 32>}, {pipeline_mode = #tpu.pipeline_mode<synchronous>, transform_indices = @transform_14, window_bounds = array<i64: 2, 1, 32>}, {pipeline_mode = #tpu.pipeline_mode<synchronous>, transform_indices = @transform_15, window_bounds = array<i64: 2, 1, 32>}, {pipeline_mode = #tpu.pipeline_mode<synchronous>, transform_indices = @transform_16, window_bounds = array<i64: 2, 1, 32>}, {transform_indices = @transform_17, window_bounds = array<i64: 1, 19, 32>}]} {
    %c0 = arith.constant 0 : index
    %c0_0 = arith.constant 0 : index
    %c0_1 = arith.constant 0 : index
    %0 = vector.load %arg1[%c0, %c0_0, %c0_1] : memref<1x22x32xf32, #tpu.memory_space<vmem>>, vector<1x22x32xf32>
    %1 = vector.shape_cast %0 : vector<1x22x32xf32> to vector<22x32xf32>
    %2 = vector.extract_strided_slice %1 {offsets = [2, 0], sizes = [19, 32], strides = [1, 1]} : vector<22x32xf32> to vector<19x32xf32>
    %3 = vector.extract_strided_slice %1 {offsets = [0, 0], sizes = [19, 32], strides = [1, 1]} : vector<22x32xf32> to vector<19x32xf32>
    %4 = vector.extract_strided_slice %1 {offsets = [1, 0], sizes = [19, 32], strides = [1, 1]} : vector<22x32xf32> to vector<19x32xf32>
    %5 = vector.extract_strided_slice %1 {offsets = [2, 0], sizes = [19, 32], strides = [1, 1]} : vector<22x32xf32> to vector<19x32xf32>
    %6 = vector.extract_strided_slice %1 {offsets = [3, 0], sizes = [19, 32], strides = [1, 1]} : vector<22x32xf32> to vector<19x32xf32>
    %7 = tpu.concatenate %3, %4, %5, %6 in 1 : vector<19x32xf32>, vector<19x32xf32>, vector<19x32xf32>, vector<19x32xf32> -> vector<19x128xf32>
    %c0_2 = arith.constant 0 : index
    %c0_3 = arith.constant 0 : index
    %8 = vector.load %arg2[%c0_2, %c0_3] : memref<128x32xf32, #tpu.memory_space<vmem>>, vector<128x32xf32>
    %9 = arith.truncf %7 : vector<19x128xf32> to vector<19x128xbf16>
    %10 = arith.truncf %8 : vector<128x32xf32> to vector<128x32xbf16>
    %cst = arith.constant dense<0.000000e+00> : vector<19x32xf32>
    %11 = tpu.matmul %9, %10, %cst {dimension_numbers = #tpu.dot_dimension_numbers<[1], [0], [0], [1], [0, 0, 1, 1], [], []>} : vector<19x128xbf16>, vector<128x32xbf16>, vector<19x32xf32> -> vector<19x32xf32>
    %c0_4 = arith.constant 0 : index
    %c0_5 = arith.constant 0 : index
    %12 = vector.load %arg3[%c0_4, %c0_5] : memref<1x32xf32, #tpu.memory_space<vmem>>, vector<1x32xf32>
    %13 = vector.broadcast %12 : vector<1x32xf32> to vector<19x32xf32>
    %14 = arith.addf %11, %13 : vector<19x32xf32>
    %15 = arith.mulf %14, %14 : vector<19x32xf32>
    %16 = arith.mulf %14, %15 : vector<19x32xf32>
    %cst_6 = arith.constant 4.471500e-02 : f32
    %17 = vector.broadcast %cst_6 : f32 to vector<19x32xf32>
    %18 = arith.mulf %17, %16 : vector<19x32xf32>
    %19 = arith.addf %14, %18 : vector<19x32xf32>
    %cst_7 = arith.constant 0.797884583 : f32
    %20 = vector.broadcast %cst_7 : f32 to vector<19x32xf32>
    %21 = arith.mulf %20, %19 : vector<19x32xf32>
    %22 = math.tanh %21 : vector<19x32xf32>
    %cst_8 = arith.constant 1.000000e+00 : f32
    %23 = vector.broadcast %cst_8 : f32 to vector<19x32xf32>
    %24 = arith.addf %23, %22 : vector<19x32xf32>
    %cst_9 = arith.constant 5.000000e-01 : f32
    %25 = vector.broadcast %cst_9 : f32 to vector<19x32xf32>
    %26 = arith.mulf %25, %24 : vector<19x32xf32>
    %27 = arith.mulf %14, %26 : vector<19x32xf32>
    %28 = arith.addf %2, %27 : vector<19x32xf32>
    %c0_10 = arith.constant 0 : index
    %c0_11 = arith.constant 0 : index
    %29 = vector.load %arg4[%c0_10, %c0_11] : memref<1x32xf32, #tpu.memory_space<vmem>>, vector<1x32xf32>
    %c0_12 = arith.constant 0 : index
    %c0_13 = arith.constant 0 : index
    %30 = vector.load %arg5[%c0_12, %c0_13] : memref<1x32xf32, #tpu.memory_space<vmem>>, vector<1x32xf32>
    %cst_14 = arith.constant dense<0.000000e+00> : vector<19xf32>
    %31 = vector.multi_reduction <add>, %28, %cst_14 [1] : vector<19x32xf32> to vector<19xf32>
    %32 = vector.shape_cast %31 : vector<19xf32> to vector<19x1xf32>
    %cst_15 = arith.constant 3.200000e+01 : f32
    %33 = vector.broadcast %cst_15 : f32 to vector<19x1xf32>
    %34 = arith.divf %32, %33 : vector<19x1xf32>
    %35 = vector.broadcast %34 : vector<19x1xf32> to vector<19x32xf32>
    %36 = arith.subf %28, %35 : vector<19x32xf32>
    %37 = arith.mulf %36, %36 : vector<19x32xf32>
    %cst_16 = arith.constant dense<0.000000e+00> : vector<19xf32>
    %38 = vector.multi_reduction <add>, %37, %cst_16 [1] : vector<19x32xf32> to vector<19xf32>
    %39 = vector.shape_cast %38 : vector<19xf32> to vector<19x1xf32>
    %cst_17 = arith.constant 3.200000e+01 : f32
    %40 = vector.broadcast %cst_17 : f32 to vector<19x1xf32>
    %41 = arith.divf %39, %40 : vector<19x1xf32>
    %42 = vector.broadcast %34 : vector<19x1xf32> to vector<19x32xf32>
    %43 = arith.subf %28, %42 : vector<19x32xf32>
    %cst_18 = arith.constant 9.99999974E-6 : f32
    %44 = vector.broadcast %cst_18 : f32 to vector<19x1xf32>
    %45 = arith.addf %41, %44 : vector<19x1xf32>
    %46 = math.rsqrt %45 : vector<19x1xf32>
    %47 = vector.broadcast %46 : vector<19x1xf32> to vector<19x32xf32>
    %48 = arith.mulf %43, %47 : vector<19x32xf32>
    %49 = vector.broadcast %29 : vector<1x32xf32> to vector<19x32xf32>
    %50 = arith.mulf %48, %49 : vector<19x32xf32>
    %51 = vector.broadcast %30 : vector<1x32xf32> to vector<19x32xf32>
    %52 = arith.addf %50, %51 : vector<19x32xf32>
    %c0_19 = arith.constant 0 : index
    %c0_20 = arith.constant 0 : index
    %c0_21 = arith.constant 0 : index
    %53 = vector.load %arg6[%c0_19, %c0_20, %c0_21] : memref<2x32x96xf32, #tpu.memory_space<vmem>>, vector<1x32x96xf32>
    %54 = vector.shape_cast %53 : vector<1x32x96xf32> to vector<32x96xf32>
    %55 = arith.truncf %52 : vector<19x32xf32> to vector<19x32xbf16>
    %56 = arith.truncf %54 : vector<32x96xf32> to vector<32x96xbf16>
    %cst_22 = arith.constant dense<0.000000e+00> : vector<19x96xf32>
    %57 = tpu.matmul %55, %56, %cst_22 {dimension_numbers = #tpu.dot_dimension_numbers<[1], [0], [0], [1], [0, 0, 1, 1], [], []>} : vector<19x32xbf16>, vector<32x96xbf16>, vector<19x96xf32> -> vector<19x96xf32>
    %c0_23 = arith.constant 0 : index
    %c0_24 = arith.constant 0 : index
    %c0_25 = arith.constant 0 : index
    %58 = vector.load %arg7[%c0_23, %c0_24, %c0_25] : memref<2x1x96xf32, #tpu.memory_space<vmem>>, vector<1x1x96xf32>
    %59 = vector.shape_cast %58 : vector<1x1x96xf32> to vector<1x96xf32>
    %60 = vector.broadcast %59 : vector<1x96xf32> to vector<19x96xf32>
    %61 = arith.addf %57, %60 : vector<19x96xf32>
    %62 = vector.extract_strided_slice %61 {offsets = [0, 0], sizes = [19, 32], strides = [1, 1]} : vector<19x96xf32> to vector<19x32xf32>
    %cst_26 = arith.constant 0.353553385 : f32
    %63 = vector.broadcast %cst_26 : f32 to vector<19x32xf32>
    %64 = arith.mulf %62, %63 : vector<19x32xf32>
    %65 = vector.extract_strided_slice %61 {offsets = [0, 32], sizes = [19, 32], strides = [1, 1]} : vector<19x96xf32> to vector<19x32xf32>
    %66 = vector.extract_strided_slice %61 {offsets = [0, 64], sizes = [19, 32], strides = [1, 1]} : vector<19x96xf32> to vector<19x32xf32>
    %67 = vector.extract_strided_slice %64 {offsets = [0, 0], sizes = [19, 8], strides = [1, 1]} : vector<19x32xf32> to vector<19x8xf32>
    %68 = vector.extract_strided_slice %64 {offsets = [0, 8], sizes = [19, 8], strides = [1, 1]} : vector<19x32xf32> to vector<19x8xf32>
    %69 = vector.extract_strided_slice %64 {offsets = [0, 16], sizes = [19, 8], strides = [1, 1]} : vector<19x32xf32> to vector<19x8xf32>
    %70 = vector.extract_strided_slice %64 {offsets = [0, 24], sizes = [19, 8], strides = [1, 1]} : vector<19x32xf32> to vector<19x8xf32>
    %71 = vector.shape_cast %67 : vector<19x8xf32> to vector<1x19x8xf32>
    %72 = vector.shape_cast %68 : vector<19x8xf32> to vector<1x19x8xf32>
    %73 = vector.shape_cast %69 : vector<19x8xf32> to vector<1x19x8xf32>
    %74 = vector.shape_cast %70 : vector<19x8xf32> to vector<1x19x8xf32>
    %75 = tpu.concatenate %71, %72, %73, %74 in 0 : vector<1x19x8xf32>, vector<1x19x8xf32>, vector<1x19x8xf32>, vector<1x19x8xf32> -> vector<4x19x8xf32>
    %76 = arith.truncf %75 : vector<4x19x8xf32> to vector<4x19x8xbf16>
    %77 = vector.extract_strided_slice %65 {offsets = [0, 0], sizes = [19, 8], strides = [1, 1]} : vector<19x32xf32> to vector<19x8xf32>
    %78 = vector.extract_strided_slice %65 {offsets = [0, 8], sizes = [19, 8], strides = [1, 1]} : vector<19x32xf32> to vector<19x8xf32>
    %79 = vector.extract_strided_slice %65 {offsets = [0, 16], sizes = [19, 8], strides = [1, 1]} : vector<19x32xf32> to vector<19x8xf32>
    %80 = vector.extract_strided_slice %65 {offsets = [0, 24], sizes = [19, 8], strides = [1, 1]} : vector<19x32xf32> to vector<19x8xf32>
    %81 = vector.shape_cast %77 : vector<19x8xf32> to vector<1x19x8xf32>
    %82 = vector.shape_cast %78 : vector<19x8xf32> to vector<1x19x8xf32>
    %83 = vector.shape_cast %79 : vector<19x8xf32> to vector<1x19x8xf32>
    %84 = vector.shape_cast %80 : vector<19x8xf32> to vector<1x19x8xf32>
    %85 = tpu.concatenate %81, %82, %83, %84 in 0 : vector<1x19x8xf32>, vector<1x19x8xf32>, vector<1x19x8xf32>, vector<1x19x8xf32> -> vector<4x19x8xf32>
    %86 = arith.truncf %85 : vector<4x19x8xf32> to vector<4x19x8xbf16>
    %87 = vector.extract_strided_slice %66 {offsets = [0, 0], sizes = [19, 8], strides = [1, 1]} : vector<19x32xf32> to vector<19x8xf32>
    %88 = vector.extract_strided_slice %66 {offsets = [0, 8], sizes = [19, 8], strides = [1, 1]} : vector<19x32xf32> to vector<19x8xf32>
    %89 = vector.extract_strided_slice %66 {offsets = [0, 16], sizes = [19, 8], strides = [1, 1]} : vector<19x32xf32> to vector<19x8xf32>
    %90 = vector.extract_strided_slice %66 {offsets = [0, 24], sizes = [19, 8], strides = [1, 1]} : vector<19x32xf32> to vector<19x8xf32>
    %91 = vector.shape_cast %87 : vector<19x8xf32> to vector<1x19x8xf32>
    %92 = vector.shape_cast %88 : vector<19x8xf32> to vector<1x19x8xf32>
    %93 = vector.shape_cast %89 : vector<19x8xf32> to vector<1x19x8xf32>
    %94 = vector.shape_cast %90 : vector<19x8xf32> to vector<1x19x8xf32>
    %95 = tpu.concatenate %91, %92, %93, %94 in 0 : vector<1x19x8xf32>, vector<1x19x8xf32>, vector<1x19x8xf32>, vector<1x19x8xf32> -> vector<4x19x8xf32>
    %96 = arith.truncf %95 : vector<4x19x8xf32> to vector<4x19x8xbf16>
    "tpu.trace_start"() <{level = 10 : i32, message = "nqd,nkd->nqk"}> : () -> ()
    %cst_27 = arith.constant dense<0.000000e+00> : vector<4x19x19xf32>
    %97 = tpu.matmul %76, %86, %cst_27 {dimension_numbers = #tpu.dot_dimension_numbers<[2], [2], [1], [1], [0, 0, 0, 1, 1, 1], [0], [0]>} : vector<4x19x8xbf16>, vector<4x19x8xbf16>, vector<4x19x19xf32> -> vector<4x19x19xf32>
    "tpu.trace_stop"() : () -> ()
    %cst_28 = arith.constant dense<0xFF800000> : vector<4x19xf32>
    %98 = vector.multi_reduction <maximumf>, %97, %cst_28 [2] : vector<4x19x19xf32> to vector<4x19xf32>
    %99 = vector.shape_cast %98 : vector<4x19xf32> to vector<4x19x1xf32>
    %100 = vector.broadcast %99 : vector<4x19x1xf32> to vector<4x19x19xf32>
    %101 = arith.subf %97, %100 : vector<4x19x19xf32>
    %102 = math.exp %101 : vector<4x19x19xf32>
    %cst_29 = arith.constant dense<0.000000e+00> : vector<4x19xf32>
    %103 = vector.multi_reduction <add>, %102, %cst_29 [2] : vector<4x19x19xf32> to vector<4x19xf32>
    %104 = vector.shape_cast %103 : vector<4x19xf32> to vector<4x19x1xf32>
    %105 = tpu.reciprocal %104 {approx = true} : vector<4x19x1xf32> -> vector<4x19x1xf32>
    %106 = vector.broadcast %105 : vector<4x19x1xf32> to vector<4x19x19xf32>
    %107 = arith.mulf %102, %106 : vector<4x19x19xf32>
    %108 = arith.truncf %107 : vector<4x19x19xf32> to vector<4x19x19xbf16>
    "tpu.trace_start"() <{level = 10 : i32, message = "nqk,nkd->nqd"}> : () -> ()
    %cst_30 = arith.constant dense<0.000000e+00> : vector<4x19x8xf32>
    %109 = tpu.matmul %108, %96, %cst_30 {dimension_numbers = #tpu.dot_dimension_numbers<[2], [1], [1], [2], [0, 0, 0, 1, 1, 2], [0], [0]>} : vector<4x19x19xbf16>, vector<4x19x8xbf16>, vector<4x19x8xf32> -> vector<4x19x8xf32>
    "tpu.trace_stop"() : () -> ()
    %110 = vector.extract_strided_slice %109 {offsets = [0, 0, 0], sizes = [1, 19, 8], strides = [1, 1, 1]} : vector<4x19x8xf32> to vector<1x19x8xf32>
    %111 = vector.shape_cast %110 : vector<1x19x8xf32> to vector<19x8xf32>
    %112 = vector.extract_strided_slice %109 {offsets = [1, 0, 0], sizes = [1, 19, 8], strides = [1, 1, 1]} : vector<4x19x8xf32> to vector<1x19x8xf32>
    %113 = vector.shape_cast %112 : vector<1x19x8xf32> to vector<19x8xf32>
    %114 = vector.extract_strided_slice %109 {offsets = [2, 0, 0], sizes = [1, 19, 8], strides = [1, 1, 1]} : vector<4x19x8xf32> to vector<1x19x8xf32>
    %115 = vector.shape_cast %114 : vector<1x19x8xf32> to vector<19x8xf32>
    %116 = vector.extract_strided_slice %109 {offsets = [3, 0, 0], sizes = [1, 19, 8], strides = [1, 1, 1]} : vector<4x19x8xf32> to vector<1x19x8xf32>
    %117 = vector.shape_cast %116 : vector<1x19x8xf32> to vector<19x8xf32>
    %118 = tpu.concatenate %111, %113, %115, %117 in 1 : vector<19x8xf32>, vector<19x8xf32>, vector<19x8xf32>, vector<19x8xf32> -> vector<19x32xf32>
    %c0_31 = arith.constant 0 : index
    %c0_32 = arith.constant 0 : index
    %c0_33 = arith.constant 0 : index
    %119 = vector.load %arg8[%c0_31, %c0_32, %c0_33] : memref<2x32x32xf32, #tpu.memory_space<vmem>>, vector<1x32x32xf32>
    %120 = vector.shape_cast %119 : vector<1x32x32xf32> to vector<32x32xf32>
    %121 = arith.truncf %118 : vector<19x32xf32> to vector<19x32xbf16>
    %122 = arith.truncf %120 : vector<32x32xf32> to vector<32x32xbf16>
    %cst_34 = arith.constant dense<0.000000e+00> : vector<19x32xf32>
    %123 = tpu.matmul %121, %122, %cst_34 {dimension_numbers = #tpu.dot_dimension_numbers<[1], [0], [0], [1], [0, 0, 1, 1], [], []>} : vector<19x32xbf16>, vector<32x32xbf16>, vector<19x32xf32> -> vector<19x32xf32>
    %124 = arith.addf %52, %123 : vector<19x32xf32>
    %c0_35 = arith.constant 0 : index
    %c0_36 = arith.constant 0 : index
    %c0_37 = arith.constant 0 : index
    %125 = vector.load %arg9[%c0_35, %c0_36, %c0_37] : memref<2x1x32xf32, #tpu.memory_space<vmem>>, vector<1x1x32xf32>
    %126 = vector.shape_cast %125 : vector<1x1x32xf32> to vector<1x32xf32>
    %127 = vector.broadcast %126 : vector<1x32xf32> to vector<19x32xf32>
    %128 = arith.addf %124, %127 : vector<19x32xf32>
    %c0_38 = arith.constant 0 : index
    %c0_39 = arith.constant 0 : index
    %c0_40 = arith.constant 0 : index
    %129 = vector.load %arg10[%c0_38, %c0_39, %c0_40] : memref<2x1x32xf32, #tpu.memory_space<vmem>>, vector<1x1x32xf32>
    %130 = vector.shape_cast %129 : vector<1x1x32xf32> to vector<1x32xf32>
    %c0_41 = arith.constant 0 : index
    %c0_42 = arith.constant 0 : index
    %c0_43 = arith.constant 0 : index
    %131 = vector.load %arg11[%c0_41, %c0_42, %c0_43] : memref<2x1x32xf32, #tpu.memory_space<vmem>>, vector<1x1x32xf32>
    %132 = vector.shape_cast %131 : vector<1x1x32xf32> to vector<1x32xf32>
    %cst_44 = arith.constant dense<0.000000e+00> : vector<19xf32>
    %133 = vector.multi_reduction <add>, %128, %cst_44 [1] : vector<19x32xf32> to vector<19xf32>
    %134 = vector.shape_cast %133 : vector<19xf32> to vector<19x1xf32>
    %cst_45 = arith.constant 3.200000e+01 : f32
    %135 = vector.broadcast %cst_45 : f32 to vector<19x1xf32>
    %136 = arith.divf %134, %135 : vector<19x1xf32>
    %137 = vector.broadcast %136 : vector<19x1xf32> to vector<19x32xf32>
    %138 = arith.subf %128, %137 : vector<19x32xf32>
    %139 = arith.mulf %138, %138 : vector<19x32xf32>
    %cst_46 = arith.constant dense<0.000000e+00> : vector<19xf32>
    %140 = vector.multi_reduction <add>, %139, %cst_46 [1] : vector<19x32xf32> to vector<19xf32>
    %141 = vector.shape_cast %140 : vector<19xf32> to vector<19x1xf32>
    %cst_47 = arith.constant 3.200000e+01 : f32
    %142 = vector.broadcast %cst_47 : f32 to vector<19x1xf32>
    %143 = arith.divf %141, %142 : vector<19x1xf32>
    %144 = vector.broadcast %136 : vector<19x1xf32> to vector<19x32xf32>
    %145 = arith.subf %128, %144 : vector<19x32xf32>
    %cst_48 = arith.constant 9.99999974E-6 : f32
    %146 = vector.broadcast %cst_48 : f32 to vector<19x1xf32>
    %147 = arith.addf %143, %146 : vector<19x1xf32>
    %148 = math.rsqrt %147 : vector<19x1xf32>
    %149 = vector.broadcast %148 : vector<19x1xf32> to vector<19x32xf32>
    %150 = arith.mulf %145, %149 : vector<19x32xf32>
    %151 = vector.broadcast %130 : vector<1x32xf32> to vector<19x32xf32>
    %152 = arith.mulf %150, %151 : vector<19x32xf32>
    %153 = vector.broadcast %132 : vector<1x32xf32> to vector<19x32xf32>
    %154 = arith.addf %152, %153 : vector<19x32xf32>
    %c0_49 = arith.constant 0 : index
    %c0_50 = arith.constant 0 : index
    %c0_51 = arith.constant 0 : index
    %155 = vector.load %arg12[%c0_49, %c0_50, %c0_51] : memref<2x32x64xf32, #tpu.memory_space<vmem>>, vector<1x32x64xf32>
    %156 = vector.shape_cast %155 : vector<1x32x64xf32> to vector<32x64xf32>
    %157 = arith.truncf %154 : vector<19x32xf32> to vector<19x32xbf16>
    %158 = arith.truncf %156 : vector<32x64xf32> to vector<32x64xbf16>
    %cst_52 = arith.constant dense<0.000000e+00> : vector<19x64xf32>
    %159 = tpu.matmul %157, %158, %cst_52 {dimension_numbers = #tpu.dot_dimension_numbers<[1], [0], [0], [1], [0, 0, 1, 1], [], []>} : vector<19x32xbf16>, vector<32x64xbf16>, vector<19x64xf32> -> vector<19x64xf32>
    %c0_53 = arith.constant 0 : index
    %c0_54 = arith.constant 0 : index
    %c0_55 = arith.constant 0 : index
    %160 = vector.load %arg13[%c0_53, %c0_54, %c0_55] : memref<2x1x64xf32, #tpu.memory_space<vmem>>, vector<1x1x64xf32>
    %161 = vector.shape_cast %160 : vector<1x1x64xf32> to vector<1x64xf32>
    %162 = vector.broadcast %161 : vector<1x64xf32> to vector<19x64xf32>
    %163 = arith.addf %159, %162 : vector<19x64xf32>
    %164 = arith.mulf %163, %163 : vector<19x64xf32>
    %165 = arith.mulf %163, %164 : vector<19x64xf32>
    %cst_56 = arith.constant 4.471500e-02 : f32
    %166 = vector.broadcast %cst_56 : f32 to vector<19x64xf32>
    %167 = arith.mulf %166, %165 : vector<19x64xf32>
    %168 = arith.addf %163, %167 : vector<19x64xf32>
    %cst_57 = arith.constant 0.797884583 : f32
    %169 = vector.broadcast %cst_57 : f32 to vector<19x64xf32>
    %170 = arith.mulf %169, %168 : vector<19x64xf32>
    %171 = math.tanh %170 : vector<19x64xf32>
    %cst_58 = arith.constant 1.000000e+00 : f32
    %172 = vector.broadcast %cst_58 : f32 to vector<19x64xf32>
    %173 = arith.addf %172, %171 : vector<19x64xf32>
    %cst_59 = arith.constant 5.000000e-01 : f32
    %174 = vector.broadcast %cst_59 : f32 to vector<19x64xf32>
    %175 = arith.mulf %174, %173 : vector<19x64xf32>
    %176 = arith.mulf %163, %175 : vector<19x64xf32>
    %c0_60 = arith.constant 0 : index
    %c0_61 = arith.constant 0 : index
    %c0_62 = arith.constant 0 : index
    %177 = vector.load %arg14[%c0_60, %c0_61, %c0_62] : memref<2x64x32xf32, #tpu.memory_space<vmem>>, vector<1x64x32xf32>
    %178 = vector.shape_cast %177 : vector<1x64x32xf32> to vector<64x32xf32>
    %179 = arith.truncf %176 : vector<19x64xf32> to vector<19x64xbf16>
    %180 = arith.truncf %178 : vector<64x32xf32> to vector<64x32xbf16>
    %cst_63 = arith.constant dense<0.000000e+00> : vector<19x32xf32>
    %181 = tpu.matmul %179, %180, %cst_63 {dimension_numbers = #tpu.dot_dimension_numbers<[1], [0], [0], [1], [0, 0, 1, 1], [], []>} : vector<19x64xbf16>, vector<64x32xbf16>, vector<19x32xf32> -> vector<19x32xf32>
    %182 = arith.addf %154, %181 : vector<19x32xf32>
    %c0_64 = arith.constant 0 : index
    %c0_65 = arith.constant 0 : index
    %c0_66 = arith.constant 0 : index
    %183 = vector.load %arg15[%c0_64, %c0_65, %c0_66] : memref<2x1x32xf32, #tpu.memory_space<vmem>>, vector<1x1x32xf32>
    %184 = vector.shape_cast %183 : vector<1x1x32xf32> to vector<1x32xf32>
    %185 = vector.broadcast %184 : vector<1x32xf32> to vector<19x32xf32>
    %186 = arith.addf %182, %185 : vector<19x32xf32>
    %c0_67 = arith.constant 0 : index
    %c0_68 = arith.constant 0 : index
    %c0_69 = arith.constant 0 : index
    %187 = vector.load %arg16[%c0_67, %c0_68, %c0_69] : memref<2x1x32xf32, #tpu.memory_space<vmem>>, vector<1x1x32xf32>
    %188 = vector.shape_cast %187 : vector<1x1x32xf32> to vector<1x32xf32>
    %c0_70 = arith.constant 0 : index
    %c0_71 = arith.constant 0 : index
    %c0_72 = arith.constant 0 : index
    %189 = vector.load %arg17[%c0_70, %c0_71, %c0_72] : memref<2x1x32xf32, #tpu.memory_space<vmem>>, vector<1x1x32xf32>
    %190 = vector.shape_cast %189 : vector<1x1x32xf32> to vector<1x32xf32>
    %cst_73 = arith.constant dense<0.000000e+00> : vector<19xf32>
    %191 = vector.multi_reduction <add>, %186, %cst_73 [1] : vector<19x32xf32> to vector<19xf32>
    %192 = vector.shape_cast %191 : vector<19xf32> to vector<19x1xf32>
    %cst_74 = arith.constant 3.200000e+01 : f32
    %193 = vector.broadcast %cst_74 : f32 to vector<19x1xf32>
    %194 = arith.divf %192, %193 : vector<19x1xf32>
    %195 = vector.broadcast %194 : vector<19x1xf32> to vector<19x32xf32>
    %196 = arith.subf %186, %195 : vector<19x32xf32>
    %197 = arith.mulf %196, %196 : vector<19x32xf32>
    %cst_75 = arith.constant dense<0.000000e+00> : vector<19xf32>
    %198 = vector.multi_reduction <add>, %197, %cst_75 [1] : vector<19x32xf32> to vector<19xf32>
    %199 = vector.shape_cast %198 : vector<19xf32> to vector<19x1xf32>
    %cst_76 = arith.constant 3.200000e+01 : f32
    %200 = vector.broadcast %cst_76 : f32 to vector<19x1xf32>
    %201 = arith.divf %199, %200 : vector<19x1xf32>
    %202 = vector.broadcast %194 : vector<19x1xf32> to vector<19x32xf32>
    %203 = arith.subf %186, %202 : vector<19x32xf32>
    %cst_77 = arith.constant 9.99999974E-6 : f32
    %204 = vector.broadcast %cst_77 : f32 to vector<19x1xf32>
    %205 = arith.addf %201, %204 : vector<19x1xf32>
    %206 = math.rsqrt %205 : vector<19x1xf32>
    %207 = vector.broadcast %206 : vector<19x1xf32> to vector<19x32xf32>
    %208 = arith.mulf %203, %207 : vector<19x32xf32>
    %209 = vector.broadcast %188 : vector<1x32xf32> to vector<19x32xf32>
    %210 = arith.mulf %208, %209 : vector<19x32xf32>
    %211 = vector.broadcast %190 : vector<1x32xf32> to vector<19x32xf32>
    %212 = arith.addf %210, %211 : vector<19x32xf32>
    %c1 = arith.constant 1 : index
    %c0_78 = arith.constant 0 : index
    %c0_79 = arith.constant 0 : index
    %213 = vector.load %arg6[%c1, %c0_78, %c0_79] : memref<2x32x96xf32, #tpu.memory_space<vmem>>, vector<1x32x96xf32>
    %214 = vector.shape_cast %213 : vector<1x32x96xf32> to vector<32x96xf32>
    %215 = arith.truncf %212 : vector<19x32xf32> to vector<19x32xbf16>
    %216 = arith.truncf %214 : vector<32x96xf32> to vector<32x96xbf16>
    %cst_80 = arith.constant dense<0.000000e+00> : vector<19x96xf32>
    %217 = tpu.matmul %215, %216, %cst_80 {dimension_numbers = #tpu.dot_dimension_numbers<[1], [0], [0], [1], [0, 0, 1, 1], [], []>} : vector<19x32xbf16>, vector<32x96xbf16>, vector<19x96xf32> -> vector<19x96xf32>
    %c1_81 = arith.constant 1 : index
    %c0_82 = arith.constant 0 : index
    %c0_83 = arith.constant 0 : index
    %218 = vector.load %arg7[%c1_81, %c0_82, %c0_83] : memref<2x1x96xf32, #tpu.memory_space<vmem>>, vector<1x1x96xf32>
    %219 = vector.shape_cast %218 : vector<1x1x96xf32> to vector<1x96xf32>
    %220 = vector.broadcast %219 : vector<1x96xf32> to vector<19x96xf32>
    %221 = arith.addf %217, %220 : vector<19x96xf32>
    %222 = vector.extract_strided_slice %221 {offsets = [0, 0], sizes = [19, 32], strides = [1, 1]} : vector<19x96xf32> to vector<19x32xf32>
    %cst_84 = arith.constant 0.353553385 : f32
    %223 = vector.broadcast %cst_84 : f32 to vector<19x32xf32>
    %224 = arith.mulf %222, %223 : vector<19x32xf32>
    %225 = vector.extract_strided_slice %221 {offsets = [0, 32], sizes = [19, 32], strides = [1, 1]} : vector<19x96xf32> to vector<19x32xf32>
    %226 = vector.extract_strided_slice %221 {offsets = [0, 64], sizes = [19, 32], strides = [1, 1]} : vector<19x96xf32> to vector<19x32xf32>
    %227 = vector.extract_strided_slice %224 {offsets = [0, 0], sizes = [19, 8], strides = [1, 1]} : vector<19x32xf32> to vector<19x8xf32>
    %228 = vector.extract_strided_slice %224 {offsets = [0, 8], sizes = [19, 8], strides = [1, 1]} : vector<19x32xf32> to vector<19x8xf32>
    %229 = vector.extract_strided_slice %224 {offsets = [0, 16], sizes = [19, 8], strides = [1, 1]} : vector<19x32xf32> to vector<19x8xf32>
    %230 = vector.extract_strided_slice %224 {offsets = [0, 24], sizes = [19, 8], strides = [1, 1]} : vector<19x32xf32> to vector<19x8xf32>
    %231 = vector.shape_cast %227 : vector<19x8xf32> to vector<1x19x8xf32>
    %232 = vector.shape_cast %228 : vector<19x8xf32> to vector<1x19x8xf32>
    %233 = vector.shape_cast %229 : vector<19x8xf32> to vector<1x19x8xf32>
    %234 = vector.shape_cast %230 : vector<19x8xf32> to vector<1x19x8xf32>
    %235 = tpu.concatenate %231, %232, %233, %234 in 0 : vector<1x19x8xf32>, vector<1x19x8xf32>, vector<1x19x8xf32>, vector<1x19x8xf32> -> vector<4x19x8xf32>
    %236 = arith.truncf %235 : vector<4x19x8xf32> to vector<4x19x8xbf16>
    %237 = vector.extract_strided_slice %225 {offsets = [0, 0], sizes = [19, 8], strides = [1, 1]} : vector<19x32xf32> to vector<19x8xf32>
    %238 = vector.extract_strided_slice %225 {offsets = [0, 8], sizes = [19, 8], strides = [1, 1]} : vector<19x32xf32> to vector<19x8xf32>
    %239 = vector.extract_strided_slice %225 {offsets = [0, 16], sizes = [19, 8], strides = [1, 1]} : vector<19x32xf32> to vector<19x8xf32>
    %240 = vector.extract_strided_slice %225 {offsets = [0, 24], sizes = [19, 8], strides = [1, 1]} : vector<19x32xf32> to vector<19x8xf32>
    %241 = vector.shape_cast %237 : vector<19x8xf32> to vector<1x19x8xf32>
    %242 = vector.shape_cast %238 : vector<19x8xf32> to vector<1x19x8xf32>
    %243 = vector.shape_cast %239 : vector<19x8xf32> to vector<1x19x8xf32>
    %244 = vector.shape_cast %240 : vector<19x8xf32> to vector<1x19x8xf32>
    %245 = tpu.concatenate %241, %242, %243, %244 in 0 : vector<1x19x8xf32>, vector<1x19x8xf32>, vector<1x19x8xf32>, vector<1x19x8xf32> -> vector<4x19x8xf32>
    %246 = arith.truncf %245 : vector<4x19x8xf32> to vector<4x19x8xbf16>
    %247 = vector.extract_strided_slice %226 {offsets = [0, 0], sizes = [19, 8], strides = [1, 1]} : vector<19x32xf32> to vector<19x8xf32>
    %248 = vector.extract_strided_slice %226 {offsets = [0, 8], sizes = [19, 8], strides = [1, 1]} : vector<19x32xf32> to vector<19x8xf32>
    %249 = vector.extract_strided_slice %226 {offsets = [0, 16], sizes = [19, 8], strides = [1, 1]} : vector<19x32xf32> to vector<19x8xf32>
    %250 = vector.extract_strided_slice %226 {offsets = [0, 24], sizes = [19, 8], strides = [1, 1]} : vector<19x32xf32> to vector<19x8xf32>
    %251 = vector.shape_cast %247 : vector<19x8xf32> to vector<1x19x8xf32>
    %252 = vector.shape_cast %248 : vector<19x8xf32> to vector<1x19x8xf32>
    %253 = vector.shape_cast %249 : vector<19x8xf32> to vector<1x19x8xf32>
    %254 = vector.shape_cast %250 : vector<19x8xf32> to vector<1x19x8xf32>
    %255 = tpu.concatenate %251, %252, %253, %254 in 0 : vector<1x19x8xf32>, vector<1x19x8xf32>, vector<1x19x8xf32>, vector<1x19x8xf32> -> vector<4x19x8xf32>
    %256 = arith.truncf %255 : vector<4x19x8xf32> to vector<4x19x8xbf16>
    "tpu.trace_start"() <{level = 10 : i32, message = "nqd,nkd->nqk"}> : () -> ()
    %cst_85 = arith.constant dense<0.000000e+00> : vector<4x19x19xf32>
    %257 = tpu.matmul %236, %246, %cst_85 {dimension_numbers = #tpu.dot_dimension_numbers<[2], [2], [1], [1], [0, 0, 0, 1, 1, 1], [0], [0]>} : vector<4x19x8xbf16>, vector<4x19x8xbf16>, vector<4x19x19xf32> -> vector<4x19x19xf32>
    "tpu.trace_stop"() : () -> ()
    %cst_86 = arith.constant dense<0xFF800000> : vector<4x19xf32>
    %258 = vector.multi_reduction <maximumf>, %257, %cst_86 [2] : vector<4x19x19xf32> to vector<4x19xf32>
    %259 = vector.shape_cast %258 : vector<4x19xf32> to vector<4x19x1xf32>
    %260 = vector.broadcast %259 : vector<4x19x1xf32> to vector<4x19x19xf32>
    %261 = arith.subf %257, %260 : vector<4x19x19xf32>
    %262 = math.exp %261 : vector<4x19x19xf32>
    %cst_87 = arith.constant dense<0.000000e+00> : vector<4x19xf32>
    %263 = vector.multi_reduction <add>, %262, %cst_87 [2] : vector<4x19x19xf32> to vector<4x19xf32>
    %264 = vector.shape_cast %263 : vector<4x19xf32> to vector<4x19x1xf32>
    %265 = tpu.reciprocal %264 {approx = true} : vector<4x19x1xf32> -> vector<4x19x1xf32>
    %266 = vector.broadcast %265 : vector<4x19x1xf32> to vector<4x19x19xf32>
    %267 = arith.mulf %262, %266 : vector<4x19x19xf32>
    %268 = arith.truncf %267 : vector<4x19x19xf32> to vector<4x19x19xbf16>
    "tpu.trace_start"() <{level = 10 : i32, message = "nqk,nkd->nqd"}> : () -> ()
    %cst_88 = arith.constant dense<0.000000e+00> : vector<4x19x8xf32>
    %269 = tpu.matmul %268, %256, %cst_88 {dimension_numbers = #tpu.dot_dimension_numbers<[2], [1], [1], [2], [0, 0, 0, 1, 1, 2], [0], [0]>} : vector<4x19x19xbf16>, vector<4x19x8xbf16>, vector<4x19x8xf32> -> vector<4x19x8xf32>
    "tpu.trace_stop"() : () -> ()
    %270 = vector.extract_strided_slice %269 {offsets = [0, 0, 0], sizes = [1, 19, 8], strides = [1, 1, 1]} : vector<4x19x8xf32> to vector<1x19x8xf32>
    %271 = vector.shape_cast %270 : vector<1x19x8xf32> to vector<19x8xf32>
    %272 = vector.extract_strided_slice %269 {offsets = [1, 0, 0], sizes = [1, 19, 8], strides = [1, 1, 1]} : vector<4x19x8xf32> to vector<1x19x8xf32>
    %273 = vector.shape_cast %272 : vector<1x19x8xf32> to vector<19x8xf32>
    %274 = vector.extract_strided_slice %269 {offsets = [2, 0, 0], sizes = [1, 19, 8], strides = [1, 1, 1]} : vector<4x19x8xf32> to vector<1x19x8xf32>
    %275 = vector.shape_cast %274 : vector<1x19x8xf32> to vector<19x8xf32>
    %276 = vector.extract_strided_slice %269 {offsets = [3, 0, 0], sizes = [1, 19, 8], strides = [1, 1, 1]} : vector<4x19x8xf32> to vector<1x19x8xf32>
    %277 = vector.shape_cast %276 : vector<1x19x8xf32> to vector<19x8xf32>
    %278 = tpu.concatenate %271, %273, %275, %277 in 1 : vector<19x8xf32>, vector<19x8xf32>, vector<19x8xf32>, vector<19x8xf32> -> vector<19x32xf32>
    %c1_89 = arith.constant 1 : index
    %c0_90 = arith.constant 0 : index
    %c0_91 = arith.constant 0 : index
    %279 = vector.load %arg8[%c1_89, %c0_90, %c0_91] : memref<2x32x32xf32, #tpu.memory_space<vmem>>, vector<1x32x32xf32>
    %280 = vector.shape_cast %279 : vector<1x32x32xf32> to vector<32x32xf32>
    %281 = arith.truncf %278 : vector<19x32xf32> to vector<19x32xbf16>
    %282 = arith.truncf %280 : vector<32x32xf32> to vector<32x32xbf16>
    %cst_92 = arith.constant dense<0.000000e+00> : vector<19x32xf32>
    %283 = tpu.matmul %281, %282, %cst_92 {dimension_numbers = #tpu.dot_dimension_numbers<[1], [0], [0], [1], [0, 0, 1, 1], [], []>} : vector<19x32xbf16>, vector<32x32xbf16>, vector<19x32xf32> -> vector<19x32xf32>
    %284 = arith.addf %212, %283 : vector<19x32xf32>
    %c1_93 = arith.constant 1 : index
    %c0_94 = arith.constant 0 : index
    %c0_95 = arith.constant 0 : index
    %285 = vector.load %arg9[%c1_93, %c0_94, %c0_95] : memref<2x1x32xf32, #tpu.memory_space<vmem>>, vector<1x1x32xf32>
    %286 = vector.shape_cast %285 : vector<1x1x32xf32> to vector<1x32xf32>
    %287 = vector.broadcast %286 : vector<1x32xf32> to vector<19x32xf32>
    %288 = arith.addf %284, %287 : vector<19x32xf32>
    %c1_96 = arith.constant 1 : index
    %c0_97 = arith.constant 0 : index
    %c0_98 = arith.constant 0 : index
    %289 = vector.load %arg10[%c1_96, %c0_97, %c0_98] : memref<2x1x32xf32, #tpu.memory_space<vmem>>, vector<1x1x32xf32>
    %290 = vector.shape_cast %289 : vector<1x1x32xf32> to vector<1x32xf32>
    %c1_99 = arith.constant 1 : index
    %c0_100 = arith.constant 0 : index
    %c0_101 = arith.constant 0 : index
    %291 = vector.load %arg11[%c1_99, %c0_100, %c0_101] : memref<2x1x32xf32, #tpu.memory_space<vmem>>, vector<1x1x32xf32>
    %292 = vector.shape_cast %291 : vector<1x1x32xf32> to vector<1x32xf32>
    %cst_102 = arith.constant dense<0.000000e+00> : vector<19xf32>
    %293 = vector.multi_reduction <add>, %288, %cst_102 [1] : vector<19x32xf32> to vector<19xf32>
    %294 = vector.shape_cast %293 : vector<19xf32> to vector<19x1xf32>
    %cst_103 = arith.constant 3.200000e+01 : f32
    %295 = vector.broadcast %cst_103 : f32 to vector<19x1xf32>
    %296 = arith.divf %294, %295 : vector<19x1xf32>
    %297 = vector.broadcast %296 : vector<19x1xf32> to vector<19x32xf32>
    %298 = arith.subf %288, %297 : vector<19x32xf32>
    %299 = arith.mulf %298, %298 : vector<19x32xf32>
    %cst_104 = arith.constant dense<0.000000e+00> : vector<19xf32>
    %300 = vector.multi_reduction <add>, %299, %cst_104 [1] : vector<19x32xf32> to vector<19xf32>
    %301 = vector.shape_cast %300 : vector<19xf32> to vector<19x1xf32>
    %cst_105 = arith.constant 3.200000e+01 : f32
    %302 = vector.broadcast %cst_105 : f32 to vector<19x1xf32>
    %303 = arith.divf %301, %302 : vector<19x1xf32>
    %304 = vector.broadcast %296 : vector<19x1xf32> to vector<19x32xf32>
    %305 = arith.subf %288, %304 : vector<19x32xf32>
    %cst_106 = arith.constant 9.99999974E-6 : f32
    %306 = vector.broadcast %cst_106 : f32 to vector<19x1xf32>
    %307 = arith.addf %303, %306 : vector<19x1xf32>
    %308 = math.rsqrt %307 : vector<19x1xf32>
    %309 = vector.broadcast %308 : vector<19x1xf32> to vector<19x32xf32>
    %310 = arith.mulf %305, %309 : vector<19x32xf32>
    %311 = vector.broadcast %290 : vector<1x32xf32> to vector<19x32xf32>
    %312 = arith.mulf %310, %311 : vector<19x32xf32>
    %313 = vector.broadcast %292 : vector<1x32xf32> to vector<19x32xf32>
    %314 = arith.addf %312, %313 : vector<19x32xf32>
    %c1_107 = arith.constant 1 : index
    %c0_108 = arith.constant 0 : index
    %c0_109 = arith.constant 0 : index
    %315 = vector.load %arg12[%c1_107, %c0_108, %c0_109] : memref<2x32x64xf32, #tpu.memory_space<vmem>>, vector<1x32x64xf32>
    %316 = vector.shape_cast %315 : vector<1x32x64xf32> to vector<32x64xf32>
    %317 = arith.truncf %314 : vector<19x32xf32> to vector<19x32xbf16>
    %318 = arith.truncf %316 : vector<32x64xf32> to vector<32x64xbf16>
    %cst_110 = arith.constant dense<0.000000e+00> : vector<19x64xf32>
    %319 = tpu.matmul %317, %318, %cst_110 {dimension_numbers = #tpu.dot_dimension_numbers<[1], [0], [0], [1], [0, 0, 1, 1], [], []>} : vector<19x32xbf16>, vector<32x64xbf16>, vector<19x64xf32> -> vector<19x64xf32>
    %c1_111 = arith.constant 1 : index
    %c0_112 = arith.constant 0 : index
    %c0_113 = arith.constant 0 : index
    %320 = vector.load %arg13[%c1_111, %c0_112, %c0_113] : memref<2x1x64xf32, #tpu.memory_space<vmem>>, vector<1x1x64xf32>
    %321 = vector.shape_cast %320 : vector<1x1x64xf32> to vector<1x64xf32>
    %322 = vector.broadcast %321 : vector<1x64xf32> to vector<19x64xf32>
    %323 = arith.addf %319, %322 : vector<19x64xf32>
    %324 = arith.mulf %323, %323 : vector<19x64xf32>
    %325 = arith.mulf %323, %324 : vector<19x64xf32>
    %cst_114 = arith.constant 4.471500e-02 : f32
    %326 = vector.broadcast %cst_114 : f32 to vector<19x64xf32>
    %327 = arith.mulf %326, %325 : vector<19x64xf32>
    %328 = arith.addf %323, %327 : vector<19x64xf32>
    %cst_115 = arith.constant 0.797884583 : f32
    %329 = vector.broadcast %cst_115 : f32 to vector<19x64xf32>
    %330 = arith.mulf %329, %328 : vector<19x64xf32>
    %331 = math.tanh %330 : vector<19x64xf32>
    %cst_116 = arith.constant 1.000000e+00 : f32
    %332 = vector.broadcast %cst_116 : f32 to vector<19x64xf32>
    %333 = arith.addf %332, %331 : vector<19x64xf32>
    %cst_117 = arith.constant 5.000000e-01 : f32
    %334 = vector.broadcast %cst_117 : f32 to vector<19x64xf32>
    %335 = arith.mulf %334, %333 : vector<19x64xf32>
    %336 = arith.mulf %323, %335 : vector<19x64xf32>
    %c1_118 = arith.constant 1 : index
    %c0_119 = arith.constant 0 : index
    %c0_120 = arith.constant 0 : index
    %337 = vector.load %arg14[%c1_118, %c0_119, %c0_120] : memref<2x64x32xf32, #tpu.memory_space<vmem>>, vector<1x64x32xf32>
    %338 = vector.shape_cast %337 : vector<1x64x32xf32> to vector<64x32xf32>
    %339 = arith.truncf %336 : vector<19x64xf32> to vector<19x64xbf16>
    %340 = arith.truncf %338 : vector<64x32xf32> to vector<64x32xbf16>
    %cst_121 = arith.constant dense<0.000000e+00> : vector<19x32xf32>
    %341 = tpu.matmul %339, %340, %cst_121 {dimension_numbers = #tpu.dot_dimension_numbers<[1], [0], [0], [1], [0, 0, 1, 1], [], []>} : vector<19x64xbf16>, vector<64x32xbf16>, vector<19x32xf32> -> vector<19x32xf32>
    %342 = arith.addf %314, %341 : vector<19x32xf32>
    %c1_122 = arith.constant 1 : index
    %c0_123 = arith.constant 0 : index
    %c0_124 = arith.constant 0 : index
    %343 = vector.load %arg15[%c1_122, %c0_123, %c0_124] : memref<2x1x32xf32, #tpu.memory_space<vmem>>, vector<1x1x32xf32>
    %344 = vector.shape_cast %343 : vector<1x1x32xf32> to vector<1x32xf32>
    %345 = vector.broadcast %344 : vector<1x32xf32> to vector<19x32xf32>
    %346 = arith.addf %342, %345 : vector<19x32xf32>
    %c1_125 = arith.constant 1 : index
    %c0_126 = arith.constant 0 : index
    %c0_127 = arith.constant 0 : index
    %347 = vector.load %arg16[%c1_125, %c0_126, %c0_127] : memref<2x1x32xf32, #tpu.memory_space<vmem>>, vector<1x1x32xf32>
    %348 = vector.shape_cast %347 : vector<1x1x32xf32> to vector<1x32xf32>
    %c1_128 = arith.constant 1 : index
    %c0_129 = arith.constant 0 : index
    %c0_130 = arith.constant 0 : index
    %349 = vector.load %arg17[%c1_128, %c0_129, %c0_130] : memref<2x1x32xf32, #tpu.memory_space<vmem>>, vector<1x1x32xf32>
    %350 = vector.shape_cast %349 : vector<1x1x32xf32> to vector<1x32xf32>
    %cst_131 = arith.constant dense<0.000000e+00> : vector<19xf32>
    %351 = vector.multi_reduction <add>, %346, %cst_131 [1] : vector<19x32xf32> to vector<19xf32>
    %352 = vector.shape_cast %351 : vector<19xf32> to vector<19x1xf32>
    %cst_132 = arith.constant 3.200000e+01 : f32
    %353 = vector.broadcast %cst_132 : f32 to vector<19x1xf32>
    %354 = arith.divf %352, %353 : vector<19x1xf32>
    %355 = vector.broadcast %354 : vector<19x1xf32> to vector<19x32xf32>
    %356 = arith.subf %346, %355 : vector<19x32xf32>
    %357 = arith.mulf %356, %356 : vector<19x32xf32>
    %cst_133 = arith.constant dense<0.000000e+00> : vector<19xf32>
    %358 = vector.multi_reduction <add>, %357, %cst_133 [1] : vector<19x32xf32> to vector<19xf32>
    %359 = vector.shape_cast %358 : vector<19xf32> to vector<19x1xf32>
    %cst_134 = arith.constant 3.200000e+01 : f32
    %360 = vector.broadcast %cst_134 : f32 to vector<19x1xf32>
    %361 = arith.divf %359, %360 : vector<19x1xf32>
    %362 = vector.broadcast %354 : vector<19x1xf32> to vector<19x32xf32>
    %363 = arith.subf %346, %362 : vector<19x32xf32>
    %cst_135 = arith.constant 9.99999974E-6 : f32
    %364 = vector.broadcast %cst_135 : f32 to vector<19x1xf32>
    %365 = arith.addf %361, %364 : vector<19x1xf32>
    %366 = math.rsqrt %365 : vector<19x1xf32>
    %367 = vector.broadcast %366 : vector<19x1xf32> to vector<19x32xf32>
    %368 = arith.mulf %363, %367 : vector<19x32xf32>
    %369 = vector.broadcast %348 : vector<1x32xf32> to vector<19x32xf32>
    %370 = arith.mulf %368, %369 : vector<19x32xf32>
    %371 = vector.broadcast %350 : vector<1x32xf32> to vector<19x32xf32>
    %372 = arith.addf %370, %371 : vector<19x32xf32>
    %c0_136 = arith.constant 0 : index
    %c0_137 = arith.constant 0 : index
    %c0_138 = arith.constant 0 : index
    %373 = vector.load %arg18[%c0_136, %c0_137, %c0_138] : memref<1x19x32xf32, #tpu.memory_space<vmem>>, vector<1x19x32xf32>
    %374 = vector.shape_cast %373 : vector<1x19x32xf32> to vector<19x32xf32>
    %375 = vector.shape_cast %372 : vector<19x32xf32> to vector<1x19x32xf32>
    tpu.vector_store %arg18[%c0_136, %c0_137, %c0_138], %375 {strides = array<i32>} : memref<1x19x32xf32, #tpu.memory_space<vmem>>, vector<1x19x32xf32>,
    return
  }
  func.func @transform_0(%arg0: i32) -> (i32, i32, i32) {
    %c0_i32 = arith.constant 0 : i32
    %c0_i32_0 = arith.constant 0 : i32
    %c0_i32_1 = arith.constant 0 : i32
    return %arg0, %c0_i32, %c0_i32_0 : i32, i32, i32
  }
  func.func @transform_1(%arg0: i32) -> (i32, i32) {
    %c0_i32 = arith.constant 0 : i32
    %c0_i32_0 = arith.constant 0 : i32
    %c0_i32_1 = arith.constant 0 : i32
    return %c0_i32, %c0_i32_0 : i32, i32
  }
  func.func @transform_2(%arg0: i32) -> (i32, i32) {
    %c0_i32 = arith.constant 0 : i32
    %c0_i32_0 = arith.constant 0 : i32
    %c0_i32_1 = arith.constant 0 : i32
    return %c0_i32, %c0_i32_0 : i32, i32
  }
  func.func @transform_3(%arg0: i32) -> (i32, i32) {
    %c0_i32 = arith.constant 0 : i32
    %c0_i32_0 = arith.constant 0 : i32
    %c0_i32_1 = arith.constant 0 : i32
    return %c0_i32, %c0_i32_0 : i32, i32
  }
  func.func @transform_4(%arg0: i32) -> (i32, i32) {
    %c0_i32 = arith.constant 0 : i32
    %c0_i32_0 = arith.constant 0 : i32
    %c0_i32_1 = arith.constant 0 : i32
    return %c0_i32, %c0_i32_0 : i32, i32
  }
  func.func @transform_5(%arg0: i32) -> (i32, i32, i32) {
    %c0_i32 = arith.constant 0 : i32
    %c0_i32_0 = arith.constant 0 : i32
    %c0_i32_1 = arith.constant 0 : i32
    %c0_i32_2 = arith.constant 0 : i32
    return %c0_i32, %c0_i32_0, %c0_i32_1 : i32, i32, i32
  }
  func.func @transform_6(%arg0: i32) -> (i32, i32, i32) {
    %c0_i32 = arith.constant 0 : i32
    %c0_i32_0 = arith.constant 0 : i32
    %c0_i32_1 = arith.constant 0 : i32
    %c0_i32_2 = arith.constant 0 : i32
    return %c0_i32, %c0_i32_0, %c0_i32_1 : i32, i32, i32
  }
  func.func @transform_7(%arg0: i32) -> (i32, i32, i32) {
    %c0_i32 = arith.constant 0 : i32
    %c0_i32_0 = arith.constant 0 : i32
    %c0_i32_1 = arith.constant 0 : i32
    %c0_i32_2 = arith.constant 0 : i32
    return %c0_i32, %c0_i32_0, %c0_i32_1 : i32, i32, i32
  }
  func.func @transform_8(%arg0: i32) -> (i32, i32, i32) {
    %c0_i32 = arith.constant 0 : i32
    %c0_i32_0 = arith.constant 0 : i32
    %c0_i32_1 = arith.constant 0 : i32
    %c0_i32_2 = arith.constant 0 : i32
    return %c0_i32, %c0_i32_0, %c0_i32_1 : i32, i32, i32
  }
  func.func @transform_9(%arg0: i32) -> (i32, i32, i32) {
    %c0_i32 = arith.constant 0 : i32
    %c0_i32_0 = arith.constant 0 : i32
    %c0_i32_1 = arith.constant 0 : i32
    %c0_i32_2 = arith.constant 0 : i32
    return %c0_i32, %c0_i32_0, %c0_i32_1 : i32, i32, i32
  }
  func.func @transform_10(%arg0: i32) -> (i32, i32, i32) {
    %c0_i32 = arith.constant 0 : i32
    %c0_i32_0 = arith.constant 0 : i32
    %c0_i32_1 = arith.constant 0 : i32
    %c0_i32_2 = arith.constant 0 : i32
    return %c0_i32, %c0_i32_0, %c0_i32_1 : i32, i32, i32
  }
  func.func @transform_11(%arg0: i32) -> (i32, i32, i32) {
    %c0_i32 = arith.constant 0 : i32
    %c0_i32_0 = arith.constant 0 : i32
    %c0_i32_1 = arith.constant 0 : i32
    %c0_i32_2 = arith.constant 0 : i32
    return %c0_i32, %c0_i32_0, %c0_i32_1 : i32, i32, i32
  }
  func.func @transform_12(%arg0: i32) -> (i32, i32, i32) {
    %c0_i32 = arith.constant 0 : i32
    %c0_i32_0 = arith.constant 0 : i32
    %c0_i32_1 = arith.constant 0 : i32
    %c0_i32_2 = arith.constant 0 : i32
    return %c0_i32, %c0_i32_0, %c0_i32_1 : i32, i32, i32
  }
  func.func @transform_13(%arg0: i32) -> (i32, i32, i32) {
    %c0_i32 = arith.constant 0 : i32
    %c0_i32_0 = arith.constant 0 : i32
    %c0_i32_1 = arith.constant 0 : i32
    %c0_i32_2 = arith.constant 0 : i32
    return %c0_i32, %c0_i32_0, %c0_i32_1 : i32, i32, i32
  }
  func.func @transform_14(%arg0: i32) -> (i32, i32, i32) {
    %c0_i32 = arith.constant 0 : i32
    %c0_i32_0 = arith.constant 0 : i32
    %c0_i32_1 = arith.constant 0 : i32
    %c0_i32_2 = arith.constant 0 : i32
    return %c0_i32, %c0_i32_0, %c0_i32_1 : i32, i32, i32
  }
  func.func @transform_15(%arg0: i32) -> (i32, i32, i32) {
    %c0_i32 = arith.constant 0 : i32
    %c0_i32_0 = arith.constant 0 : i32
    %c0_i32_1 = arith.constant 0 : i32
    %c0_i32_2 = arith.constant 0 : i32
    return %c0_i32, %c0_i32_0, %c0_i32_1 : i32, i32, i32
  }
  func.func @transform_16(%arg0: i32) -> (i32, i32, i32) {
    %c0_i32 = arith.constant 0 : i32
    %c0_i32_0 = arith.constant 0 : i32
    %c0_i32_1 = arith.constant 0 : i32
    %c0_i32_2 = arith.constant 0 : i32
    return %c0_i32, %c0_i32_0, %c0_i32_1 : i32, i32, i32
  }
  func.func @transform_17(%arg0: i32) -> (i32, i32, i32) {
    %c0_i32 = arith.constant 0 : i32
    %c0_i32_0 = arith.constant 0 : i32
    %c0_i32_1 = arith.constant 0 : i32
    return %arg0, %c0_i32, %c0_i32_0 : i32, i32, i32
  }
}

</mosaic_0001>

<bundles_post_ra>
// kernel: _lambda_.5
= control target key start
LH: loop header
LB: loop body
LE: loop exit
PB: predicated region body
PF: predicated region fallthrough
CT: control target
= control target key end

     0   :  { %s498_s9 = smov 0   ;;  %s620_s0 = inlined_call_operand.vmem [shape: f32[2,40,64], index: 0, kind: input, shape index: {}]   ;;  %s621_s1 = inlined_call_operand.vmem [shape: f32[128,32], index: 1, kind: input, shape index: {}]   ;;  %s622_s2 = inlined_call_operand.vmem [shape: f32[2,39,32], index: 2, kind: output, shape index: {}]  }
   0x1 LB: > { %s376_s10 = sadd.s32 4294967295, %s478_s9   ;;  %p380_p0 = scmp.ge.s32.totalorder %s478_s9, 1  ;;  %s478_s9 = sphi %s498_s9, %s12_s9  }
   0x2   : > { %p112_p1 = scmp.lt.s32.totalorder %s478_s9, 3 }
   0x4   : > { %p113_p2 = pnand %p380_p0, %p112_p1 }
   0x5   : > { %p134_p3 = scmp.lt.s32.totalorder (!%p113_p2), %s376_s10, 1  ;;  %s482_s3 = smov (!%p113_p2), 64  }
   0x6   : > { %116 = sbr.rel (%p113_p2) target bundleno = 374 (0x176), region = 28 }
   0xb   : > { %v200_v0 = vld [vmem:[%s621_s1 + $0x70] sm:$0xff]  ;;  %v201_v1 = vld [vmem:[%s621_s1 + $0x78] sm:$0xff]  ;;  %v480_v2 = vmov 0.0   ;;  %v198_v4 = vld [vmem:[%s621_s1 + $0x60] sm:$0xff]  ;;  %s624_s10 = smov (!%p134_p3, %s376_s10), 1  ;;  %vm481_vm0 = vmmov 0  }
   0xc   : > { %424 = vmatprep.subr.bf16.mxu1 %v480_v2  ;;  %v212_v3 = vpack.c.bf16 %v201_v1, %v200_v0  ;;  %396 = vmatprep.subr.bf16.mxu0 %v480_v2  ;;  %v199_v5 = vld [vmem:[%s621_s1 + $0x68] sm:$0xff]  ;;  %s440_s19 = smul.u32 40, %s624_s10  ;;  %v196_v7 = vld [vmem:[%s621_s1 + $0x50] sm:$0xff]  ;;  %v197_v8 = vld [vmem:[%s621_s1 + $0x58] sm:$0xff]  ;;  %vm155_vm1 = vcmask 1046528   ;;  %vm180_vm2 = vcmask 523264  }
   0xd   : > { %v211_v6 = vpack.c.bf16 %v199_v5, %v198_v4  ;;  %416 = vmatprep.mubr.msk.bf16.mxu1 %vm481_vm0, %v480_v2  ;;  %412 = vmatprep.mubr.msk.bf16.mxu0 %vm481_vm0, %v480_v2  ;;  %v194_v9 = vld [vmem:[%s621_s1 + $0x40] sm:$0xff]  ;;  %v195_v10 = vld [vmem:[%s621_s1 + $0x48] sm:$0xff]  ;;  %v210_v14 = vpack.c.bf16 %v197_v8, %v196_v7  ;;  %v192_v28 = vld [vmem:[%s621_s1 + $0x30] sm:$0xff]  ;;  %vm314_vm3 = vcmask 261120   ;;  %vm319_vm4 = vcmask 260096  }
   0xe   : > { %432 = vmatpush3.bf16.msra.mxu1 %v212_v3  ;;  %397 = vmatpush3.bf16.msra.mxu0 %v212_v3  ;;  %s138_s26 = scalar_lea.vmem %s620_s0, %s440_s19  ;;  %v209_v24 = vpack.c.bf16 %v195_v10, %v194_v9  ;;  %v193_v29 = vld [vmem:[%s621_s1 + $0x38] sm:$0xff]  ;;  %v190_v32 = vld [vmem:[%s621_s1 + $0x20] sm:$0xff]  ;;  %v191_v33 = vld [vmem:[%s621_s1 + $0x28] sm:$0xff]  ;;  %s143_s25 = scalar_lea.vmem %s622_s2, %s440_s19 }
   0xf   : > { %425 = vmatprep.subr.bf16.mxu1 %v480_v2  ;;  %398 = vmatprep.subr.bf16.mxu0 %v480_v2  ;;  %v546_v11 = vld [vmem:[%s138_s26 + $0x10] sm:$0xff]  ;;  %v548_v12 = vld [vmem:[%s138_s26 + $0x18] sm:$0xff]  ;;  %v550_v13 = vld [vmem:[%s138_s26 + $0x20] sm:$0xff]  ;;  %v208_v31 = vpack.c.bf16 %v193_v29, %v192_v28  ;;  %v207_v34 = vpack.c.bf16 %v191_v33, %v190_v32 }
  0x10   : > { %v159_v15 = vrot.slane %v546_v11, 1  ;;  %v161_v16 = vrot.slane %v548_v12, 1  ;;  %v163_v17 = vrot.slane %v550_v13, 1  ;;  %v555_v18 = vld [vmem:[%s138_s26] sm:$0xff]  ;;  %v557_v19 = vld [vmem:[%s138_s26 + $0x8] sm:$0xff]  ;;  %v188_v35 = vld [vmem:[%s621_s1 + $0x10] sm:$0xff] }
  0x11   : > { %v156_v20 = vrot.slane %v555_v18, 1  ;;  %v157_v21 = vrot.slane %v557_v19, 1  ;;  %v189_v36 = vld [vmem:[%s621_s1 + $0x18] sm:$0xff]  ;;  %v186_v38 = vld [vmem:[%s621_s1] sm:$0xff]  ;;  %v187_v39 = vld [vmem:[%s621_s1 + $0x8] sm:$0xff] }
  0x12   : > { %433 = vmatpush3.bf16.msra.mxu1 %v211_v6  ;;  %399 = vmatpush3.bf16.msra.mxu0 %v211_v6  ;;  %v162_v22 = vsel %vm155_vm1, %v159_v15, %v161_v16  ;;  %v164_v23 = vsel %vm155_vm1, %v161_v16, %v163_v17  ;;  %v206_v37 = vpack.c.bf16 %v189_v36, %v188_v35 }
  0x13   : > { %426 = vmatprep.subr.bf16.mxu1 %v480_v2  ;;  %400 = vmatprep.subr.bf16.mxu0 %v480_v2  ;;  %v452_v25 = vpack.i.bf16 %v164_v23, %v162_v22  ;;  %v158_v26 = vsel %vm155_vm1, %v156_v20, %v157_v21  ;;  %v160_v27 = vsel %vm155_vm1, %v157_v21, %v159_v15 }
  0x14   : > { %173 = vrot.lane.b32.xlu1 %v163_v17, %s482_s3  ;;  %v457_v30 = vpack.i.bf16 %v160_v27, %v158_v26  ;;  %v205_v40 = vpack.c.bf16 %v187_v39, %v186_v38 }
  0x15   : > { %453 = vrot.lane.b32.xlu0 %v452_v25, %s482_s3 }
  0x16   : > { %434 = vmatpush3.bf16.msra.mxu1 %v210_v14  ;;  %401 = vmatpush3.bf16.msra.mxu0 %v210_v14 }
  0x17   : > { %427 = vmatprep.subr.bf16.mxu1 %v480_v2  ;;  %402 = vmatprep.subr.bf16.mxu0 %v480_v2 }
  0x19   : > { %458 = vrot.lane.b32.xlu0 %v457_v30, %s482_s3 }
  0x1a   : > { %435 = vmatpush3.bf16.msra.mxu1 %v209_v24  ;;  %403 = vmatpush3.bf16.msra.mxu0 %v209_v24 }
  0x1b   : > { %428 = vmatprep.subr.bf16.mxu1 %v480_v2  ;;  %404 = vmatprep.subr.bf16.mxu0 %v480_v2 }
  0x1e   : > { %436 = vmatpush3.bf16.msra.mxu1 %v208_v31  ;;  %405 = vmatpush3.bf16.msra.mxu0 %v208_v31 }
  0x1f   : > { %429 = vmatprep.subr.bf16.mxu1 %v480_v2  ;;  %406 = vmatprep.subr.bf16.mxu0 %v480_v2 }
  0x22   : > { %437 = vmatpush3.bf16.msra.mxu1 %v207_v34  ;;  %407 = vmatpush3.bf16.msra.mxu0 %v207_v34 }
  0x23   : > { %430 = vmatprep.subr.bf16.mxu1 %v480_v2  ;;  %408 = vmatprep.subr.bf16.mxu0 %v480_v2 }
  0x26   : > { %438 = vmatpush3.bf16.msra.mxu1 %v206_v37  ;;  %409 = vmatpush3.bf16.msra.mxu0 %v206_v37 }
  0x27   : > { %431 = vmatprep.subr.bf16.mxu1 %v480_v2  ;;  %410 = vmatprep.subr.bf16.mxu0 %v480_v2 }
  0x2a   : > { %439 = vmatpush3.bf16.msra.mxu1 %v205_v40  ;;  %411 = vmatpush3.bf16.msra.mxu0 %v205_v40 }
  0x86   : > { %v174_v48 = vpop.permute.xlu1 %173 }
  0x87   : > { %v454_v41 = vpop.permute.xlu0 %453  ;;  %v185_v51 = vsel %vm180_vm2, %v550_v13, %v174_v48 }
  0x88   : > { %v456_v42 = vunpack.i.h.bf16 %v454_v41  ;;  %v455_v43 = vunpack.i.l.bf16 %v454_v41  ;;  %v204_v55 = vpack.c.bf16 %v185_v51, %v185_v51 }
  0x8a   : > { %v183_v44 = vsel %vm180_vm2, %v546_v11, %v455_v43  ;;  %v184_v45 = vsel %vm180_vm2, %v548_v12, %v456_v42 }
  0x8b   : > { %v459_v46 = vpop.permute.xlu0 %458  ;;  %v203_v47 = vpack.c.bf16 %v184_v45, %v183_v44 }
  0x8c   : > { %v461_v49 = vunpack.i.h.bf16 %v459_v46  ;;  %v460_v50 = vunpack.i.l.bf16 %v459_v46 }
  0x8d   : > { %417 = vmatmul.mubr.bf16.vlgmr.msra.gmra.mxu1 %v203_v47 }
  0x8e   : > { %v181_v52 = vsel %vm180_vm2, %v555_v18, %v460_v50  ;;  %v182_v53 = vsel %vm180_vm2, %v557_v19, %v461_v49  ;;  %420 = vmatprep.mubr.msk.bf16.mxu1 %vm481_vm0, %v480_v2 }
  0x8f   : > { %v202_v54 = vpack.c.bf16 %v182_v53, %v181_v52 }
  0x91   : > { %413 = vmatmul.mubr.bf16.vlgmr.msra.gmra.mxu0 %v202_v54 }
  0x95   : > { %421 = vmatmul.mubr.bf16.gmra.mxu1 %v204_v55 }
 0x14d   : > { %v255_v56 = vpop.f32.mrf.mxu1 }
 0x14e   : > { %v271_v57 = vmul.f32 %v255_v56, %v255_v56 }
 0x14f   : > { %v418_v58 = vpop.f32.mrf.mxu1 }
 0x150   : > { %v276_v59 = vmul.f32 %v271_v57, %v255_v56 }
 0x151   : > { %v247_v60 = vpop.f32.mrf.mxu0  ;;  %v258_v61 = vpop.f32.mrf.mxu1 }
 0x152   : > { %v281_v62 = vmul.f32 0.044715, %v276_v59  ;;  %v269_v63 = vmul.f32 %v247_v60, %v247_v60  ;;  %v272_v0 = vmul.f32 %v258_v61, %v258_v61 }
 0x153   : > { %v414_v1 = vpop.f32.mrf.mxu0  ;;  %v419_v3 = vpop.f32.mrf.mxu1 }
 0x154   : > { %v286_v4 = vadd.f32 %v281_v62, %v255_v56  ;;  %v274_v5 = vmul.f32 %v269_v63, %v247_v60  ;;  %v277_v6 = vmul.f32 %v272_v0, %v258_v61 }
 0x155   : > { %v250_v7 = vpop.f32.mrf.mxu0  ;;  %v263_v2 = vpop.f32.mrf.mxu1 }
 0x156   : > { %v291_v8 = vmul.f32 0.7978846, %v286_v4  ;;  %v279_v9 = vmul.f32 0.044715, %v274_v5  ;;  %v282_v10 = vmul.f32 0.044715, %v277_v6  ;;  %v270_v11 = vmul.f32 %v250_v7, %v250_v7 }
 0x157   : > { %v273_v12 = vmul.f32 %v263_v2, %v263_v2  ;;  %v415_v13 = vpop.f32.mrf.mxu0  ;;  %v422_v14 = vpop.f32.mrf.mxu1 }
 0x158   : > { %462 = vtanh.f32 %v291_v8  ;;  %v284_v15 = vadd.f32 %v279_v9, %v247_v60  ;;  %v287_v16 = vadd.f32 %v282_v10, %v258_v61  ;;  %v275_v17 = vmul.f32 %v270_v11, %v250_v7 }
 0x159   : > { %v278_v18 = vmul.f32 %v273_v12, %v263_v2  ;;  %v266_v19 = vpop.f32.mrf.mxu1 }
 0x15a   : > { %v289_v20 = vmul.f32 0.7978846, %v284_v15  ;;  %v292_v21 = vmul.f32 0.7978846, %v287_v16  ;;  %v280_v22 = vmul.f32 0.044715, %v275_v17 }
 0x15b   : > { %v283_v23 = vmul.f32 0.044715, %v278_v18  ;;  %v423_v24 = vpop.f32.mrf.mxu1 }
 0x15c   : > { %464 = vtanh.f32 %v289_v20  ;;  %v285_v25 = vadd.f32 %v280_v22, %v250_v7 }
 0x15d   : > { %466 = vtanh.f32 %v292_v21  ;;  %v288_v26 = vadd.f32 %v283_v23, %v263_v2 }
 0x15e   : > { %v290_v27 = vmul.f32 0.7978846, %v285_v25 }
 0x15f   : > { %v293_v28 = vmul.f32 0.7978846, %v288_v26 }
 0x160   : > { %468 = vtanh.f32 %v290_v27 }
 0x161   : > { %470 = vtanh.f32 %v293_v28 }
 0x165   : > { %v463_v29 = vpop.eup %462 }
 0x166   : > { %v301_v30 = vadd.f32 1.0, %v463_v29 }
 0x168   : > { %v306_v31 = vmul.f32 0.5, %v301_v30 }
 0x169   : > { %v465_v32 = vpop.eup %464 }
 0x16a   : > { %v467_v33 = vpop.eup %466  ;;  %v311_v34 = vmul.f32 %v306_v31, %v255_v56  ;;  %v299_v35 = vadd.f32 1.0, %v465_v32 }
 0x16b   : > { %v302_v36 = vadd.f32 1.0, %v467_v33 }
 0x16c   : > { %317 = vst.msk [vmem:[%s143_s25 + $0x10] sm:$0xff] %vm314_vm3, %v311_v34  ;;  %v304_v37 = vmul.f32 0.5, %v299_v35 }
 0x16d   : > { %v469_v38 = vpop.eup %468  ;;  %v307_v39 = vmul.f32 0.5, %v302_v36 }
 0x16e   : > { %v471_v40 = vpop.eup %470  ;;  %v309_v41 = vmul.f32 %v304_v37, %v247_v60  ;;  %v300_v42 = vadd.f32 1.0, %v469_v38 }
 0x16f   : > { %v312_v43 = vmul.f32 %v307_v39, %v258_v61  ;;  %v303_v44 = vadd.f32 1.0, %v471_v40 }
 0x170   : > { %315 = vst.msk [vmem:[%s143_s25] sm:$0xff] %vm314_vm3, %v309_v41  ;;  %v305_v45 = vmul.f32 0.5, %v300_v42 }
 0x171   : > { %318 = vst.msk [vmem:[%s143_s25 + $0x18] sm:$0xff] %vm314_vm3, %v312_v43  ;;  %v308_v46 = vmul.f32 0.5, %v303_v44 }
 0x172   : > { %v310_v47 = vmul.f32 %v305_v45, %v250_v7 }
 0x173   : > { %v313_v48 = vmul.f32 %v308_v46, %v263_v2 }
 0x174   : > { %316 = vst.msk [vmem:[%s143_s25 + $0x8] sm:$0xff] %vm314_vm3, %v310_v47 }
 0x175   : > { %320 = vst.msk [vmem:[%s143_s25 + $0x20] sm:$0x7f] %vm319_vm4, %v313_v48 }
 0x176 PF: > { %s12_s9 = sadd.s32 1, %s478_s9  }
 0x177   : > { %p9_p4 = scmp.ge.s32.totalorder %s12_s9, 4  }
 0x179   :  { %11 = sbr.rel (!%p9_p4) target bundleno = 1 (0x1), region = 58 }

// kernel: _lambda_.6
= control target key start
LH: loop header
LB: loop body
LE: loop exit
PB: predicated region body
PF: predicated region fallthrough
CT: control target
= control target key end

     0   :  { %s651_s21 = smov 0   ;;  %s731_s0 = inlined_call_operand.vmem [shape: f32[2,19,64], index: 0, kind: input, shape index: {}]   ;;  %s732_s1 = inlined_call_operand.vmem [shape: f32[64,32], index: 1, kind: input, shape index: {}]   ;;  %s733_s2 = inlined_call_operand.vmem [shape: f32[1,32], index: 2, kind: input, shape index: {}]   ;;  %s734_s3 = inlined_call_operand.vmem [shape: f32[1,32], index: 3, kind: input, shape index: {}]   ;;  %s735_s4 = inlined_call_operand.vmem [shape: f32[32,32], index: 4, kind: input, shape index: {}]   ;;  %s736_s5 = inlined_call_operand.vmem [shape: f32[1,32], index: 5, kind: input, shape index: {}]   ;;  %s737_s6 = inlined_call_operand.vmem [shape: f32[2,19,32], index: 6, kind: output, shape index: {}]  }
   0x1 LB: > { %s541_s22 = sadd.s32 4294967295, %s614_s21   ;;  %p545_p0 = scmp.ge.s32.totalorder %s614_s21, 1  ;;  %s614_s21 = sphi %s651_s21, %s16_s21  }
   0x2   : > { %p212_p1 = scmp.lt.s32.totalorder %s614_s21, 3 }
   0x4   : > { %p213_p2 = pnand %p545_p0, %p212_p1 }
   0x5   : > { %p242_p3 = scmp.lt.s32.totalorder (!%p213_p2), %s541_s22, 1 }
   0x6   : > { %216 = sbr.rel (%p213_p2) target bundleno = 773 (0x305), region = 44 }
   0xb   : > { %v262_v0 = vld [vmem:[%s732_s1 + $0x30] sm:$0xff]  ;;  %v263_v1 = vld [vmem:[%s732_s1 + $0x38] sm:$0xff]  ;;  %v260_v2 = vld [vmem:[%s732_s1 + $0x20] sm:$0xff]  ;;  %s739_s22 = smov (!%p242_p3, %s541_s22), 1  ;;  %vm270_vm0 = vcmask 523264   ;;  %vm361_vm1 = vcmask 256000  }
   0xc   : > { %v269_v3 = vpack.c.bf16 %v263_v1, %v262_v0  ;;  %v261_v4 = vld [vmem:[%s732_s1 + $0x28] sm:$0xff]  ;;  %v258_v6 = vld [vmem:[%s732_s1 + $0x10] sm:$0xff]  ;;  %v259_v7 = vld [vmem:[%s732_s1 + $0x18] sm:$0xff]  ;;  %s587_s11 = smul.u32 24, %s739_s22  ;;  %vm354_vm2 = vcmask 261120  }
   0xd   : > { %v268_v5 = vpack.c.bf16 %v261_v4, %v260_v2  ;;  %v267_v8 = vpack.c.bf16 %v259_v7, %v258_v6  ;;  %v256_v9 = vld [vmem:[%s732_s1] sm:$0xff]  ;;  %v257_v10 = vld [vmem:[%s732_s1 + $0x8] sm:$0xff]  ;;  %v416_v2 = vld [vmem:[%s735_s4 + $0x10] sm:$0xff] }
   0xe   : > { %567 = vmatprep.subr.bf16.mxu0 %v269_v3  ;;  %s246_s18 = scalar_lea.vmem %s731_s0, %s587_s11  ;;  %v266_v14 = vpack.c.bf16 %v257_v10, %v256_v9  ;;  %v414_v4 = vld [vmem:[%s735_s4] sm:$0xff]  ;;  %v415_v6 = vld [vmem:[%s735_s4 + $0x8] sm:$0xff]  ;;  %s251_s14 = scalar_lea.vmem %s737_s6, %s587_s11 }
   0xf   : > { %568 = vmatpush3.bf16.msra.mxu0 %v269_v3  ;;  %v253_v11 = vld [vmem:[%s246_s18] sm:$0xff]  ;;  %v254_v12 = vld [vmem:[%s246_s18 + $0x8] sm:$0xff]  ;;  %v255_v15 = vld [vmem:[%s246_s18 + $0x10] sm:$0x7]  ;;  %v420_v7 = vpack.c.bf16 %v415_v6, %v414_v4 }
  0x10   : > { %569 = vmatprep.subr.bf16.mxu0 %v268_v5  ;;  %v264_v13 = vpack.c.bf16 %v254_v12, %v253_v11  ;;  %v265_v16 = vpack.c.bf16 %v255_v15, %v255_v15  ;;  %v417_v3 = vld [vmem:[%s735_s4 + $0x18] sm:$0xff] }
  0x12   : > { %575 = vmatprep.mubr.msk.bf16.mxu0 %vm270_vm0, %v264_v13 }
  0x13   : > { %570 = vmatpush3.bf16.msra.mxu0 %v268_v5  ;;  %v421_v5 = vpack.c.bf16 %v417_v3, %v416_v2 }
  0x14   : > { %571 = vmatprep.subr.bf16.mxu0 %v267_v8 }
  0x15   : > { %579 = vmatprep.subr.bf16.mxu1 %v421_v5 }
  0x16   : > { %580 = vmatpush3.bf16.msra.mxu1 %v421_v5 }
  0x17   : > { %572 = vmatpush3.bf16.msra.mxu0 %v267_v8  ;;  %581 = vmatprep.subr.bf16.mxu1 %v420_v7 }
  0x18   : > { %573 = vmatprep.subr.bf16.mxu0 %v266_v14 }
  0x1a   : > { %582 = vmatpush3.bf16.msra.mxu1 %v420_v7 }
  0x1b   : > { %574 = vmatpush3.bf16.msra.mxu0 %v266_v14 }
  0x1e   : > { %576 = vmatmul.mubr.msk.bf16.vlgmr.msra.gmra.mxu0 %vm270_vm0, %v265_v16 }
  0xde   : > { %v577_v17 = vpop.f32.mrf.mxu0 }
  0xdf   : > { %v327_v18 = vmul.f32 %v577_v17, %v577_v17 }
  0xe0   : > { %v311_v19 = vpop.f32.mrf.mxu0 }
  0xe1   : > { %v330_v20 = vmul.f32 %v577_v17, %v327_v18  ;;  %v325_v21 = vmul.f32 %v311_v19, %v311_v19 }
  0xe2   : > { %v578_v22 = vpop.f32.mrf.mxu0 }
  0xe3   : > { %v333_v23 = vmul.f32 0.044715, %v330_v20  ;;  %v328_v24 = vmul.f32 %v325_v21, %v311_v19 }
  0xe4   : > { %v314_v25 = vpop.f32.mrf.mxu0 }
  0xe5   : > { %v336_v26 = vadd.f32 %v577_v17, %v333_v23  ;;  %v331_v27 = vmul.f32 0.044715, %v328_v24  ;;  %v326_v28 = vmul.f32 %v314_v25, %v314_v25 }
  0xe7   : > { %v339_v29 = vmul.f32 0.7978846, %v336_v26  ;;  %v334_v30 = vadd.f32 %v331_v27, %v311_v19  ;;  %v329_v31 = vmul.f32 %v326_v28, %v314_v25 }
  0xe9   : > { %596 = vtanh.f32 %v339_v29  ;;  %v337_v32 = vmul.f32 0.7978846, %v334_v30  ;;  %v332_v33 = vmul.f32 0.044715, %v329_v31 }
  0xeb   : > { %598 = vtanh.f32 %v337_v32  ;;  %v335_v34 = vadd.f32 %v332_v33, %v314_v25  ;;  %v552_v33 = vld [vmem:[%s736_s5] ss:$0 sm:$0xff] }
  0xed   : > { %v338_v35 = vmul.f32 0.7978846, %v335_v34 }
  0xef   : > { %600 = vtanh.f32 %v338_v35 }
  0xf6   : > { %v597_v36 = vpop.eup %596 }
  0xf7   : > { %v345_v37 = vadd.f32 1.0, %v597_v36 }
  0xf8   : > { %v599_v38 = vpop.eup %598 }
  0xf9   : > { %v348_v39 = vmul.f32 0.5, %v345_v37  ;;  %v343_v40 = vadd.f32 1.0, %v599_v38 }
  0xfb   : > { %v351_v41 = vmul.f32 %v577_v17, %v348_v39  ;;  %v346_v42 = vmul.f32 0.5, %v343_v40 }
  0xfc   : > { %v601_v43 = vpop.eup %600 }
  0xfd   : > { %v362_v44 = vsel %vm361_vm1, %v351_v41, 0.0  ;;  %v349_v45 = vmul.f32 %v346_v42, %v311_v19  ;;  %v344_v46 = vadd.f32 1.0, %v601_v43  ;;  %v550_v19 = vld [vmem:[%s733_s2] ss:$0 sm:$0xff] }
  0xfe   : > { %363 = vadd.xlane.f32.xlu1 %v362_v44 }
  0xff   : > { %v355_v47 = vsel %vm354_vm2, %v349_v45, 0.0  ;;  %v347_v48 = vmul.f32 0.5, %v344_v46 }
 0x100   : > { %356 = vadd.xlane.f32.xlu0 %v355_v47 }
 0x101   : > { %v350_v49 = vmul.f32 %v347_v48, %v314_v25  ;;  %v551_v25 = vld [vmem:[%s734_s3] ss:$0 sm:$0xff] }
 0x103   : > { %v358_v50 = vsel %vm354_vm2, %v350_v49, 0.0 }
 0x104   : > { %359 = vadd.xlane.f32.xlu0 %v358_v50 }
 0x187   : > { %v364_v51 = vpop.xlane.xlu1 %363 }
 0x188   : > { %v368_v52 = vmul.f32 0.03125, %v364_v51 }
 0x189   : > { %v357_v53 = vpop.xlane.xlu0 %356 }
 0x18a   : > { %v366_v54 = vmul.f32 0.03125, %v357_v53  ;;  %v371_v55 = vsub.f32 %v351_v41, %v368_v52 }
 0x18c   : > { %v369_v56 = vsub.f32 %v349_v45, %v366_v54  ;;  %v374_v62 = vmul.f32 %v371_v55, %v371_v55 }
 0x18d   : > { %v360_v57 = vpop.xlane.xlu0 %359 }
 0x18e   : > { %v367_v58 = vmul.f32 0.03125, %v360_v57  ;;  %v372_v59 = vmul.f32 %v369_v56, %v369_v56  ;;  %v381_v0 = vsel %vm361_vm1, %v374_v62, 0.0 }
 0x190   : > { %v370_v60 = vsub.f32 %v350_v49, %v367_v58  ;;  %v375_v61 = vsel %vm354_vm2, %v372_v59, 0.0 }
 0x191   : > { %376 = vadd.xlane.f32.xlu1 %v375_v61 }
 0x192   : > { %v373_v63 = vmul.f32 %v370_v60, %v370_v60 }
 0x194   : > { %v378_v1 = vsel %vm354_vm2, %v373_v63, 0.0 }
 0x195   : > { %382 = vadd.xlane.f32.xlu1 %v381_v0  ;;  %379 = vadd.xlane.f32.xlu0 %v378_v1 }
 0x21a   : > { %v377_v8 = vpop.xlane.xlu1 %376 }
 0x21b   : > { %v384_v9 = vmul.f32 0.03125, %v377_v8 }
 0x21d   : > { %v387_v10 = vadd.f32 1e-05, %v384_v9 }
 0x21e   : > { %v383_v11 = vpop.xlane.xlu1 %382  ;;  %v380_v12 = vpop.xlane.xlu0 %379 }
 0x21f   : > { %602 = vrsqrt.f32 %v387_v10  ;;  %v386_v13 = vmul.f32 0.03125, %v383_v11  ;;  %v385_v14 = vmul.f32 0.03125, %v380_v12 }
 0x221   : > { %v389_v15 = vadd.f32 1e-05, %v386_v13  ;;  %v388_v16 = vadd.f32 1e-05, %v385_v14 }
 0x223   : > { %604 = vrsqrt.f32 %v389_v15 }
 0x224   : > { %606 = vrsqrt.f32 %v388_v16 }
 0x22c   : > { %v603_v17 = vpop.eup %602 }
 0x22d   : > { %v393_v18 = vmul.f32 %v603_v17, %v369_v56 }
 0x22f   : > { %v402_v24 = vmul.f32 %v550_v19, %v393_v18 }
 0x230   : > { %v605_v20 = vpop.eup %604 }
 0x231   : > { %v607_v21 = vpop.eup %606  ;;  %v395_v22 = vmul.f32 %v605_v20, %v371_v55  ;;  %v411_v29 = vadd.f32 %v551_v25, %v402_v24 }
 0x232   : > { %v394_v23 = vmul.f32 %v607_v21, %v370_v60 }
 0x233   : > { %v404_v26 = vmul.f32 %v550_v19, %v395_v22 }
 0x234   : > { %v403_v27 = vmul.f32 %v550_v19, %v394_v23 }
 0x235   : > { %v413_v28 = vadd.f32 %v551_v25, %v404_v26 }
 0x236   : > { %v412_v30 = vadd.f32 %v551_v25, %v403_v27 }
 0x237   : > { %v419_v31 = vpack.c.bf16 %v413_v28, %v413_v28 }
 0x238   : > { %v418_v32 = vpack.c.bf16 %v412_v30, %v411_v29 }
 0x23a   : > { %583 = vmatprep.mubr.msk.bf16.mxu1 %vm354_vm2, %v418_v32 }
 0x23b   : > { %584 = vmatmul.mubr.msk.bf16.vlgmr.msra.gmra.mxu1 %vm354_vm2, %v419_v31 }
 0x2fb   : > { %v585_v34 = vpop.f32.mrf.mxu1 }
 0x2fc   : > { %v478_v35 = vadd.f32 %v585_v34, %v552_v33 }
 0x2fd   : > { %v469_v36 = vpop.f32.mrf.mxu1 }
 0x2fe   : > { %485 = vst.msk [vmem:[%s251_s14 + $0x10] sm:$0x7] %vm361_vm1, %v478_v35  ;;  %v470_v37 = vadd.f32 %v552_v33, %v469_v36 }
 0x2ff   : > { %v586_v38 = vpop.f32.mrf.mxu1 }
 0x300   : > { %483 = vst.msk [vmem:[%s251_s14] sm:$0xff] %vm354_vm2, %v470_v37 }
 0x301   : > { %v472_v39 = vpop.f32.mrf.mxu1 }
 0x302   : > { %v473_v40 = vadd.f32 %v552_v33, %v472_v39 }
 0x304   : > { %484 = vst.msk [vmem:[%s251_s14 + $0x8] sm:$0xff] %vm354_vm2, %v473_v40 }
 0x305 PF: > { %s16_s21 = sadd.s32 1, %s614_s21  }
 0x306   : > { %p13_p4 = scmp.ge.s32.totalorder %s16_s21, 4  }
 0x308   :  { %15 = sbr.rel (!%p13_p4) target bundleno = 1 (0x1), region = 74 }

// kernel: _lambda_.4
= control target key start
LH: loop header
LB: loop body
LE: loop exit
PB: predicated region body
PF: predicated region fallthrough
CT: control target
= control target key end

     0   :  { %s900_s15 = smov 0   ;;  %s1192_s0 = inlined_call_operand.vmem [shape: f32[2,80,5], index: 0, kind: input, shape index: {}]   ;;  %s1193_s1 = inlined_call_operand.vmem [shape: f32[10,32], index: 1, kind: input, shape index: {}]   ;;  %s1194_s2 = inlined_call_operand.vmem [shape: f32[1,32], index: 2, kind: input, shape index: {}]   ;;  %s1195_s3 = inlined_call_operand.vmem [shape: f32[1,32], index: 3, kind: input, shape index: {}]   ;;  %s1196_s4 = inlined_call_operand.vmem [shape: f32[2,79,32], index: 4, kind: output, shape index: {}]  }
   0x1 LB: > { %s753_s16 = sadd.s32 4294967295, %s870_s15   ;;  %p757_p0 = scmp.ge.s32.totalorder %s870_s15, 1  ;;  %s870_s15 = sphi %s900_s15, %s14_s15  }
   0x2   : > { %p162_p1 = scmp.lt.s32.totalorder %s870_s15, 3 }
   0x4   : > { %p163_p2 = pnand %p757_p0, %p162_p1 }
   0x5   : > { %p188_p3 = scmp.lt.s32.totalorder (!%p163_p2), %s753_s16, 1  ;;  %s873_s27 = smov (!%p163_p2), 5  }
   0x6   : > { %166 = sbr.rel (%p163_p2) target bundleno = 730 (0x2da), region = 36 }
   0xb   : > { %s1198_s16 = smov (!%p188_p3, %s753_s16), 1  ;;  %vm209_vm0 = vcmask 39936   ;;  %vm316_vm1 = vcmask 1046528   ;;  %vm400_vm2 = vcmask 1044480   ;;  %vm874_vm3 = vmmov 0  }
   0xc   : > { %s799_s17 = smul.u32 80, %s1198_s16  ;;  %vm384_vm4 = vcmask 80896   ;;  %vm477_vm5 = vcmask 261120   ;;  %vm495_vm6 = vcmask 260096  }
   0xe   : > { %s916_s20 = scalar_lea.vmem %s1192_s0, %s799_s17  ;;  %s1157_s8 = scalar_lea.vmem %s1196_s4, %s799_s17 }
   0xf   : > { %v919_v0 = vld [vmem:[%s916_s20] sm:$0xff]  ;;  %v922_v1 = vld [vmem:[%s916_s20 + $0x8] sm:$0xff]  ;;  %v925_v2 = vld [vmem:[%s916_s20 + $0x10] sm:$0xff] }
  0x10   : > { %v928_v3 = vld [vmem:[%s916_s20 + $0x18] sm:$0xff]  ;;  %v210_v4 = vsel %vm209_vm0, %v919_v0, 0.0  ;;  %v211_v5 = vsel %vm209_vm0, %v922_v1, 0.0  ;;  %v213_v6 = vsel %vm209_vm0, %v925_v2, 0.0  ;;  %v937_v7 = vld [vmem:[%s916_s20 + $0x20] sm:$0xff]  ;;  %v241_v9 = vmul.f32 %v919_v0, %v919_v0  ;;  %v946_v12 = vld [vmem:[%s916_s20 + $0x28] sm:$0xff] }
  0x11   : > { %v212_v8 = vadd.f32 %v211_v5, %v210_v4  ;;  %v215_v10 = vsel %vm209_vm0, %v928_v3, 0.0  ;;  %v242_v11 = vmul.f32 %v922_v1, %v922_v1  ;;  %v243_v14 = vmul.f32 %v925_v2, %v925_v2  ;;  %v955_v17 = vld [vmem:[%s916_s20 + $0x30] sm:$0xff]  ;;  %v965_v24 = vld [vmem:[%s916_s20 + $0x38] sm:$0xff]  ;;  %v973_v30 = vld [vmem:[%s916_s20 + $0x40] sm:$0xff] }
  0x12   : > { %v217_v15 = vsel %vm209_vm0, %v937_v7, 0.0  ;;  %v244_v16 = vmul.f32 %v928_v3, %v928_v3  ;;  %v251_v19 = vsel %vm209_vm0, %v241_v9, 0.0  ;;  %v219_v20 = vsel %vm209_vm0, %v946_v12, 0.0  ;;  %v981_v36 = vld [vmem:[%s916_s20 + $0x48] sm:$0xff] }
  0x13   : > { %v214_v13 = vadd.f32 %v213_v6, %v212_v8  ;;  %v245_v21 = vmul.f32 %v937_v7, %v937_v7  ;;  %v252_v22 = vsel %vm209_vm0, %v242_v11, 0.0  ;;  %v254_v23 = vsel %vm209_vm0, %v243_v14, 0.0 }
  0x14   : > { %v253_v26 = vadd.f32 %v252_v22, %v251_v19  ;;  %v221_v27 = vsel %vm209_vm0, %v955_v17, 0.0  ;;  %v246_v28 = vmul.f32 %v946_v12, %v946_v12  ;;  %v256_v29 = vsel %vm209_vm0, %v244_v16, 0.0 }
  0x15   : > { %v216_v18 = vadd.f32 %v215_v10, %v214_v13  ;;  %v223_v33 = vsel %vm209_vm0, %v965_v24, 0.0  ;;  %v247_v34 = vmul.f32 %v955_v17, %v955_v17  ;;  %v258_v35 = vsel %vm209_vm0, %v245_v21, 0.0 }
  0x16   : > { %v255_v32 = vadd.f32 %v254_v23, %v253_v26  ;;  %v225_v39 = vsel %vm209_vm0, %v973_v30, 0.0  ;;  %v248_v40 = vmul.f32 %v965_v24, %v965_v24  ;;  %v260_v41 = vsel %vm209_vm0, %v246_v28, 0.0  ;;  %v376_v28 = vld [vmem:[%s1193_s1] sm:$0xff] }
  0x17   : > { %v218_v25 = vadd.f32 %v217_v15, %v216_v18  ;;  %v227_v44 = vsel %vm209_vm0, %v981_v36, 0.0  ;;  %v249_v45 = vmul.f32 %v973_v30, %v973_v30  ;;  %v262_v46 = vsel %vm209_vm0, %v247_v34, 0.0 }
  0x18   : > { %v257_v38 = vadd.f32 %v256_v29, %v255_v32  ;;  %v250_v49 = vmul.f32 %v981_v36, %v981_v36  ;;  %v264_v50 = vsel %vm209_vm0, %v248_v40, 0.0  ;;  %v377_v29 = vld [vmem:[%s1193_s1 + $0x8] sm:$0x3] }
  0x19   : > { %v220_v31 = vadd.f32 %v219_v20, %v218_v25  ;;  %v266_v53 = vsel %vm209_vm0, %v249_v45, 0.0  ;;  %v383_v34 = vpack.c.bf16 %v377_v29, %v376_v28 }
  0x1a   : > { %v259_v43 = vadd.f32 %v258_v35, %v257_v38  ;;  %v268_v55 = vsel %vm209_vm0, %v250_v49, 0.0 }
  0x1b   : > { %v222_v37 = vadd.f32 %v221_v27, %v220_v31 }
  0x1c   : > { %v261_v48 = vadd.f32 %v260_v41, %v259_v43 }
  0x1d   : > { %v224_v42 = vadd.f32 %v223_v33, %v222_v37 }
  0x1e   : > { %v263_v52 = vadd.f32 %v262_v46, %v261_v48 }
  0x1f   : > { %v226_v47 = vadd.f32 %v225_v39, %v224_v42 }
  0x20   : > { %v265_v54 = vadd.f32 %v264_v50, %v263_v52 }
  0x21   : > { %v228_v51 = vadd.f32 %v227_v44, %v226_v47 }
  0x22   : > { %v267_v56 = vadd.f32 %v266_v53, %v265_v54 }
  0x23   : > { %229 = vadd.xlane.f32.xlu0 %v228_v51 }
  0x24   : > { %v269_v57 = vadd.f32 %v268_v55, %v267_v56 }
  0x27   : > { %270 = vadd.xlane.f32.xlu0 %v269_v57 }
  0xac   : > { %v230_v58 = vpop.xlane.xlu0 %229 }
  0xad   : > { %v231_v59 = vrot.slane %v230_v58, 4 }
  0xaf   : > { %v232_v60 = vadd.f32 %v231_v59, %v230_v58  ;;  %v402_v59 = vsel %vm400_vm2, %v383_v34, 0 }
  0xb0   : > { %v271_v62 = vpop.xlane.xlu0 %270 }
  0xb1   : > { %v233_v61 = vrot.slane %v232_v60, 2  ;;  %v272_v63 = vrot.slane %v271_v62, 4 }
  0xb3   : > { %v234_v4 = vadd.f32 %v233_v61, %v232_v60  ;;  %v273_v5 = vadd.f32 %v272_v63, %v271_v62 }
  0xb5   : > { %v235_v6 = vrot.slane %v234_v4, 1  ;;  %v274_v8 = vrot.slane %v273_v5, 2 }
  0xb7   : > { %v236_v9 = vadd.f32 %v235_v6, %v234_v4  ;;  %v275_v10 = vadd.f32 %v274_v8, %v273_v5 }
  0xb9   : > { %800 = vpush %v236_v9  ;;  %v276_v11 = vrot.slane %v275_v10, 1 }
  0xbb   : > { %v277_v13 = vadd.f32 %v276_v11, %v275_v10 }
  0xbd   : > { %802 = vpush %v277_v13 }
  0xea   : > { %s801_s21 = spop %800 }
  0xeb   : > { %v238_v14 = vstv %s801_s21 }
  0xec   : > { %v240_v15 = vmul.f32 0.0025, %v238_v14 }
  0xee   : > { %s803_s22 = spop %802  ;;  %v281_v19 = vmul.f32 %v240_v15, %v240_v15  ;;  %v288_v23 = vsub.f32 %v937_v7, %v240_v15  ;;  %v289_v25 = vsub.f32 %v946_v12, %v240_v15  ;;  %v290_v26 = vsub.f32 %v955_v17, %v240_v15 }
  0xef   : > { %v279_v16 = vstv %s803_s22  ;;  %v284_v27 = vsub.f32 %v919_v0, %v240_v15  ;;  %v285_v31 = vsub.f32 %v922_v1, %v240_v15  ;;  %v286_v32 = vsub.f32 %v925_v2, %v240_v15 }
  0xf0   : > { %v280_v18 = vmul.f32 0.0025, %v279_v16  ;;  %v287_v7 = vsub.f32 %v928_v3, %v240_v15  ;;  %v291_v12 = vsub.f32 %v965_v24, %v240_v15  ;;  %v292_v0 = vsub.f32 %v973_v30, %v240_v15 }
  0xf1   : > { %v872_v17 = vmov 0.0   ;;  %v293_v49 = vsub.f32 %v981_v36, %v240_v15 }
  0xf2   : > { %v282_v20 = vsub.f32 %v280_v18, %v281_v19  ;;  %775 = vmatprep.subr.bf16.mxu0 %v872_v17  ;;  %797 = vmatprep.subr.bf16.mxu1 %v872_v17 }
  0xf3   : > { %776 = vmatpush3.bf16.msra.mxu0 %v402_v59  ;;  %777 = vmatprep.mubr.msk.bf16.mxu0 %vm874_vm3, %v872_v17 }
  0xf4   : > { %v283_v21 = vmax.f32 %v282_v20, 0.0  ;;  %798 = vmatpush3.bf16.msra.mxu1 %v402_v59  ;;  %789 = vmatprep.mubr.msk.bf16.mxu1 %vm874_vm3, %v872_v17 }
  0xf6   : > { %v294_v22 = vadd.f32 1e-07, %v283_v21 }
  0xf8   : > { %840 = vrsqrt.f32 %v294_v22 }
 0x105   : > { %v841_v33 = vpop.eup %840 }
 0x106   : > { %v1015_v35 = vmul.f32 %v841_v33, %v288_v23  ;;  %v1017_v37 = vmul.f32 %v841_v33, %v289_v25  ;;  %v1019_v1 = vmul.f32 %v841_v33, %v290_v26  ;;  %v296_v2 = vmul.f32 %v841_v33, %v284_v27 }
 0x107   : > { %v297_v3 = vmul.f32 %v841_v33, %v285_v31  ;;  %v298_v38 = vmul.f32 %v841_v33, %v286_v32  ;;  %v299_v39 = vmul.f32 %v841_v33, %v287_v7  ;;  %v303_v40 = vmul.f32 %v841_v33, %v291_v12 }
 0x108   : > { %v324_v24 = vrot.slane %v1015_v35, 1  ;;  %v326_v30 = vrot.slane %v1017_v37, 1  ;;  %v328_v41 = vrot.slane %v1019_v1, 1  ;;  %v317_v42 = vrot.slane %v296_v2, 1 }
 0x109   : > { %v318_v43 = vrot.slane %v297_v3, 1  ;;  %v320_v44 = vrot.slane %v298_v38, 1  ;;  %v322_v45 = vrot.slane %v299_v39, 1  ;;  %v1024_v46 = vmul.f32 %v841_v33, %v292_v0 }
 0x10a   : > { %v327_v47 = vsel %vm316_vm1, %v324_v24, %v326_v30  ;;  %v329_v48 = vsel %vm316_vm1, %v326_v30, %v328_v41  ;;  %v330_v55 = vrot.slane %v303_v40, 1  ;;  %v305_v56 = vmul.f32 %v841_v33, %v293_v49 }
 0x10b   : > { %v825_v50 = vpack.i.bf16 %v329_v48, %v327_v47  ;;  %v319_v51 = vsel %vm316_vm1, %v317_v42, %v318_v43  ;;  %v321_v52 = vsel %vm316_vm1, %v318_v43, %v320_v44  ;;  %v323_v54 = vsel %vm316_vm1, %v320_v44, %v322_v45 }
 0x10c   : > { %v815_v53 = vpack.i.bf16 %v321_v52, %v319_v51  ;;  %v325_v57 = vsel %vm316_vm1, %v322_v45, %v324_v24  ;;  %v332_v58 = vrot.slane %v1024_v46, 1  ;;  %v331_v60 = vsel %vm316_vm1, %v328_v41, %v330_v55 }
 0x10d   : > { %826 = vrot.lane.b32.xlu0 %v825_v50, %s873_s27  ;;  %v820_v36 = vpack.i.bf16 %v325_v57, %v323_v54  ;;  %v334_v62 = vrot.slane %v305_v56, 1 }
 0x10e   : > { %816 = vrot.lane.b32.xlu1 %v815_v53, %s873_s27  ;;  %v333_v61 = vsel %vm316_vm1, %v330_v55, %v332_v58 }
 0x10f   : > { %v830_v63 = vpack.i.bf16 %v333_v61, %v331_v60  ;;  %v335_v4 = vsel %vm316_vm1, %v332_v58, %v334_v62 }
 0x110   : > { %v835_v5 = vpack.i.bf16 %v334_v62, %v335_v4 }
 0x112   : > { %821 = vrot.lane.b32.xlu1 %v820_v36, %s873_s27 }
 0x116   : > { %831 = vrot.lane.b32.xlu1 %v830_v63, %s873_s27 }
 0x11a   : > { %836 = vrot.lane.b32.xlu1 %v835_v5, %s873_s27 }
 0x17f   : > { %v827_v23 = vpop.permute.xlu0 %826 }
 0x180   : > { %v817_v6 = vpop.permute.xlu1 %816  ;;  %v829_v31 = vunpack.i.h.bf16 %v827_v23  ;;  %v828_v32 = vunpack.i.l.bf16 %v827_v23 }
 0x181   : > { %v819_v8 = vunpack.i.h.bf16 %v817_v6  ;;  %v818_v9 = vunpack.i.l.bf16 %v817_v6 }
 0x182   : > { %v371_v12 = vsel %vm209_vm0, %v1017_v37, %v829_v31  ;;  %v370_v0 = vsel %vm209_vm0, %v1015_v35, %v828_v32 }
 0x183   : > { %v367_v10 = vsel %vm209_vm0, %v297_v3, %v819_v8  ;;  %v366_v11 = vsel %vm209_vm0, %v296_v2, %v818_v9  ;;  %v380_v2 = vpack.c.bf16 %v371_v12, %v370_v0 }
 0x184   : > { %v378_v13 = vpack.c.bf16 %v367_v10, %v366_v11  ;;  %v822_v14 = vpop.permute.xlu1 %821 }
 0x185   : > { %v824_v15 = vunpack.i.h.bf16 %v822_v14  ;;  %v823_v16 = vunpack.i.l.bf16 %v822_v14 }
 0x186   : > { %778 = vmatmul.mubr.msk.bf16.vlgmr.msra.gmra.mxu0 %vm384_vm4, %v378_v13 }
 0x187   : > { %781 = vmatprep.mubr.msk.bf16.mxu0 %vm874_vm3, %v872_v17  ;;  %v369_v19 = vsel %vm209_vm0, %v299_v39, %v824_v15  ;;  %v368_v20 = vsel %vm209_vm0, %v298_v38, %v823_v16 }
 0x188   : > { %v832_v18 = vpop.permute.xlu1 %831  ;;  %v379_v27 = vpack.c.bf16 %v369_v19, %v368_v20 }
 0x189   : > { %v834_v21 = vunpack.i.h.bf16 %v832_v18  ;;  %v833_v22 = vunpack.i.l.bf16 %v832_v18 }
 0x18b   : > { %v373_v25 = vsel %vm209_vm0, %v303_v40, %v834_v21  ;;  %v372_v26 = vsel %vm209_vm0, %v1019_v1, %v833_v22 }
 0x18c   : > { %v381_v28 = vpack.c.bf16 %v373_v25, %v372_v26  ;;  %v837_v29 = vpop.permute.xlu1 %836 }
 0x18d   : > { %v839_v7 = vunpack.i.h.bf16 %v837_v29  ;;  %v838_v33 = vunpack.i.l.bf16 %v837_v29 }
 0x18e   : > { %782 = vmatmul.mubr.msk.bf16.gmra.mxu0 %vm384_vm4, %v379_v27  ;;  %790 = vmatmul.mubr.msk.bf16.vlgmr.msra.gmra.mxu1 %vm384_vm4, %v381_v28 }
 0x18f   : > { %785 = vmatprep.mubr.msk.bf16.mxu0 %vm874_vm3, %v872_v17  ;;  %793 = vmatprep.mubr.msk.bf16.mxu1 %vm874_vm3, %v872_v17  ;;  %v375_v34 = vsel %vm209_vm0, %v305_v56, %v839_v7  ;;  %v374_v1 = vsel %vm209_vm0, %v1024_v46, %v838_v33 }
 0x190   : > { %v382_v3 = vpack.c.bf16 %v375_v34, %v374_v1 }
 0x196   : > { %786 = vmatmul.mubr.msk.bf16.gmra.mxu0 %vm384_vm4, %v380_v2  ;;  %794 = vmatmul.mubr.msk.bf16.gmra.mxu1 %vm384_vm4, %v382_v3 }
 0x246   : > { %v438_v38 = vpop.f32.mrf.mxu0 }
 0x247   : > { %v478_v44 = vsel %vm477_vm5, %v438_v38, 0.0 }
 0x248   : > { %v779_v39 = vpop.f32.mrf.mxu0 }
 0x24a   : > { %v441_v17 = vpop.f32.mrf.mxu0 }
 0x24b   : > { %v479_v41 = vsel %vm477_vm5, %v441_v17, 0.0 }
 0x24c   : > { %v780_v40 = vpop.f32.mrf.mxu0  ;;  %v480_v46 = vadd.f32 %v479_v41, %v478_v44 }
 0x24e   : > { %v446_v24 = vpop.f32.mrf.mxu0  ;;  %v462_v37 = vpop.f32.mrf.mxu1 }
 0x24f   : > { %v481_v45 = vsel %vm477_vm5, %v446_v24, 0.0  ;;  %v489_v63 = vsel %vm477_vm5, %v462_v37, 0.0 }
 0x250   : > { %v783_v30 = vpop.f32.mrf.mxu0  ;;  %v791_v35 = vpop.f32.mrf.mxu1  ;;  %v482_v50 = vadd.f32 %v481_v45, %v480_v46 }
 0x252   : > { %v449_v42 = vpop.f32.mrf.mxu0  ;;  %v465_v43 = vpop.f32.mrf.mxu1 }
 0x253   : > { %v483_v49 = vsel %vm477_vm5, %v449_v42, 0.0  ;;  %v491_v5 = vsel %vm477_vm5, %v465_v43, 0.0 }
 0x254   : > { %v784_v47 = vpop.f32.mrf.mxu0  ;;  %v792_v48 = vpop.f32.mrf.mxu1  ;;  %v484_v54 = vadd.f32 %v483_v49, %v482_v50 }
 0x256   : > { %v454_v51 = vpop.f32.mrf.mxu0  ;;  %v470_v52 = vpop.f32.mrf.mxu1 }
 0x257   : > { %v485_v53 = vsel %vm477_vm5, %v454_v51, 0.0  ;;  %v493_v8 = vsel %vm477_vm5, %v470_v52, 0.0 }
 0x258   : > { %v787_v55 = vpop.f32.mrf.mxu0  ;;  %v795_v56 = vpop.f32.mrf.mxu1  ;;  %v486_v57 = vadd.f32 %v485_v53, %v484_v54 }
 0x25a   : > { %v457_v58 = vpop.f32.mrf.mxu0  ;;  %v473_v59 = vpop.f32.mrf.mxu1 }
 0x25b   : > { %v487_v36 = vsel %vm477_vm5, %v457_v58, 0.0  ;;  %v496_v10 = vsel %vm495_vm6, %v473_v59, 0.0 }
 0x25c   : > { %v488_v60 = vadd.f32 %v487_v36, %v486_v57  ;;  %v788_v61 = vpop.f32.mrf.mxu0  ;;  %v796_v62 = vpop.f32.mrf.mxu1 }
 0x25d   : > { %v765_v62 = vld [vmem:[%s1194_s2] ss:$0 sm:$0xff] }
 0x25e   : > { %v490_v4 = vadd.f32 %v489_v63, %v488_v60 }
 0x260   : > { %v492_v6 = vadd.f32 %v491_v5, %v490_v4 }
 0x262   : > { %v494_v9 = vadd.f32 %v493_v8, %v492_v6 }
 0x264   : > { %v497_v11 = vadd.f32 %v496_v10, %v494_v9 }
 0x266   : > { %v498_v13 = vrot.slane %v497_v11, 4 }
 0x268   : > { %v499_v14 = vadd.f32 %v498_v13, %v497_v11 }
 0x26a   : > { %v500_v15 = vrot.slane %v499_v14, 2 }
 0x26c   : > { %v501_v16 = vadd.f32 %v500_v15, %v499_v14 }
 0x26e   : > { %v502_v18 = vrot.slane %v501_v16, 1 }
 0x270   : > { %v503_v19 = vadd.f32 %v502_v18, %v501_v16  ;;  %v766_v18 = vld [vmem:[%s1195_s3] ss:$0 sm:$0xff] }
 0x272   : > { %v505_v20 = vmul.f32 0.012658228, %v503_v19 }
 0x274   : > { %v506_v21 = vsub.f32 %v438_v38, %v505_v20  ;;  %v507_v22 = vsub.f32 %v441_v17, %v505_v20  ;;  %v508_v23 = vsub.f32 %v446_v24, %v505_v20  ;;  %v509_v25 = vsub.f32 %v449_v42, %v505_v20 }
 0x275   : > { %v510_v28 = vsub.f32 %v454_v51, %v505_v20  ;;  %v511_v31 = vsub.f32 %v457_v58, %v505_v20  ;;  %v512_v0 = vsub.f32 %v462_v37, %v505_v20  ;;  %v513_v3 = vsub.f32 %v465_v43, %v505_v20 }
 0x276   : > { %v516_v26 = vmul.f32 %v506_v21, %v506_v21  ;;  %v517_v27 = vmul.f32 %v507_v22, %v507_v22  ;;  %v518_v29 = vmul.f32 %v508_v23, %v508_v23  ;;  %v519_v32 = vmul.f32 %v509_v25, %v509_v25 }
 0x277   : > { %v520_v34 = vmul.f32 %v510_v28, %v510_v28  ;;  %v521_v38 = vmul.f32 %v511_v31, %v511_v31  ;;  %v514_v40 = vsub.f32 %v470_v52, %v505_v20  ;;  %v522_v24 = vmul.f32 %v512_v0, %v512_v0 }
 0x278   : > { %v526_v7 = vsel %vm477_vm5, %v516_v26, 0.0  ;;  %v527_v33 = vsel %vm477_vm5, %v517_v27, 0.0  ;;  %v529_v1 = vsel %vm477_vm5, %v518_v29, 0.0  ;;  %v531_v39 = vsel %vm477_vm5, %v519_v32, 0.0 }
 0x279   : > { %v528_v12 = vadd.f32 %v527_v33, %v526_v7  ;;  %v533_v30 = vsel %vm477_vm5, %v520_v34, 0.0  ;;  %v515_v41 = vsub.f32 %v473_v59, %v505_v20  ;;  %v523_v42 = vmul.f32 %v513_v3, %v513_v3 }
 0x27a   : > { %v535_v44 = vsel %vm477_vm5, %v521_v38, 0.0  ;;  %v524_v37 = vmul.f32 %v514_v40, %v514_v40  ;;  %v537_v46 = vsel %vm477_vm5, %v522_v24, 0.0 }
 0x27b   : > { %v530_v2 = vadd.f32 %v529_v1, %v528_v12  ;;  %v525_v48 = vmul.f32 %v515_v41, %v515_v41  ;;  %v539_v43 = vsel %vm477_vm5, %v523_v42, 0.0 }
 0x27c   : > { %v541_v50 = vsel %vm477_vm5, %v524_v37, 0.0 }
 0x27d   : > { %v532_v17 = vadd.f32 %v531_v39, %v530_v2  ;;  %v543_v52 = vsel %vm495_vm6, %v525_v48, 0.0 }
 0x27f   : > { %v534_v35 = vadd.f32 %v533_v30, %v532_v17 }
 0x281   : > { %v536_v45 = vadd.f32 %v535_v44, %v534_v35 }
 0x283   : > { %v538_v47 = vadd.f32 %v537_v46, %v536_v45 }
 0x285   : > { %v540_v49 = vadd.f32 %v539_v43, %v538_v47 }
 0x287   : > { %v542_v51 = vadd.f32 %v541_v50, %v540_v49 }
 0x289   : > { %v544_v53 = vadd.f32 %v543_v52, %v542_v51 }
 0x28b   : > { %v545_v54 = vrot.slane %v544_v53, 4 }
 0x28d   : > { %v546_v55 = vadd.f32 %v545_v54, %v544_v53 }
 0x28f   : > { %v547_v56 = vrot.slane %v546_v55, 2 }
 0x291   : > { %v548_v57 = vadd.f32 %v547_v56, %v546_v55 }
 0x293   : > { %v549_v58 = vrot.slane %v548_v57, 1 }
 0x295   : > { %v550_v59 = vadd.f32 %v549_v58, %v548_v57 }
 0x297   : > { %v551_v36 = vmul.f32 0.012658228, %v550_v59 }
 0x299   : > { %v552_v60 = vadd.f32 1e-05, %v551_v36 }
 0x29b   : > { %842 = vrsqrt.f32 %v552_v60 }
 0x2a8   : > { %v843_v61 = vpop.eup %842 }
 0x2a9   : > { %v554_v63 = vmul.f32 %v843_v61, %v506_v21  ;;  %v555_v4 = vmul.f32 %v843_v61, %v507_v22  ;;  %v556_v5 = vmul.f32 %v843_v61, %v508_v23  ;;  %v557_v6 = vmul.f32 %v843_v61, %v509_v25 }
 0x2aa   : > { %v558_v8 = vmul.f32 %v843_v61, %v510_v28  ;;  %v559_v9 = vmul.f32 %v843_v61, %v511_v31  ;;  %v560_v10 = vmul.f32 %v843_v61, %v512_v0  ;;  %v561_v11 = vmul.f32 %v843_v61, %v513_v3 }
 0x2ab   : > { %v562_v13 = vmul.f32 %v843_v61, %v514_v40  ;;  %v563_v14 = vmul.f32 %v843_v61, %v515_v41  ;;  %v571_v15 = vmul.f32 %v765_v62, %v554_v63  ;;  %v572_v16 = vmul.f32 %v765_v62, %v555_v4 }
 0x2ac   : > { %v573_v19 = vmul.f32 %v765_v62, %v556_v5  ;;  %v574_v20 = vmul.f32 %v765_v62, %v557_v6  ;;  %v575_v26 = vmul.f32 %v765_v62, %v558_v8  ;;  %v576_v27 = vmul.f32 %v765_v62, %v559_v9 }
 0x2ad   : > { %v577_v21 = vmul.f32 %v765_v62, %v560_v10  ;;  %v578_v22 = vmul.f32 %v765_v62, %v561_v11  ;;  %v579_v23 = vmul.f32 %v765_v62, %v562_v13  ;;  %v580_v25 = vmul.f32 %v765_v62, %v563_v14 }
 0x2ae   : > { %v1092_v28 = vadd.f32 %v766_v18, %v571_v15  ;;  %v1094_v29 = vadd.f32 %v766_v18, %v572_v16  ;;  %v1096_v31 = vadd.f32 %v766_v18, %v573_v19  ;;  %v1098_v32 = vadd.f32 %v766_v18, %v574_v20 }
 0x2af   : > { %v1100_v7 = vadd.f32 %v766_v18, %v575_v26  ;;  %v1102_v33 = vadd.f32 %v766_v18, %v576_v27  ;;  %v1104_v12 = vadd.f32 %v766_v18, %v577_v21  ;;  %v1106_v0 = vadd.f32 %v766_v18, %v578_v22 }
 0x2b0   : > { %v1108_v34 = vadd.f32 %v766_v18, %v579_v23  ;;  %v1110_v1 = vadd.f32 %v766_v18, %v580_v25  ;;  %v598_v2 = vmul.f32 %v1092_v28, %v1092_v28  ;;  %v599_v3 = vmul.f32 %v1094_v29, %v1094_v29 }
 0x2b1   : > { %v600_v38 = vmul.f32 %v1096_v31, %v1096_v31  ;;  %v601_v39 = vmul.f32 %v1098_v32, %v1098_v32  ;;  %v602_v17 = vmul.f32 %v1100_v7, %v1100_v7  ;;  %v603_v40 = vmul.f32 %v1102_v33, %v1102_v33 }
 0x2b2   : > { %v604_v24 = vmul.f32 %v1104_v12, %v1104_v12  ;;  %v605_v30 = vmul.f32 %v1106_v0, %v1106_v0  ;;  %v606_v35 = vmul.f32 %v1108_v34, %v1108_v34  ;;  %v607_v41 = vmul.f32 %v1110_v1, %v1110_v1 }
 0x2b3   : > { %v608_v42 = vmul.f32 %v598_v2, %v1092_v28  ;;  %v609_v44 = vmul.f32 %v599_v3, %v1094_v29  ;;  %v610_v45 = vmul.f32 %v600_v38, %v1096_v31  ;;  %v611_v37 = vmul.f32 %v601_v39, %v1098_v32 }
 0x2b4   : > { %v612_v46 = vmul.f32 %v602_v17, %v1100_v7  ;;  %v613_v47 = vmul.f32 %v603_v40, %v1102_v33  ;;  %v614_v48 = vmul.f32 %v604_v24, %v1104_v12  ;;  %v615_v43 = vmul.f32 %v605_v30, %v1106_v0 }
 0x2b5   : > { %v616_v49 = vmul.f32 %v606_v35, %v1108_v34  ;;  %v617_v50 = vmul.f32 %v607_v41, %v1110_v1  ;;  %v618_v51 = vmul.f32 0.044715, %v608_v42  ;;  %v619_v52 = vmul.f32 0.044715, %v609_v44 }
 0x2b6   : > { %v620_v53 = vmul.f32 0.044715, %v610_v45  ;;  %v621_v54 = vmul.f32 0.044715, %v611_v37  ;;  %v622_v55 = vmul.f32 0.044715, %v612_v46 }
 0x2b7   : > { %v623_v56 = vmul.f32 0.044715, %v613_v47  ;;  %v624_v57 = vmul.f32 0.044715, %v614_v48  ;;  %v625_v58 = vmul.f32 0.044715, %v615_v43  ;;  %v628_v59 = vadd.f32 %v618_v51, %v1092_v28 }
 0x2b8   : > { %v626_v36 = vmul.f32 0.044715, %v616_v49  ;;  %v629_v60 = vadd.f32 %v619_v52, %v1094_v29  ;;  %v630_v61 = vadd.f32 %v620_v53, %v1096_v31  ;;  %v627_v62 = vmul.f32 0.044715, %v617_v50 }
 0x2b9   : > { %v631_v63 = vadd.f32 %v621_v54, %v1098_v32  ;;  %v632_v4 = vadd.f32 %v622_v55, %v1100_v7  ;;  %v633_v5 = vadd.f32 %v623_v56, %v1102_v33  ;;  %v634_v6 = vadd.f32 %v624_v57, %v1104_v12 }
 0x2ba   : > { %v638_v8 = vmul.f32 0.7978846, %v628_v59  ;;  %v635_v9 = vadd.f32 %v625_v58, %v1106_v0  ;;  %v639_v10 = vmul.f32 0.7978846, %v629_v60  ;;  %v640_v11 = vmul.f32 0.7978846, %v630_v61 }
 0x2bb   : > { %v641_v13 = vmul.f32 0.7978846, %v631_v63  ;;  %v636_v14 = vadd.f32 %v626_v36, %v1108_v34  ;;  %v642_v15 = vmul.f32 0.7978846, %v632_v4  ;;  %v637_v16 = vadd.f32 %v627_v62, %v1110_v1 }
 0x2bc   : > { %844 = vtanh.f32 %v638_v8  ;;  %v643_v18 = vmul.f32 0.7978846, %v633_v5  ;;  %v644_v19 = vmul.f32 0.7978846, %v634_v6  ;;  %v645_v20 = vmul.f32 0.7978846, %v635_v9 }
 0x2bd   : > { %846 = vtanh.f32 %v639_v10  ;;  %v646_v26 = vmul.f32 0.7978846, %v636_v14  ;;  %v647_v27 = vmul.f32 0.7978846, %v637_v16 }
 0x2be   : > { %848 = vtanh.f32 %v640_v11 }
 0x2bf   : > { %850 = vtanh.f32 %v641_v13 }
 0x2c0   : > { %852 = vtanh.f32 %v642_v15 }
 0x2c1   : > { %854 = vtanh.f32 %v643_v18 }
 0x2c2   : > { %856 = vtanh.f32 %v644_v19 }
 0x2c3   : > { %858 = vtanh.f32 %v645_v20 }
 0x2c4   : > { %860 = vtanh.f32 %v646_v26 }
 0x2c5   : > { %862 = vtanh.f32 %v647_v27 }
 0x2c9   : > { %v845_v21 = vpop.eup %844 }
 0x2ca   : > { %v847_v22 = vpop.eup %846  ;;  %v658_v23 = vadd.f32 1.0, %v845_v21 }
 0x2cb   : > { %v849_v25 = vpop.eup %848  ;;  %v659_v2 = vadd.f32 1.0, %v847_v22 }
 0x2cc   : > { %v851_v3 = vpop.eup %850  ;;  %v660_v38 = vadd.f32 1.0, %v849_v25  ;;  %v668_v39 = vmul.f32 0.5, %v658_v23 }
 0x2cd   : > { %v853_v17 = vpop.eup %852  ;;  %v661_v40 = vadd.f32 1.0, %v851_v3  ;;  %v669_v24 = vmul.f32 0.5, %v659_v2 }
 0x2ce   : > { %v855_v30 = vpop.eup %854  ;;  %v662_v35 = vadd.f32 1.0, %v853_v17  ;;  %v670_v41 = vmul.f32 0.5, %v660_v38  ;;  %v678_v42 = vmul.f32 %v668_v39, %v1092_v28 }
 0x2cf   : > { %v857_v44 = vpop.eup %856  ;;  %v663_v45 = vadd.f32 1.0, %v855_v30  ;;  %v671_v37 = vmul.f32 0.5, %v661_v40  ;;  %v679_v46 = vmul.f32 %v669_v24, %v1094_v29 }
 0x2d0   : > { %v859_v47 = vpop.eup %858  ;;  %v664_v48 = vadd.f32 1.0, %v857_v44  ;;  %v672_v43 = vmul.f32 0.5, %v662_v35  ;;  %v680_v49 = vmul.f32 %v670_v41, %v1096_v31  ;;  %688 = vst.msk [vmem:[%s1157_s8] sm:$0xff] %vm477_vm5, %v678_v42 }
 0x2d1   : > { %v861_v50 = vpop.eup %860  ;;  %v665_v51 = vadd.f32 1.0, %v859_v47  ;;  %v673_v52 = vmul.f32 0.5, %v663_v45  ;;  %v681_v28 = vmul.f32 %v671_v37, %v1098_v32  ;;  %689 = vst.msk [vmem:[%s1157_s8 + $0x8] sm:$0xff] %vm477_vm5, %v679_v46 }
 0x2d2   : > { %v863_v53 = vpop.eup %862  ;;  %v666_v29 = vadd.f32 1.0, %v861_v50  ;;  %v674_v54 = vmul.f32 0.5, %v664_v48  ;;  %v682_v55 = vmul.f32 %v672_v43, %v1100_v7  ;;  %690 = vst.msk [vmem:[%s1157_s8 + $0x10] sm:$0xff] %vm477_vm5, %v680_v49 }
 0x2d3   : > { %v667_v31 = vadd.f32 1.0, %v863_v53  ;;  %v675_v56 = vmul.f32 0.5, %v665_v51  ;;  %v683_v57 = vmul.f32 %v673_v52, %v1102_v33  ;;  %691 = vst.msk [vmem:[%s1157_s8 + $0x18] sm:$0xff] %vm477_vm5, %v681_v28 }
 0x2d4   : > { %v676_v32 = vmul.f32 0.5, %v666_v29  ;;  %v684_v58 = vmul.f32 %v674_v54, %v1104_v12  ;;  %692 = vst.msk [vmem:[%s1157_s8 + $0x20] sm:$0xff] %vm477_vm5, %v682_v55 }
 0x2d5   : > { %v677_v59 = vmul.f32 0.5, %v667_v31  ;;  %v685_v36 = vmul.f32 %v675_v56, %v1106_v0  ;;  %693 = vst.msk [vmem:[%s1157_s8 + $0x28] sm:$0xff] %vm477_vm5, %v683_v57 }
 0x2d6   : > { %v686_v7 = vmul.f32 %v676_v32, %v1108_v34  ;;  %694 = vst.msk [vmem:[%s1157_s8 + $0x30] sm:$0xff] %vm477_vm5, %v684_v58 }
 0x2d7   : > { %v687_v60 = vmul.f32 %v677_v59, %v1110_v1  ;;  %695 = vst.msk [vmem:[%s1157_s8 + $0x38] sm:$0xff] %vm477_vm5, %v685_v36 }
 0x2d8   : > { %696 = vst.msk [vmem:[%s1157_s8 + $0x40] sm:$0xff] %vm477_vm5, %v686_v7 }
 0x2d9   : > { %697 = vst.msk [vmem:[%s1157_s8 + $0x48] sm:$0x7f] %vm495_vm6, %v687_v60 }
 0x2da PF: > { %s14_s15 = sadd.s32 1, %s870_s15  }
 0x2db   : > { %p11_p4 = scmp.ge.s32.totalorder %s14_s15, 4  }
 0x2dd   :  { %13 = sbr.rel (!%p11_p4) target bundleno = 1 (0x1), region = 66 }

// kernel: _lambda_.7
= control target key start
LH: loop header
LB: loop body
LE: loop exit
PB: predicated region body
PF: predicated region fallthrough
CT: control target
= control target key end

     0   :  { %s4197_s24 = smov 0   ;;  %s5007_s0 = inlined_call_operand.vmem [shape: f32[2,22,32], index: 0, kind: input, shape index: {}]   ;;  %s5008_s1 = inlined_call_operand.vmem [shape: f32[128,32], index: 1, kind: input, shape index: {}]   ;;  %s5009_s2 = inlined_call_operand.vmem [shape: f32[1,32], index: 2, kind: input, shape index: {}]   ;;  %s5010_s3 = inlined_call_operand.vmem [shape: f32[1,32], index: 3, kind: input, shape index: {}]   ;;  %s5011_s4 = inlined_call_operand.vmem [shape: f32[1,32], index: 4, kind: input, shape index: {}]   ;;  %s5012_s5 = inlined_call_operand.vmem [shape: f32[2,32,96], index: 5, kind: input, shape index: {}]   ;;  %s5013_s6 = inlined_call_operand.vmem [shape: f32[2,1,96], index: 6, kind: input, shape index: {}]   ;;  %s5014_s7 = inlined_call_operand.vmem [shape: f32[2,32,32], index: 7, kind: input, shape index: {}]   ;;  %s5015_s8 = inlined_call_operand.vmem [shape: f32[2,1,32], index: 8, kind: input, shape index: {}]   ;;  %s5016_s9 = inlined_call_operand.vmem [shape: f32[2,1,32], index: 9, kind: input, shape index: {}, may-alias: {9,15}]   ;;  %s5017_s10 = inlined_call_operand.vmem [shape: f32[2,1,32], index: 10, kind: input, shape index: {}, may-alias: {10,16}]   ;;  %s5018_s11 = inlined_call_operand.vmem [shape: f32[2,32,64], index: 11, kind: input, shape index: {}]   ;;  %s5019_s12 = inlined_call_operand.vmem [shape: f32[2,1,64], index: 12, kind: input, shape index: {}]   ;;  %s5020_s13 = inlined_call_operand.vmem [shape: f32[2,64,32], index: 13, kind: input, shape index: {}]   ;;  %s5021_s14 = inlined_call_operand.vmem [shape: f32[2,1,32], index: 14, kind: input, shape index: {}]   ;;  %s5022_s15 = inlined_call_operand.vmem [shape: f32[2,1,32], index: 15, kind: input, shape index: {}, may-alias: {9,15}]   ;;  %s5023_s16 = inlined_call_operand.vmem [shape: f32[2,1,32], index: 16, kind: input, shape index: {}, may-alias: {10,16}]   ;;  %s5024_s17 = inlined_call_operand.vmem [shape: f32[2,19,32], index: 17, kind: output, shape index: {}]  }
   0x1   :  { %5035 = sst [smem:[#allocation2_spill]] %s5007_s0 }
   0x2   :  { %5036 = sst [smem:[#allocation3_spill]] %s5008_s1 }
   0x3 LB: > { %s3371_s25 = sadd.s32 4294967295, %s4095_s24   ;;  %p3375_p0 = scmp.ge.s32.totalorder %s4095_s24, 1  ;;  %s4095_s24 = sphi %s4197_s24, %s27_s24  }
   0x4   : > { %p487_p1 = scmp.lt.s32.totalorder %s4095_s24, 3 }
   0x6   : > { %p488_p2 = pnand %p3375_p0, %p487_p1 }
   0x7   : > { %p539_p3 = scmp.lt.s32.totalorder (!%p488_p2), %s3371_s25, 1  ;;  %s5037_s28 = sld [smem:[#allocation3_spill]] (!%p488_p2) }
   0x8   : > { %491 = sbr.rel (%p488_p2) target bundleno = 5939 (0x1733), region = 88  ;;  %s5038_s0 = sld [smem:[#allocation2_spill]] (!%p488_p2) }
   0x9   : > { %s5027_s22 = smov (!%p488_p2), 64   ;;  %s4098_s23 = smov (!%p488_p2), 32  }
   0xa   : > { %s5029_s21 = smov (!%p488_p2), 96   ;;  %s4100_s18 = smov (!%p488_p2), 120  }
   0xb   : > { %s4101_s19 = smov (!%p488_p2), 112   ;;  %s4102_s1 = smov (!%p488_p2), 104  }
   0xc   : > { %s4105_s26 = smov (!%p488_p2), 16   ;;  %s5033_s27 = smov (!%p488_p2), 24  }
   0xd   : > { %v627_v0 = vld [vmem:[%s5037_s28 + $0x70] sm:$0xff]  ;;  %v628_v1 = vld [vmem:[%s5037_s28 + $0x78] sm:$0xff]  ;;  %v625_v2 = vld [vmem:[%s5037_s28 + $0x60] sm:$0xff]  ;;  %s5045_s25 = smov (!%p539_p3, %s3371_s25), 1  ;;  %vm571_vm0 = vcmask 1045504   ;;  %vm556_vm1 = vcmask 1046528  }
   0xe   : > { %v626_v3 = vld [vmem:[%s5037_s28 + $0x68] sm:$0xff]  ;;  %v638_v4 = vpack.c.bf16 %v628_v1, %v627_v0  ;;  %s5026_s20 = smul.u32 24, %s5045_s25  ;;  %v623_v6 = vld [vmem:[%s5037_s28 + $0x50] sm:$0xff]  ;;  %v624_v7 = vld [vmem:[%s5037_s28 + $0x58] sm:$0xff]  ;;  %vm586_vm2 = vcmask 1044480   ;;  %vm601_vm3 = vcmask 261120  }
   0xf   : > { %v637_v5 = vpack.c.bf16 %v626_v3, %v625_v2  ;;  %v636_v11 = vpack.c.bf16 %v624_v7, %v623_v6  ;;  %v621_v16 = vld [vmem:[%s5037_s28 + $0x40] sm:$0xff]  ;;  %v622_v17 = vld [vmem:[%s5037_s28 + $0x48] sm:$0xff]  ;;  %v619_v32 = vld [vmem:[%s5037_s28 + $0x30] sm:$0xff]  ;;  %vm605_vm4 = vcmask 523264   ;;  %vm609_vm5 = vcmask 785408  }
  0x10   : > { %3585 = vmatprep.subr.bf16.mxu0 %v638_v4  ;;  %s543_s30 = scalar_lea.vmem %s5038_s0, %s5026_s20  ;;  %v635_v28 = vpack.c.bf16 %v622_v17, %v621_v16  ;;  %v620_v33 = vld [vmem:[%s5037_s28 + $0x38] sm:$0xff]  ;;  %v617_v36 = vld [vmem:[%s5037_s28 + $0x20] sm:$0xff]  ;;  %v618_v37 = vld [vmem:[%s5037_s28 + $0x28] sm:$0xff]  ;;  %vm738_vm6 = vcmask 261122   ;;  %vm724_vm7 = vcmask 1041408   ;;  %vm745_vm8 = vcmask 258048  }
  0x11   : > { %3586 = vmatpush3.bf16.msra.mxu0 %v638_v4  ;;  %v4231_v8 = vld [vmem:[%s543_s30 + $0x10] sm:$0x3f]  ;;  %v4233_v9 = vld [vmem:[%s543_s30] sm:$0xff]  ;;  %v4235_v10 = vld [vmem:[%s543_s30 + $0x8] sm:$0xff]  ;;  %v634_v35 = vpack.c.bf16 %v620_v33, %v619_v32  ;;  %v633_v38 = vpack.c.bf16 %v618_v37, %v617_v36  ;;  %vm958_vm9 = vcmask 64512   ;;  %vm1224_vm10 = vcmask 149504  }
  0x12   : > { %3587 = vmatprep.subr.bf16.mxu0 %v637_v5  ;;  %v575_v12 = vrot.slane %v4231_v8, 2  ;;  %v560_v13 = vrot.slane %v4231_v8, 1  ;;  %v572_v14 = vrot.slane %v4233_v9, 2  ;;  %v573_v15 = vrot.slane %v4235_v10, 2  ;;  %v615_v39 = vld [vmem:[%s5037_s28 + $0x10] sm:$0xff]  ;;  %v616_v40 = vld [vmem:[%s5037_s28 + $0x18] sm:$0xff] }
  0x13   : > { %v557_v18 = vrot.slane %v4233_v9, 1  ;;  %v558_v19 = vrot.slane %v4235_v10, 1  ;;  %v590_v20 = vrot.slane %v4231_v8, 3  ;;  %v587_v21 = vrot.slane %v4233_v9, 3  ;;  %v613_v42 = vld [vmem:[%s5037_s28] sm:$0xff]  ;;  %v614_v43 = vld [vmem:[%s5037_s28 + $0x8] sm:$0xff] }
  0x14   : > { %581 = vrot.lane.b32.xlu1 %v575_v12, %s5027_s22  ;;  %566 = vrot.lane.b32.xlu0 %v560_v13, %s4098_s23  ;;  %v574_v22 = vsel %vm571_vm0, %v572_v14, %v573_v15  ;;  %v576_v23 = vsel %vm571_vm0, %v573_v15, %v575_v12  ;;  %v588_v24 = vrot.slane %v4235_v10, 3  ;;  %v632_v41 = vpack.c.bf16 %v616_v40, %v615_v39  ;;  %v3378_v4 = vld [vmem:[%s5009_s2] ss:$0 sm:$0xff]  ;;  %s5039_s20 = smov 96  }
  0x15   : > { %3588 = vmatpush3.bf16.msra.mxu0 %v637_v5  ;;  %v3845_v25 = vpack.i.bf16 %v576_v23, %v574_v22  ;;  %v559_v26 = vsel %vm556_vm1, %v557_v18, %v558_v19  ;;  %v561_v27 = vsel %vm556_vm1, %v558_v19, %v560_v13  ;;  %v631_v44 = vpack.c.bf16 %v614_v43, %v613_v42 }
  0x16   : > { %3589 = vmatprep.subr.bf16.mxu0 %v636_v11  ;;  %v3840_v29 = vpack.i.bf16 %v561_v27, %v559_v26  ;;  %v589_v30 = vsel %vm586_vm2, %v587_v21, %v588_v24  ;;  %v591_v31 = vsel %vm586_vm2, %v588_v24, %v590_v20  ;;  %vm1217_vm11 = vcmask 154624  }
  0x17   : > { %v3850_v34 = vpack.i.bf16 %v591_v31, %v589_v30  ;;  %vm1370_vm12 = vcmask 1040384   ;;  %vm1649_vm13 = vcmask 130048   ;;  %vm1653_vm14 = vcmask 195584  }
  0x18   : > { %3846 = vrot.lane.b32.xlu1 %v3845_v25, %s5027_s22  ;;  %3841 = vrot.lane.b32.xlu0 %v3840_v29, %s4098_s23  ;;  %s5031_s23 = smov 8  }
  0x19   : > { %3590 = vmatpush3.bf16.msra.mxu0 %v636_v11 }
  0x1a   : > { %3591 = vmatprep.subr.bf16.mxu0 %v635_v28 }
  0x1c   : > { %596 = vrot.lane.b32.xlu1 %v590_v20, %s5029_s21  ;;  %3851 = vrot.lane.b32.xlu0 %v3850_v34, %s5029_s21 }
  0x1d   : > { %3592 = vmatpush3.bf16.msra.mxu0 %v635_v28 }
  0x1e   : > { %3593 = vmatprep.subr.bf16.mxu0 %v634_v35 }
  0x21   : > { %3594 = vmatpush3.bf16.msra.mxu0 %v634_v35 }
  0x22   : > { %3595 = vmatprep.subr.bf16.mxu0 %v633_v38 }
  0x25   : > { %3596 = vmatpush3.bf16.msra.mxu0 %v633_v38 }
  0x26   : > { %3597 = vmatprep.subr.bf16.mxu0 %v632_v41 }
  0x29   : > { %3598 = vmatpush3.bf16.msra.mxu0 %v632_v41 }
  0x2a   : > { %3599 = vmatprep.subr.bf16.mxu0 %v631_v44 }
  0x2d   : > { %3600 = vmatpush3.bf16.msra.mxu0 %v631_v44 }
  0x86   : > { %v582_v45 = vpop.permute.xlu1 %581  ;;  %v567_v46 = vpop.permute.xlu0 %566 }
  0x87   : > { %v604_v51 = vsel %vm601_vm3, %v4231_v8, %v567_v46 }
  0x88   : > { %v608_v58 = vsel %vm605_vm4, %v604_v51, %v582_v45 }
  0x8a   : > { %v3847_v47 = vpop.permute.xlu1 %3846  ;;  %v3842_v48 = vpop.permute.xlu0 %3841 }
  0x8b   : > { %v3844_v49 = vunpack.i.h.bf16 %v3842_v48  ;;  %v3843_v50 = vunpack.i.l.bf16 %v3842_v48  ;;  %v3849_v52 = vunpack.i.h.bf16 %v3847_v47  ;;  %v3848_v53 = vunpack.i.l.bf16 %v3847_v47 }
  0x8d   : > { %v602_v54 = vsel %vm601_vm3, %v4233_v9, %v3843_v50  ;;  %v603_v55 = vsel %vm601_vm3, %v4235_v10, %v3844_v49 }
  0x8e   : > { %v597_v56 = vpop.permute.xlu1 %596  ;;  %v3852_v57 = vpop.permute.xlu0 %3851  ;;  %v606_v62 = vsel %vm605_vm4, %v602_v54, %v3848_v53  ;;  %v607_v63 = vsel %vm605_vm4, %v603_v55, %v3849_v52 }
  0x8f   : > { %v3854_v59 = vunpack.i.h.bf16 %v3852_v57  ;;  %v3853_v60 = vunpack.i.l.bf16 %v3852_v57  ;;  %v612_v61 = vsel %vm609_vm5, %v608_v58, %v597_v56 }
  0x90   : > { %v630_v3 = vpack.c.bf16 %v612_v61, %v612_v61 }
  0x91   : > { %v610_v0 = vsel %vm609_vm5, %v606_v62, %v3853_v60  ;;  %v611_v1 = vsel %vm609_vm5, %v607_v63, %v3854_v59 }
  0x92   : > { %v629_v2 = vpack.c.bf16 %v611_v1, %v610_v0  ;;  %v800_v1 = vld [vmem:[%s5012_s5 + $0x10] sm:$0xff] }
  0x94   : > { %3601 = vmatprep.mubr.bf16.mxu0 %v629_v2  ;;  %v801_v2 = vld [vmem:[%s5012_s5 + $0x18] sm:$0xff] }
  0x95   : > { %3602 = vmatmul.mubr.bf16.vlgmr.msra.gmra.mxu0 %v630_v3  ;;  %v798_v3 = vld [vmem:[%s5012_s5] sm:$0xff] }
 0x155   : > { %v3603_v5 = vpop.f32.mrf.mxu0 }
 0x156   : > { %v689_v6 = vadd.f32 %v3603_v5, %v3378_v4  ;;  %v799_v5 = vld [vmem:[%s5012_s5 + $0x8] sm:$0xff] }
 0x157   : > { %v680_v7 = vpop.f32.mrf.mxu0 }
 0x158   : > { %v696_v11 = vmul.f32 %v689_v6, %v689_v6  ;;  %v681_v12 = vadd.f32 %v3378_v4, %v680_v7 }
 0x159   : > { %v3604_v13 = vpop.f32.mrf.mxu0 }
 0x15a   : > { %v699_v14 = vmul.f32 %v696_v11, %v689_v6  ;;  %v694_v15 = vmul.f32 %v681_v12, %v681_v12 }
 0x15b   : > { %v683_v16 = vpop.f32.mrf.mxu0 }
 0x15c   : > { %v702_v17 = vmul.f32 0.044715, %v699_v14  ;;  %v697_v18 = vmul.f32 %v694_v15, %v681_v12  ;;  %v684_v19 = vadd.f32 %v3378_v4, %v683_v16  ;;  %v805_v4 = vpack.c.bf16 %v801_v2, %v800_v1 }
 0x15e   : > { %v705_v20 = vadd.f32 %v702_v17, %v689_v6  ;;  %v700_v21 = vmul.f32 0.044715, %v697_v18  ;;  %v695_v22 = vmul.f32 %v684_v19, %v684_v19  ;;  %3605 = vmatprep.subr.bf16.mxu1 %v805_v4 }
 0x15f   : > { %3606 = vmatpush3.bf16.msra.mxu1 %v805_v4 }
 0x160   : > { %v708_v23 = vmul.f32 0.7978846, %v705_v20  ;;  %v703_v24 = vadd.f32 %v700_v21, %v681_v12  ;;  %v698_v25 = vmul.f32 %v695_v22, %v684_v19  ;;  %v3379_v21 = vld [vmem:[%s5010_s3] ss:$0 sm:$0xff] }
 0x162   : > { %3945 = vtanh.f32 %v708_v23  ;;  %v706_v26 = vmul.f32 0.7978846, %v703_v24  ;;  %v701_v27 = vmul.f32 0.044715, %v698_v25 }
 0x164   : > { %3947 = vtanh.f32 %v706_v26  ;;  %v704_v28 = vadd.f32 %v701_v27, %v684_v19  ;;  %v3380_v27 = vld [vmem:[%s5011_s4] ss:$0 sm:$0xff] }
 0x166   : > { %v707_v29 = vmul.f32 0.7978846, %v704_v28 }
 0x168   : > { %3949 = vtanh.f32 %v707_v29 }
 0x16f   : > { %v3946_v30 = vpop.eup %3945 }
 0x170   : > { %v714_v31 = vadd.f32 1.0, %v3946_v30 }
 0x171   : > { %v3948_v32 = vpop.eup %3947 }
 0x172   : > { %v712_v33 = vadd.f32 1.0, %v3948_v32  ;;  %v717_v35 = vmul.f32 0.5, %v714_v31 }
 0x174   : > { %v715_v34 = vmul.f32 0.5, %v712_v33  ;;  %v720_v41 = vmul.f32 %v717_v35, %v689_v6  ;;  %v804_v6 = vpack.c.bf16 %v799_v5, %v798_v3 }
 0x175   : > { %v3950_v36 = vpop.eup %3949 }
 0x176   : > { %v718_v37 = vmul.f32 %v715_v34, %v681_v12  ;;  %v713_v38 = vadd.f32 1.0, %v3950_v36  ;;  %v728_v46 = vrot.slane %v720_v41, 6  ;;  %3607 = vmatprep.subr.bf16.mxu1 %v804_v6 }
 0x177   : > { %3608 = vmatpush3.bf16.msra.mxu1 %v804_v6 }
 0x178   : > { %v725_v39 = vrot.slane %v718_v37, 6  ;;  %v716_v40 = vmul.f32 0.5, %v713_v38  ;;  %v3381_v38 = vld [vmem:[%s5013_s6] ss:$0 sm:$0xff] }
 0x17a   : > { %v733_v42 = vadd.f32 %v725_v39, %v4233_v9  ;;  %v719_v43 = vmul.f32 %v716_v40, %v684_v19 }
 0x17c   : > { %v739_v44 = vsel %vm738_vm6, %v733_v42, 0.0  ;;  %v726_v45 = vrot.slane %v719_v43, 6 }
 0x17d   : > { %740 = vadd.xlane.f32.xlu0 %v739_v44 }
 0x17e   : > { %v729_v47 = vsel %vm724_vm7, %v726_v45, %v728_v46  ;;  %v727_v48 = vsel %vm724_vm7, %v725_v39, %v726_v45 }
 0x17f   : > { %v735_v49 = vadd.f32 %v729_v47, %v4231_v8  ;;  %v734_v50 = vadd.f32 %v727_v48, %v4235_v10 }
 0x181   : > { %v746_v51 = vsel %vm745_vm8, %v735_v49, 0.0  ;;  %v742_v9 = vsel %vm601_vm3, %v734_v50, 0.0 }
 0x182   : > { %747 = vadd.xlane.f32.xlu0 %v746_v51  ;;  %743 = vadd.xlane.f32.xlu1 %v742_v9 }
 0x206   : > { %v741_v52 = vpop.xlane.xlu0 %740 }
 0x207   : > { %v750_v53 = vmul.f32 0.03125, %v741_v52 }
 0x209   : > { %v753_v54 = vsub.f32 %v733_v42, %v750_v53 }
 0x20b   : > { %v748_v55 = vpop.xlane.xlu0 %747  ;;  %v744_v56 = vpop.xlane.xlu1 %743  ;;  %v756_v57 = vmul.f32 %v753_v54, %v753_v54 }
 0x20c   : > { %v752_v58 = vmul.f32 0.03125, %v748_v55  ;;  %v751_v59 = vmul.f32 0.03125, %v744_v56 }
 0x20d   : > { %v759_v60 = vsel %vm738_vm6, %v756_v57, 0.0 }
 0x20e   : > { %v755_v61 = vsub.f32 %v735_v49, %v752_v58  ;;  %v754_v8 = vsub.f32 %v734_v50, %v751_v59  ;;  %760 = vadd.xlane.f32.xlu0 %v759_v60 }
 0x210   : > { %v758_v10 = vmul.f32 %v755_v61, %v755_v61  ;;  %v757_v62 = vmul.f32 %v754_v8, %v754_v8 }
 0x212   : > { %v765_v63 = vsel %vm745_vm8, %v758_v10, 0.0  ;;  %v762_v0 = vsel %vm601_vm3, %v757_v62, 0.0 }
 0x213   : > { %766 = vadd.xlane.f32.xlu0 %v765_v63  ;;  %763 = vadd.xlane.f32.xlu1 %v762_v0 }
 0x297   : > { %v761_v7 = vpop.xlane.xlu0 %760 }
 0x298   : > { %v768_v11 = vmul.f32 0.03125, %v761_v7 }
 0x29a   : > { %v771_v12 = vadd.f32 1e-05, %v768_v11 }
 0x29c   : > { %3951 = vrsqrt.f32 %v771_v12  ;;  %v767_v13 = vpop.xlane.xlu0 %766  ;;  %v764_v14 = vpop.xlane.xlu1 %763 }
 0x29d   : > { %v770_v15 = vmul.f32 0.03125, %v767_v13  ;;  %v769_v16 = vmul.f32 0.03125, %v764_v14 }
 0x29f   : > { %v773_v17 = vadd.f32 1e-05, %v770_v15  ;;  %v772_v18 = vadd.f32 1e-05, %v769_v16 }
 0x2a1   : > { %3953 = vrsqrt.f32 %v773_v17 }
 0x2a2   : > { %3955 = vrsqrt.f32 %v772_v18 }
 0x2a9   : > { %v3952_v19 = vpop.eup %3951 }
 0x2aa   : > { %v777_v20 = vmul.f32 %v3952_v19, %v753_v54 }
 0x2ac   : > { %v786_v26 = vmul.f32 %v3379_v21, %v777_v20 }
 0x2ae   : > { %v3954_v22 = vpop.eup %3953  ;;  %v4329_v31 = vadd.f32 %v3380_v27, %v786_v26 }
 0x2af   : > { %v3956_v23 = vpop.eup %3955  ;;  %v779_v24 = vmul.f32 %v3954_v22, %v755_v61 }
 0x2b0   : > { %v778_v25 = vmul.f32 %v3956_v23, %v754_v8 }
 0x2b1   : > { %v788_v28 = vmul.f32 %v3379_v21, %v779_v24 }
 0x2b2   : > { %v787_v29 = vmul.f32 %v3379_v21, %v778_v25 }
 0x2b3   : > { %v4327_v30 = vadd.f32 %v3380_v27, %v788_v28 }
 0x2b4   : > { %v4331_v32 = vadd.f32 %v3380_v27, %v787_v29 }
 0x2b5   : > { %v803_v33 = vpack.c.bf16 %v4327_v30, %v4327_v30 }
 0x2b6   : > { %v802_v34 = vpack.c.bf16 %v4331_v32, %v4329_v31 }
 0x2b7   : > { %v817_v35 = vrot.slane %v803_v33, 1 }
 0x2b8   : > { %v816_v36 = vrot.slane %v802_v34, 1 }
 0x2ba   : > { %v818_v37 = vsel %vm556_vm1, %v816_v36, %v817_v35 }
 0x2bb   : > { %3609 = vmatprep.mubr.msk.bf16.mxu1 %vm601_vm3, %v818_v37 }
 0x2bc   : > { %3610 = vmatmul.mubr.msk.bf16.vlgmr.msra.gmra.mxu1 %vm601_vm3, %v817_v35 }
 0x37c   : > { %v3611_v39 = vpop.f32.mrf.mxu1 }
 0x37d   : > { %v868_v40 = vadd.f32 %v3611_v39, %v3381_v38 }
 0x37e   : > { %v859_v41 = vpop.f32.mrf.mxu1 }
 0x37f   : > { %921 = vrot.lane.b32.xlu1 %v868_v40, %s4100_s18  ;;  %v860_v43 = vadd.f32 %v3381_v38, %v859_v41  ;;  %v4350_v51 = vpack.c.bf16 %v868_v40, %v868_v40  ;;  %v875_v63 = vmul.f32 0.35355338, %v868_v40 }
 0x380   : > { %v3612_v42 = vpop.f32.mrf.mxu1 }
 0x381   : > { %v873_v46 = vmul.f32 0.35355338, %v860_v43  ;;  %v907_v12 = vpack.c.bf16 %v875_v63, %v875_v63 }
 0x382   : > { %v862_v44 = vpop.f32.mrf.mxu1 }
 0x383   : > { %v863_v45 = vadd.f32 %v3381_v38, %v862_v44  ;;  %930 = vrot.lane.b32.xlu1 %v868_v40, %s4101_s19 }
 0x385   : > { %v874_v47 = vmul.f32 0.35355338, %v863_v45  ;;  %v3855_v48 = vpack.i.bf16 %v863_v45, %v860_v43  ;;  %v4352_v9 = vpack.c.bf16 %v863_v45, %v860_v43 }
 0x387   : > { %939 = vrot.lane.b32.xlu1 %v868_v40, %s4102_s1  ;;  %3856 = vrot.lane.b32.xlu0 %v3855_v48, %s4100_s18  ;;  %v906_v49 = vpack.c.bf16 %v874_v47, %v873_v46  ;;  %v3870_v50 = vpack.i.bf16 %v874_v47, %v873_v46 }
 0x389   : > { %3617 = vmatprep.mubr.msk.bf16.mxu1 %vm958_vm9, %v906_v49 }
 0x38b   : > { %3866 = vrot.lane.b32.xlu1 %v3855_v48, %s4102_s1  ;;  %3861 = vrot.lane.b32.xlu0 %v3855_v48, %s4101_s19 }
 0x38f   : > { %956 = vrot.lane.b32.xlu0 %v4350_v51, %s5029_s21  ;;  %954 = vrot.lane.b32.xlu1 %v4352_v9, %s5029_s21 }
 0x3f1   : > { %v922_v52 = vpop.permute.xlu1 %921 }
 0x3f2   : > { %v4358_v53 = vpack.c.bf16 %v922_v52, %v922_v52 }
 0x3f4   : > { %1023 = vrot.lane.b32.xlu0 %v4358_v53, %s5029_s21 }
 0x3f5   : > { %v931_v54 = vpop.permute.xlu1 %930 }
 0x3f6   : > { %v4363_v57 = vpack.c.bf16 %v931_v54, %v931_v54 }
 0x3f8   : > { %3871 = vrot.lane.b32.xlu0 %v3870_v50, %s4100_s18 }
 0x3f9   : > { %v940_v55 = vpop.permute.xlu1 %939  ;;  %v3857_v56 = vpop.permute.xlu0 %3856 }
 0x3fa   : > { %v3859_v58 = vunpack.i.h.bf16 %v3857_v56  ;;  %v3858_v59 = vunpack.i.l.bf16 %v3857_v56  ;;  %v4378_v4 = vpack.c.bf16 %v940_v55, %v940_v55 }
 0x3fc   : > { %1089 = vrot.lane.b32.xlu0 %v4363_v57, %s5029_s21  ;;  %v4367_v60 = vpack.c.bf16 %v3859_v58, %v3858_v59 }
 0x3fd   : > { %v3867_v61 = vpop.permute.xlu1 %3866  ;;  %v3862_v8 = vpop.permute.xlu0 %3861 }
 0x3fe   : > { %v3864_v10 = vunpack.i.h.bf16 %v3862_v8  ;;  %v3863_v62 = vunpack.i.l.bf16 %v3862_v8  ;;  %1021 = vrot.lane.b32.xlu1 %v4367_v60, %s5029_s21  ;;  %v3869_v5 = vunpack.i.h.bf16 %v3867_v61  ;;  %v3868_v6 = vunpack.i.l.bf16 %v3867_v61 }
 0x400   : > { %v4371_v0 = vpack.c.bf16 %v3864_v10, %v3863_v62  ;;  %v4384_v7 = vpack.c.bf16 %v3869_v5, %v3868_v6 }
 0x401   : > { %v957_v1 = vpop.permute.xlu0 %956  ;;  %v955_v3 = vpop.permute.xlu1 %954 }
 0x402   : > { %3805 = vmatprep.subr.msk.bf16.mxu1 %vm958_vm9, %v957_v1  ;;  %883 = vrot.lane.b32.xlu1 %v875_v63, %s4100_s18  ;;  %v969_v2 = vsel %vm958_vm9, %v957_v1, 0  ;;  %v966_v11 = vsel %vm958_vm9, %v955_v3, 0 }
 0x403   : > { %1087 = vrot.lane.b32.xlu0 %v4371_v0, %s5029_s21  ;;  %3614 = vmatpush3.bf16.xpose.msra.mxu1 %v969_v2 }
 0x404   : > { %3806 = vmatprep.subr.msk.bf16.mxu1 %vm958_vm9, %v955_v3 }
 0x406   : > { %1155 = vrot.lane.b32.xlu1 %v4378_v4, %s5029_s21 }
 0x407   : > { %3876 = vrot.lane.b32.xlu0 %v3870_v50, %s4101_s19 }
 0x40a   : > { %1153 = vrot.lane.b32.xlu1 %v4384_v7, %s5029_s21 }
 0x40b   : > { %3881 = vrot.lane.b32.xlu0 %v3870_v50, %s4102_s1  ;;  %3616 = vmatpush3.bf16.xpose.msra.mxu1 %v966_v11 }
 0x40e   : > { %892 = vrot.lane.b32.xlu1 %v875_v63, %s4101_s19 }
 0x412   : > { %901 = vrot.lane.b32.xlu1 %v875_v63, %s4102_s1  ;;  %3618 = vmatmul.mubr.msk.bf16.vlgmr.msra.gmra.mxu1 %vm958_vm9, %v907_v12 }
 0x466   : > { %v1024_v13 = vpop.permute.xlu0 %1023 }
 0x467   : > { %3807 = vmatprep.subr.msk.bf16.mxu1 %vm958_vm9, %v1024_v13  ;;  %v1035_v14 = vsel %vm958_vm9, %v1024_v13, 0 }
 0x468   : > { %3622 = vmatpush3.bf16.xpose.msra.mxu1 %v1035_v14 }
 0x46a   : > { %v3872_v15 = vpop.permute.xlu0 %3871 }
 0x46b   : > { %v3874_v16 = vunpack.i.h.bf16 %v3872_v15  ;;  %v3873_v17 = vunpack.i.l.bf16 %v3872_v15 }
 0x46d   : > { %v908_v18 = vpack.c.bf16 %v3874_v16, %v3873_v17 }
 0x46e   : > { %v1090_v19 = vpop.permute.xlu0 %1089 }
 0x46f   : > { %3625 = vmatprep.mubr.msk.bf16.mxu1 %vm958_vm9, %v908_v18  ;;  %3809 = vmatprep.subr.msk.bf16.mxu0 %vm958_vm9, %v1090_v19  ;;  %v1101_v20 = vsel %vm958_vm9, %v1090_v19, 0 }
 0x470   : > { %v1022_v21 = vpop.permute.xlu1 %1021  ;;  %3630 = vmatpush3.bf16.xpose.msra.mxu0 %v1101_v20 }
 0x471   : > { %3808 = vmatprep.subr.msk.bf16.mxu1 %vm958_vm9, %v1022_v21  ;;  %v1032_v22 = vsel %vm958_vm9, %v1022_v21, 0 }
 0x472   : > { %3624 = vmatpush3.bf16.xpose.msra.mxu1 %v1032_v22 }
 0x474   : > { %v884_v23 = vpop.permute.xlu1 %883 }
 0x475   : > { %v1088_v24 = vpop.permute.xlu0 %1087  ;;  %v909_v25 = vpack.c.bf16 %v884_v23, %v884_v23 }
 0x476   : > { %3810 = vmatprep.subr.msk.bf16.mxu0 %vm958_vm9, %v1088_v24  ;;  %v1098_v26 = vsel %vm958_vm9, %v1088_v24, 0 }
 0x478   : > { %v1156_v27 = vpop.permute.xlu1 %1155  ;;  %3632 = vmatpush3.bf16.xpose.msra.mxu0 %v1098_v26 }
 0x479   : > { %v3877_v28 = vpop.permute.xlu0 %3876  ;;  %3626 = vmatmul.mubr.msk.bf16.vlgmr.msra.gmra.mxu1 %vm958_vm9, %v909_v25  ;;  %3811 = vmatprep.subr.msk.bf16.mxu1 %vm958_vm9, %v1156_v27  ;;  %v1167_v29 = vsel %vm958_vm9, %v1156_v27, 0 }
 0x47a   : > { %v3879_v33 = vunpack.i.h.bf16 %v3877_v28  ;;  %v3878_v34 = vunpack.i.l.bf16 %v3877_v28  ;;  %3638 = vmatpush3.bf16.xpose.msra.mxu1 %v1167_v29 }
 0x47c   : > { %v910_v35 = vpack.c.bf16 %v3879_v33, %v3878_v34  ;;  %v1154_v36 = vpop.permute.xlu1 %1153 }
 0x47d   : > { %v3882_v37 = vpop.permute.xlu0 %3881  ;;  %3812 = vmatprep.subr.msk.bf16.mxu1 %vm958_vm9, %v1154_v36  ;;  %v1164_v43 = vsel %vm958_vm9, %v1154_v36, 0 }
 0x47e   : > { %v3884_v38 = vunpack.i.h.bf16 %v3882_v37  ;;  %v3883_v39 = vunpack.i.l.bf16 %v3882_v37  ;;  %3633 = vmatprep.mubr.msk.bf16.mxu0 %vm958_vm9, %v910_v35 }
 0x480   : > { %v912_v40 = vpack.c.bf16 %v3884_v38, %v3883_v39  ;;  %v893_v41 = vpop.permute.xlu1 %892 }
 0x481   : > { %v911_v42 = vpack.c.bf16 %v893_v41, %v893_v41 }
 0x482   : > { %3641 = vmatprep.mubr.msk.bf16.mxu1 %vm958_vm9, %v912_v40  ;;  %3640 = vmatpush3.bf16.xpose.msra.mxu1 %v1164_v43 }
 0x483   : > { %3634 = vmatmul.mubr.msk.bf16.vlgmr.msra.gmra.mxu0 %vm958_vm9, %v911_v42 }
 0x484   : > { %v902_v44 = vpop.permute.xlu1 %901 }
 0x485   : > { %v913_v45 = vpack.c.bf16 %v902_v44, %v902_v44  ;;  %v4103_v44 = vmov 65535  }
 0x489   : > { %3642 = vmatmul.mubr.msk.bf16.vlgmr.msra.gmra.mxu1 %vm958_vm9, %v913_v45  ;;  %v1371_v45 = vsel %vm1370_vm12, 4294967295, %v4103_v44 }
 0x4d2   : > { %v3619_v46 = vpop.f32.mrf.mxu1 }
 0x4d3   : > { %v1225_v47 = vsel %vm1224_vm10, %v3619_v46, -inf }
 0x4d4   : > { %1226 = vmax.xlane.f32.xlu0 %v1225_v47  ;;  %v1005_v48 = vpop.f32.mrf.mxu1 }
 0x4d5   : > { %v1218_v50 = vsel %vm1217_vm11, %v1005_v48, -inf }
 0x4d6   : > { %v3620_v49 = vpop.f32.mrf.mxu1 }
 0x4d8   : > { %1219 = vmax.xlane.f32.xlu0 %v1218_v50  ;;  %v1008_v52 = vpop.f32.mrf.mxu1 }
 0x4d9   : > { %v1221_v54 = vsel %vm1217_vm11, %v1008_v52, -inf }
 0x4da   : > { %1222 = vmax.xlane.f32.xlu1 %v1221_v54  ;;  %v4473_v54 = vsel %vm724_vm7, %v1371_v45, 0 }
 0x539   : > { %v3627_v55 = vpop.f32.mrf.mxu1 }
 0x53a   : > { %v1234_v56 = vsel %vm1224_vm10, %v3627_v55, -inf }
 0x53b   : > { %1235 = vmax.xlane.f32.xlu0 %v1234_v56  ;;  %v1071_v58 = vpop.f32.mrf.mxu1 }
 0x53c   : > { %v1228_v61 = vsel %vm1217_vm11, %v1071_v58, -inf }
 0x53d   : > { %v3628_v59 = vpop.f32.mrf.mxu1 }
 0x53f   : > { %1229 = vmax.xlane.f32.xlu0 %v1228_v61  ;;  %v4419_v63 = vpop.f32.mrf.mxu1 }
 0x540   : > { %v1231_v12 = vsel %vm1217_vm11, %v4419_v63, -inf }
 0x543   : > { %v3635_v8 = vpop.f32.mrf.mxu0 }
 0x544   : > { %v1243_v10 = vsel %vm1224_vm10, %v3635_v8, -inf }
 0x545   : > { %v4417_v62 = vpop.f32.mrf.mxu0  ;;  %1244 = vmax.xlane.f32.xlu1 %v1243_v10 }
 0x546   : > { %v1237_v2 = vsel %vm1217_vm11, %v4417_v62, -inf }
 0x547   : > { %v3636_v1 = vpop.f32.mrf.mxu0 }
 0x549   : > { %v4423_v3 = vpop.f32.mrf.mxu0  ;;  %1238 = vmax.xlane.f32.xlu1 %v1237_v2  ;;  %v4425_v5 = vpop.f32.mrf.mxu1 }
 0x54a   : > { %v1240_v6 = vsel %vm1217_vm11, %v4423_v3, -inf  ;;  %v1252_v15 = vsel %vm1224_vm10, %v4425_v5, -inf }
 0x54b   : > { %1241 = vmax.xlane.f32.xlu0 %v1240_v6  ;;  %v4429_v11 = vpop.f32.mrf.mxu1 }
 0x54c   : > { %v1246_v14 = vsel %vm1217_vm11, %v4429_v11, -inf }
 0x54d   : > { %1232 = vmax.xlane.f32.xlu1 %v1231_v12  ;;  %v3644_v13 = vpop.f32.mrf.mxu1 }
 0x54f   : > { %1247 = vmax.xlane.f32.xlu0 %v1246_v14  ;;  %v4443_v19 = vpop.f32.mrf.mxu1 }
 0x550   : > { %v1249_v20 = vsel %vm1217_vm11, %v4443_v19, -inf }
 0x553   : > { %1253 = vmax.xlane.f32.xlu0 %v1252_v15 }
 0x55e   : > { %1361 = vrot.lane.b32.xlu1 %v4350_v51, %s5027_s22 }
 0x563   : > { %v1223_v16 = vpop.xlane.xlu1 %1222 }
 0x564   : > { %v1256_v17 = vsub.f32 %v1008_v52, %v1223_v16 }
 0x566   : > { %v1269_v18 = vmul.f32 1.442695, %v1256_v17 }
 0x568   : > { %3957 = vpow2.f32 %v1269_v18 }
 0x569   : > { %1426 = vrot.lane.b32.xlu0 %v4358_v53, %s5027_s22  ;;  %v1227_v53 = vpop.xlane.xlu0 %1226 }
 0x56d   : > { %1488 = vrot.lane.b32.xlu0 %v4363_v57, %s5027_s22  ;;  %v1257_v57 = vsub.f32 %v3619_v46, %v1227_v53  ;;  %v1220_v22 = vpop.xlane.xlu0 %1219 }
 0x56e   : > { %v1255_v24 = vsub.f32 %v1005_v48, %v1220_v22 }
 0x56f   : > { %v1271_v23 = vmul.f32 1.442695, %v1257_v57 }
 0x570   : > { %v1267_v25 = vmul.f32 1.442695, %v1255_v24 }
 0x571   : > { %3959 = vpow2.f32 %v1271_v23 }
 0x572   : > { %3961 = vpow2.f32 %v1267_v25 }
 0x575   : > { %v4447_v21 = vpop.eup %3957 }
 0x576   : > { %v1294_v51 = vsel %vm1217_vm11, %v4447_v21, 0.0 }
 0x57e   : > { %v4457_v26 = vpop.eup %3959 }
 0x57f   : > { %v1297_v27 = vsel %vm1224_vm10, %v4457_v26, 0.0 }
 0x582   : > { %1250 = vmax.xlane.f32.xlu1 %v1249_v20 }
 0x58c   : > { %1295 = vadd.xlane.f32.xlu0 %v1294_v51 }
 0x593   : > { %1359 = vrot.lane.b32.xlu1 %v4352_v9, %s5027_s22  ;;  %v4461_v9 = vpop.eup %3961 }
 0x597   : > { %1424 = vrot.lane.b32.xlu1 %v4367_v60, %s5027_s22  ;;  %v1291_v60 = vsel %vm1217_vm11, %v4461_v9, 0.0 }
 0x59b   : > { %1550 = vrot.lane.b32.xlu1 %v4378_v4, %s5027_s22 }
 0x5bf   : > { %1298 = vadd.xlane.f32.xlu1 %v1297_v27 }
 0x5c3   : > { %1292 = vadd.xlane.f32.xlu1 %v1291_v60 }
 0x5c4   : > { %v1236_v4 = vpop.xlane.xlu0 %1235 }
 0x5c5   : > { %v1260_v28 = vsub.f32 %v3627_v55, %v1236_v4 }
 0x5c7   : > { %v1277_v29 = vmul.f32 1.442695, %v1260_v28 }
 0x5c8   : > { %v1230_v33 = vpop.xlane.xlu0 %1229 }
 0x5c9   : > { %3963 = vpow2.f32 %v1277_v29  ;;  %v1258_v34 = vsub.f32 %v1071_v58, %v1230_v33 }
 0x5cb   : > { %v1273_v35 = vmul.f32 1.442695, %v1258_v34 }
 0x5cd   : > { %3965 = vpow2.f32 %v1273_v35 }
 0x5ce   : > { %v1245_v36 = vpop.xlane.xlu1 %1244 }
 0x5cf   : > { %v1263_v37 = vsub.f32 %v3635_v8, %v1245_v36 }
 0x5d1   : > { %v1283_v38 = vmul.f32 1.442695, %v1263_v37 }
 0x5d2   : > { %v1239_v39 = vpop.xlane.xlu1 %1238 }
 0x5d3   : > { %3967 = vpow2.f32 %v1283_v38  ;;  %v1261_v40 = vsub.f32 %v4417_v62, %v1239_v39 }
 0x5d4   : > { %v1242_v41 = vpop.xlane.xlu0 %1241 }
 0x5d5   : > { %v1279_v42 = vmul.f32 1.442695, %v1261_v40  ;;  %v1262_v43 = vsub.f32 %v4423_v3, %v1242_v41 }
 0x5d6   : > { %v4467_v46 = vpop.eup %3963  ;;  %v1233_v47 = vpop.xlane.xlu1 %1232 }
 0x5d7   : > { %3969 = vpow2.f32 %v1279_v42  ;;  %v1281_v48 = vmul.f32 1.442695, %v1262_v43  ;;  %v1259_v49 = vsub.f32 %v4419_v63, %v1233_v47  ;;  %v1306_v50 = vsel %vm1224_vm10, %v4467_v46, 0.0 }
 0x5d8   : > { %1307 = vadd.xlane.f32.xlu0 %v1306_v50  ;;  %v1248_v52 = vpop.xlane.xlu0 %1247 }
 0x5d9   : > { %3971 = vpow2.f32 %v1281_v48  ;;  %v1275_v55 = vmul.f32 1.442695, %v1259_v49  ;;  %v1264_v59 = vsub.f32 %v4429_v11, %v1248_v52 }
 0x5da   : > { %v4475_v56 = vpop.eup %3965  ;;  %v1362_v58 = vpop.permute.xlu1 %1361 }
 0x5db   : > { %3973 = vpow2.f32 %v1275_v55  ;;  %v1374_v61 = vand.u32 %v4473_v54, %v1362_v58  ;;  %v1300_v8 = vsel %vm1217_vm11, %v4475_v56, 0.0  ;;  %v1285_v63 = vmul.f32 1.442695, %v1264_v59 }
 0x5dc   : > { %1301 = vadd.xlane.f32.xlu0 %v1300_v8  ;;  %v1254_v10 = vpop.xlane.xlu0 %1253 }
 0x5dd   : > { %v1266_v62 = vsub.f32 %v4425_v5, %v1254_v10  ;;  %3645 = vmatprep.subr.bf16.mxu1 %v1374_v61 }
 0x5de   : > { %3646 = vmatpush3.bf16.msra.mxu1 %v1374_v61 }
 0x5df   : > { %v1289_v1 = vmul.f32 1.442695, %v1266_v62 }
 0x5e0   : > { %v4482_v2 = vpop.eup %3967  ;;  %v1427_v3 = vpop.permute.xlu0 %1426 }
 0x5e1   : > { %3975 = vpow2.f32 %v1289_v1  ;;  %v1436_v6 = vand.u32 %v1427_v3, %v4473_v54  ;;  %v1315_v11 = vsel %vm1224_vm10, %v4482_v2, 0.0 }
 0x5e2   : > { %1316 = vadd.xlane.f32.xlu1 %v1315_v11  ;;  %3977 = vpow2.f32 %v1285_v63 }
 0x5e3   : > { %3653 = vmatprep.subr.bf16.mxu0 %v1436_v6 }
 0x5e4   : > { %v4487_v12 = vpop.eup %3969  ;;  %3654 = vmatpush3.bf16.msra.mxu0 %v1436_v6  ;;  %v1489_v22 = vpop.permute.xlu0 %1488 }
 0x5e5   : > { %v1309_v5 = vsel %vm1217_vm11, %v4487_v12, 0.0  ;;  %v1498_v25 = vand.u32 %v1489_v22, %v4473_v54 }
 0x5e6   : > { %v4491_v13 = vpop.eup %3971  ;;  %1310 = vadd.xlane.f32.xlu1 %v1309_v5 }
 0x5e7   : > { %v1312_v14 = vsel %vm1217_vm11, %v4491_v13, 0.0 }
 0x5e8   : > { %v4495_v15 = vpop.eup %3973  ;;  %1313 = vadd.xlane.f32.xlu0 %v1312_v14 }
 0x5e9   : > { %v1303_v16 = vsel %vm1217_vm11, %v4495_v15, 0.0 }
 0x5ea   : > { %1304 = vadd.xlane.f32.xlu1 %v1303_v16 }
 0x5ee   : > { %v4499_v17 = vpop.eup %3975 }
 0x5ef   : > { %v1324_v18 = vsel %vm1224_vm10, %v4499_v17, 0.0  ;;  %v4503_v20 = vpop.eup %3977 }
 0x5f0   : > { %1325 = vadd.xlane.f32.xlu0 %v1324_v18  ;;  %v1318_v51 = vsel %vm1217_vm11, %v4503_v20, 0.0 }
 0x5f4   : > { %1319 = vadd.xlane.f32.xlu0 %v1318_v51 }
 0x60a   : > { %1486 = vrot.lane.b32.xlu0 %v4371_v0, %s5027_s22 }
 0x60b   : > { %v1251_v53 = vpop.xlane.xlu1 %1250 }
 0x60c   : > { %v1265_v57 = vsub.f32 %v4443_v19, %v1251_v53 }
 0x60e   : > { %v1287_v23 = vmul.f32 1.442695, %v1265_v57 }
 0x60f   : > { %v1360_v24 = vpop.permute.xlu1 %1359 }
 0x610   : > { %3979 = vpow2.f32 %v1287_v23  ;;  %3647 = vmatprep.subr.bf16.mxu1 %v1360_v24 }
 0x611   : > { %3648 = vmatpush3.bf16.msra.mxu1 %v1360_v24 }
 0x612   : > { %3661 = vmatprep.subr.bf16.mxu1 %v1498_v25 }
 0x613   : > { %v1425_v27 = vpop.permute.xlu1 %1424 }
 0x614   : > { %3655 = vmatprep.subr.bf16.mxu0 %v1425_v27 }
 0x615   : > { %3656 = vmatpush3.bf16.msra.mxu0 %v1425_v27  ;;  %v1296_v28 = vpop.xlane.xlu0 %1295 }
 0x617   : > { %v1551_v60 = vpop.permute.xlu1 %1550 }
 0x618   : > { %v1560_v4 = vand.u32 %v1551_v60, %v4473_v54 }
 0x61a   : > { %3669 = vmatprep.subr.bf16.mxu0 %v1560_v4 }
 0x61d   : > { %v4512_v0 = vpop.eup %3979 }
 0x61e   : > { %v1321_v19 = vsel %vm1217_vm11, %v4512_v0, 0.0 }
 0x61f   : > { %1322 = vadd.xlane.f32.xlu1 %v1321_v19 }
 0x630   : > { %1548 = vrot.lane.b32.xlu1 %v4384_v7, %s5027_s22 }
 0x648   : > { %v1299_v29 = vpop.xlane.xlu1 %1298 }
 0x649   : > { %3981 = vrcp.f32 %v1299_v29  ;;  %v1660_v29 = vld [vmem:[%s5014_s7 + $0x18] sm:$0xff] }
 0x64a   : > { %3983 = vrcp.f32 %v1296_v28  ;;  %v1659_v28 = vld [vmem:[%s5014_s7 + $0x10] sm:$0xff] }
 0x64c   : > { %v1293_v33 = vpop.xlane.xlu1 %1292 }
 0x64d   : > { %3985 = vrcp.f32 %v1293_v33  ;;  %v1664_v33 = vpack.c.bf16 %v1660_v29, %v1659_v28 }
 0x656   : > { %v3982_v34 = vpop.eup %3981 }
 0x657   : > { %v3984_v35 = vpop.eup %3983  ;;  %v1341_v37 = vmul.f32 %v3982_v34, %v4457_v26  ;;  %v1657_v34 = vld [vmem:[%s5014_s7] sm:$0xff] }
 0x658   : > { %v1340_v39 = vmul.f32 %v3984_v35, %v4447_v21  ;;  %v1658_v35 = vld [vmem:[%s5014_s7 + $0x8] sm:$0xff] }
 0x659   : > { %v1352_v41 = vpack.c.bf16 %v1341_v37, %v1341_v37 }
 0x65a   : > { %v3986_v36 = vpop.eup %3985 }
 0x65b   : > { %v1339_v38 = vmul.f32 %v3986_v36, %v4461_v9  ;;  %v1663_v36 = vpack.c.bf16 %v1658_v35, %v1657_v34 }
 0x65d   : > { %v1351_v40 = vpack.c.bf16 %v1340_v39, %v1339_v38 }
 0x65f   : > { %3649 = vmatprep.mubr.msk.bf16.mxu1 %vm1217_vm11, %v1351_v40 }
 0x660   : > { %3650 = vmatmul.mubr.msk.bf16.vlgmr.msra.gmra.mxu1 %vm1217_vm11, %v1352_v41 }
 0x661   : > { %3662 = vmatpush3.bf16.msra.mxu1 %v1498_v25  ;;  %v1308_v7 = vpop.xlane.xlu0 %1307 }
 0x662   : > { %3987 = vrcp.f32 %v1308_v7 }
 0x665   : > { %v1302_v43 = vpop.xlane.xlu0 %1301 }
 0x66b   : > { %v1317_v42 = vpop.xlane.xlu1 %1316 }
 0x66c   : > { %3989 = vrcp.f32 %v1317_v42 }
 0x66f   : > { %v1311_v44 = vpop.xlane.xlu1 %1310  ;;  %v3988_v45 = vpop.eup %3987 }
 0x670   : > { %3991 = vrcp.f32 %v1311_v44  ;;  %v1344_v10 = vmul.f32 %v3988_v45, %v4467_v46 }
 0x671   : > { %3993 = vrcp.f32 %v1302_v43  ;;  %v1314_v26 = vpop.xlane.xlu0 %1313 }
 0x672   : > { %3995 = vrcp.f32 %v1314_v26  ;;  %v1354_v11 = vpack.c.bf16 %v1344_v10, %v1344_v10 }
 0x673   : > { %v1305_v9 = vpop.xlane.xlu1 %1304 }
 0x674   : > { %3997 = vrcp.f32 %v1305_v9 }
 0x679   : > { %v1326_v21 = vpop.xlane.xlu0 %1325  ;;  %v3990_v47 = vpop.eup %3989 }
 0x67a   : > { %v1347_v59 = vmul.f32 %v3990_v47, %v4482_v2  ;;  %3999 = vrcp.f32 %v1326_v21 }
 0x67c   : > { %v1356_v6 = vpack.c.bf16 %v1347_v59, %v1347_v59 }
 0x67d   : > { %v3992_v48 = vpop.eup %3991  ;;  %v1320_v49 = vpop.xlane.xlu0 %1319 }
 0x67e   : > { %v3994_v50 = vpop.eup %3993  ;;  %v1345_v55 = vmul.f32 %v3992_v48, %v4487_v12  ;;  %4001 = vrcp.f32 %v1320_v49 }
 0x67f   : > { %v3996_v52 = vpop.eup %3995  ;;  %v1342_v63 = vmul.f32 %v3994_v50, %v4475_v56 }
 0x680   : > { %v1346_v58 = vmul.f32 %v3996_v52, %v4491_v13 }
 0x681   : > { %v3998_v61 = vpop.eup %3997  ;;  %v1487_v8 = vpop.permute.xlu0 %1486 }
 0x682   : > { %3663 = vmatprep.subr.bf16.mxu1 %v1487_v8  ;;  %v1355_v62 = vpack.c.bf16 %v1346_v58, %v1345_v55  ;;  %v1343_v1 = vmul.f32 %v3998_v61, %v4495_v15 }
 0x683   : > { %3664 = vmatpush3.bf16.msra.mxu1 %v1487_v8 }
 0x684   : > { %3665 = vmatprep.mubr.msk.bf16.mxu1 %vm1217_vm11, %v1355_v62  ;;  %v1353_v3 = vpack.c.bf16 %v1343_v1, %v1342_v63  ;;  %3677 = vmatprep.subr.bf16.mxu1 %v1664_v33 }
 0x686   : > { %3657 = vmatprep.mubr.msk.bf16.mxu0 %vm1217_vm11, %v1353_v3  ;;  %3666 = vmatmul.mubr.msk.bf16.vlgmr.msra.gmra.mxu1 %vm1217_vm11, %v1356_v6 }
 0x687   : > { %3658 = vmatmul.mubr.msk.bf16.vlgmr.msra.gmra.mxu0 %vm1217_vm11, %v1354_v11  ;;  %v4000_v2 = vpop.eup %3999  ;;  %3678 = vmatpush3.bf16.msra.mxu1 %v1664_v33 }
 0x688   : > { %3670 = vmatpush3.bf16.msra.mxu0 %v1560_v4  ;;  %v1350_v13 = vmul.f32 %v4000_v2, %v4499_v17  ;;  %3679 = vmatprep.subr.bf16.mxu1 %v1663_v36  ;;  %v3402_v2 = vld [vmem:[%s5015_s8] ss:$0 sm:$0xff] }
 0x68a   : > { %v1358_v18 = vpack.c.bf16 %v1350_v13, %v1350_v13 }
 0x68b   : > { %v4002_v12 = vpop.eup %4001  ;;  %3680 = vmatpush3.bf16.msra.mxu1 %v1663_v36  ;;  %v1804_v36 = vld [vmem:[%s5018_s11 + $0x10] sm:$0xff] }
 0x68c   : > { %v1348_v14 = vmul.f32 %v4002_v12, %v4503_v20 }
 0x6a8   : > { %v1323_v46 = vpop.xlane.xlu1 %1322 }
 0x6a9   : > { %4003 = vrcp.f32 %v1323_v46 }
 0x6ac   : > { %v1549_v56 = vpop.permute.xlu1 %1548 }
 0x6ad   : > { %3671 = vmatprep.subr.bf16.mxu0 %v1549_v56 }
 0x6ae   : > { %3672 = vmatpush3.bf16.msra.mxu0 %v1549_v56 }
 0x6b6   : > { %v4004_v5 = vpop.eup %4003 }
 0x6b7   : > { %v1349_v15 = vmul.f32 %v4004_v5, %v4512_v0 }
 0x6b9   : > { %v1357_v16 = vpack.c.bf16 %v1349_v15, %v1348_v14 }
 0x6bb   : > { %3673 = vmatprep.mubr.msk.bf16.mxu0 %vm1217_vm11, %v1357_v16 }
 0x6bc   : > { %3674 = vmatmul.mubr.msk.bf16.vlgmr.msra.gmra.mxu0 %vm1217_vm11, %v1358_v18 }
 0x720   : > { %v3651_v51 = vpop.f32.mrf.mxu1 }
 0x722   : > { %v1410_v53 = vpop.f32.mrf.mxu1 }
 0x724   : > { %v3652_v57 = vpop.f32.mrf.mxu1 }
 0x726   : > { %v1413_v22 = vpop.f32.mrf.mxu1 }
 0x746   : > { %v3667_v23 = vpop.f32.mrf.mxu1 }
 0x747   : > { %v3659_v24 = vpop.f32.mrf.mxu0 }
 0x748   : > { %v1534_v25 = vpop.f32.mrf.mxu1  ;;  %1617 = vrot.lane.b32.xlu1 %v3659_v24, %s5031_s23 }
 0x749   : > { %v1472_v17 = vpop.f32.mrf.mxu0 }
 0x74a   : > { %v3668_v20 = vpop.f32.mrf.mxu1 }
 0x74b   : > { %v3660_v27 = vpop.f32.mrf.mxu0 }
 0x74c   : > { %1629 = vrot.lane.b32.xlu1 %v3667_v23, %s4105_s26  ;;  %v1537_v0 = vpop.f32.mrf.mxu1 }
 0x74d   : > { %v1475_v60 = vpop.f32.mrf.mxu0  ;;  %v3890_v19 = vpack.i.bf16 %v1537_v0, %v1534_v25 }
 0x74e   : > { %v3885_v4 = vpack.i.bf16 %v1475_v60, %v1472_v17 }
 0x750   : > { %3886 = vrot.lane.b32.xlu0 %v3885_v4, %s5031_s23 }
 0x754   : > { %3891 = vrot.lane.b32.xlu0 %v3890_v19, %s4105_s26 }
 0x77c   : > { %v3675_v37 = vpop.f32.mrf.mxu0 }
 0x77d   : > { %1641 = vrot.lane.b32.xlu1 %v3675_v37, %s5033_s27  ;;  %v1805_v37 = vld [vmem:[%s5018_s11 + $0x18] sm:$0xff] }
 0x77e   : > { %v1596_v38 = vpop.f32.mrf.mxu0 }
 0x780   : > { %v3676_v39 = vpop.f32.mrf.mxu0 }
 0x781   : > { %v1809_v39 = vpack.c.bf16 %v1805_v37, %v1804_v36 }
 0x782   : > { %v1599_v40 = vpop.f32.mrf.mxu0 }
 0x783   : > { %v3895_v41 = vpack.i.bf16 %v1599_v40, %v1596_v38  ;;  %v1802_v38 = vld [vmem:[%s5018_s11] sm:$0xff]  ;;  %v1803_v40 = vld [vmem:[%s5018_s11 + $0x8] sm:$0xff]  ;;  %3685 = vmatprep.subr.bf16.mxu0 %v1809_v39 }
 0x784   : > { %3686 = vmatpush3.bf16.msra.mxu0 %v1809_v39 }
 0x785   : > { %3896 = vrot.lane.b32.xlu0 %v3895_v41, %s5033_s27  ;;  %v1808_v41 = vpack.c.bf16 %v1803_v40, %v1802_v38 }
 0x787   : > { %3687 = vmatprep.subr.bf16.mxu0 %v1808_v41 }
 0x788   : > { %3688 = vmatpush3.bf16.msra.mxu0 %v1808_v41 }
 0x7ba   : > { %v1618_v7 = vpop.permute.xlu1 %1617 }
 0x7bb   : > { %v1648_v47 = vsel %vm958_vm9, %v3651_v51, %v1618_v7 }
 0x7be   : > { %v1630_v43 = vpop.permute.xlu1 %1629 }
 0x7bf   : > { %v1652_v49 = vsel %vm1649_vm13, %v1648_v47, %v1630_v43 }
 0x7c2   : > { %v3887_v42 = vpop.permute.xlu0 %3886 }
 0x7c3   : > { %v3889_v26 = vunpack.i.h.bf16 %v3887_v42  ;;  %v3888_v9 = vunpack.i.l.bf16 %v3887_v42 }
 0x7c5   : > { %v1647_v52 = vsel %vm958_vm9, %v1413_v22, %v3889_v26  ;;  %v1646_v55 = vsel %vm958_vm9, %v1410_v53, %v3888_v9 }
 0x7c6   : > { %v3892_v44 = vpop.permute.xlu0 %3891 }
 0x7c7   : > { %v3894_v21 = vunpack.i.h.bf16 %v3892_v44  ;;  %v3893_v45 = vunpack.i.l.bf16 %v3892_v44 }
 0x7c9   : > { %v1650_v61 = vsel %vm1649_vm13, %v1646_v55, %v3893_v45  ;;  %v1651_v8 = vsel %vm1649_vm13, %v1647_v52, %v3894_v21 }
 0x7ef   : > { %v1642_v48 = vpop.permute.xlu1 %1641 }
 0x7f0   : > { %v1656_v10 = vsel %vm1653_vm14, %v1652_v49, %v1642_v48 }
 0x7f1   : > { %v1662_v3 = vpack.c.bf16 %v1656_v10, %v1656_v10 }
 0x7f7   : > { %v3897_v50 = vpop.permute.xlu0 %3896 }
 0x7f8   : > { %v3899_v58 = vunpack.i.h.bf16 %v3897_v50  ;;  %v3898_v59 = vunpack.i.l.bf16 %v3897_v50  ;;  %v3403_v50 = vld [vmem:[%s5016_s9] ss:$0 sm:$0xff] }
 0x7fa   : > { %v1655_v62 = vsel %vm1653_vm14, %v1651_v8, %v3899_v58  ;;  %v1654_v63 = vsel %vm1653_vm14, %v1650_v61, %v3898_v59  ;;  %v3404_v8 = vld [vmem:[%s5017_s10] ss:$0 sm:$0xff] }
 0x7fb   : > { %v1661_v1 = vpack.c.bf16 %v1655_v62, %v1654_v63 }
 0x7fd   : > { %3681 = vmatprep.mubr.msk.bf16.mxu1 %vm601_vm3, %v1661_v1 }
 0x7fe   : > { %3682 = vmatmul.mubr.msk.bf16.vlgmr.msra.gmra.mxu1 %vm601_vm3, %v1662_v3 }
 0x8be   : > { %v3683_v6 = vpop.f32.mrf.mxu1 }
 0x8bf   : > { %v1725_v13 = vrot.slane %v3683_v6, 6 }
 0x8c0   : > { %v1705_v11 = vpop.f32.mrf.mxu1 }
 0x8c1   : > { %v1722_v46 = vrot.slane %v1705_v11, 6 }
 0x8c2   : > { %v3684_v56 = vpop.f32.mrf.mxu1 }
 0x8c3   : > { %v1730_v12 = vadd.f32 %v1722_v46, %v4329_v31 }
 0x8c4   : > { %v1708_v5 = vpop.f32.mrf.mxu1 }
 0x8c5   : > { %v1723_v14 = vrot.slane %v1708_v5, 6  ;;  %v1740_v15 = vadd.f32 %v3402_v2, %v1730_v12  ;;  %v1909_v12 = vld [vmem:[%s5020_s13 + $0x30] sm:$0xff]  ;;  %v1910_v5 = vld [vmem:[%s5020_s13 + $0x38] sm:$0xff] }
 0x8c7   : > { %v1724_v16 = vsel %vm724_vm7, %v1722_v46, %v1723_v14  ;;  %v1726_v18 = vsel %vm724_vm7, %v1723_v14, %v1725_v13  ;;  %v1745_v51 = vsel %vm738_vm6, %v1740_v15, 0.0  ;;  %v1916_v13 = vpack.c.bf16 %v1910_v5, %v1909_v12  ;;  %v1907_v14 = vld [vmem:[%s5020_s13 + $0x20] sm:$0xff] }
 0x8c8   : > { %1746 = vadd.xlane.f32.xlu0 %v1745_v51  ;;  %v1732_v53 = vadd.f32 %v1726_v18, %v4327_v30  ;;  %v1731_v57 = vadd.f32 %v1724_v16, %v4331_v32  ;;  %v1905_v18 = vld [vmem:[%s5020_s13 + $0x10] sm:$0xff]  ;;  %v1906_v51 = vld [vmem:[%s5020_s13 + $0x18] sm:$0xff] }
 0x8c9   : > { %3693 = vmatprep.subr.bf16.mxu1 %v1916_v13 }
 0x8ca   : > { %v1742_v22 = vadd.f32 %v3402_v2, %v1732_v53  ;;  %v1741_v23 = vadd.f32 %v3402_v2, %v1731_v57  ;;  %3694 = vmatpush3.bf16.msra.mxu1 %v1916_v13  ;;  %v1914_v53 = vpack.c.bf16 %v1906_v51, %v1905_v18  ;;  %v1903_v57 = vld [vmem:[%s5020_s13] sm:$0xff] }
 0x8cc   : > { %v1751_v24 = vsel %vm745_vm8, %v1742_v22, 0.0  ;;  %v1748_v31 = vsel %vm601_vm3, %v1741_v23, 0.0 }
 0x8cd   : > { %1752 = vadd.xlane.f32.xlu0 %v1751_v24  ;;  %1749 = vadd.xlane.f32.xlu1 %v1748_v31  ;;  %v3405_v24 = vld [vmem:[%s5019_s12] ss:$0 sm:$0xff] }
 0x951   : > { %v1747_v25 = vpop.xlane.xlu0 %1746 }
 0x952   : > { %v1754_v17 = vmul.f32 0.03125, %v1747_v25 }
 0x954   : > { %v1757_v20 = vsub.f32 %v1740_v15, %v1754_v17  ;;  %v1908_v15 = vld [vmem:[%s5020_s13 + $0x28] sm:$0xff] }
 0x955   : > { %v1915_v16 = vpack.c.bf16 %v1908_v15, %v1907_v14 }
 0x956   : > { %v1753_v27 = vpop.xlane.xlu0 %1752  ;;  %v1750_v60 = vpop.xlane.xlu1 %1749  ;;  %v1760_v4 = vmul.f32 %v1757_v20, %v1757_v20 }
 0x957   : > { %v1756_v0 = vmul.f32 0.03125, %v1753_v27  ;;  %v1755_v19 = vmul.f32 0.03125, %v1750_v60  ;;  %3695 = vmatprep.subr.bf16.mxu1 %v1915_v16 }
 0x958   : > { %v1763_v30 = vsel %vm738_vm6, %v1760_v4, 0.0  ;;  %3696 = vmatpush3.bf16.msra.mxu1 %v1915_v16 }
 0x959   : > { %v1759_v28 = vsub.f32 %v1742_v22, %v1756_v0  ;;  %v1758_v32 = vsub.f32 %v1741_v23, %v1755_v19  ;;  %1764 = vadd.xlane.f32.xlu0 %v1763_v30  ;;  %3697 = vmatprep.subr.bf16.mxu1 %v1914_v53  ;;  %v1904_v22 = vld [vmem:[%s5020_s13 + $0x8] sm:$0xff] }
 0x95a   : > { %v1913_v23 = vpack.c.bf16 %v1904_v22, %v1903_v57 }
 0x95b   : > { %v1762_v29 = vmul.f32 %v1759_v28, %v1759_v28  ;;  %v1761_v33 = vmul.f32 %v1758_v32, %v1758_v32 }
 0x95c   : > { %3698 = vmatpush3.bf16.msra.mxu1 %v1914_v53 }
 0x95d   : > { %v1769_v34 = vsel %vm745_vm8, %v1762_v29, 0.0  ;;  %v1766_v35 = vsel %vm601_vm3, %v1761_v33, 0.0  ;;  %3699 = vmatprep.subr.bf16.mxu1 %v1913_v23 }
 0x95e   : > { %1770 = vadd.xlane.f32.xlu0 %v1769_v34  ;;  %1767 = vadd.xlane.f32.xlu1 %v1766_v35 }
 0x960   : > { %3700 = vmatpush3.bf16.msra.mxu1 %v1913_v23 }
 0x9e2   : > { %v1765_v7 = vpop.xlane.xlu0 %1764 }
 0x9e3   : > { %v1772_v42 = vmul.f32 0.03125, %v1765_v7 }
 0x9e5   : > { %v1775_v43 = vadd.f32 1e-05, %v1772_v42 }
 0x9e7   : > { %4005 = vrsqrt.f32 %v1775_v43  ;;  %v1771_v44 = vpop.xlane.xlu0 %1770  ;;  %v1768_v26 = vpop.xlane.xlu1 %1767 }
 0x9e8   : > { %v1774_v9 = vmul.f32 0.03125, %v1771_v44  ;;  %v1773_v21 = vmul.f32 0.03125, %v1768_v26 }
 0x9ea   : > { %v1777_v45 = vadd.f32 1e-05, %v1774_v9  ;;  %v1776_v47 = vadd.f32 1e-05, %v1773_v21 }
 0x9ec   : > { %4007 = vrsqrt.f32 %v1777_v45 }
 0x9ed   : > { %4009 = vrsqrt.f32 %v1776_v47 }
 0x9f4   : > { %v4006_v48 = vpop.eup %4005 }
 0x9f5   : > { %v1781_v49 = vmul.f32 %v4006_v48, %v1757_v20 }
 0x9f7   : > { %v1790_v61 = vmul.f32 %v3403_v50, %v1781_v49 }
 0x9f9   : > { %v4008_v52 = vpop.eup %4007  ;;  %v4601_v1 = vadd.f32 %v3404_v8, %v1790_v61 }
 0x9fa   : > { %v4010_v55 = vpop.eup %4009  ;;  %v1783_v58 = vmul.f32 %v4008_v52, %v1759_v28 }
 0x9fb   : > { %v1782_v59 = vmul.f32 %v4010_v55, %v1758_v32 }
 0x9fc   : > { %v1792_v10 = vmul.f32 %v3403_v50, %v1783_v58 }
 0x9fd   : > { %v1791_v62 = vmul.f32 %v3403_v50, %v1782_v59 }
 0x9fe   : > { %v4599_v63 = vadd.f32 %v3404_v8, %v1792_v10  ;;  %v3410_v10 = vld [vmem:[%s5021_s14] ss:$0 sm:$0xff] }
 0x9ff   : > { %v4603_v3 = vadd.f32 %v3404_v8, %v1791_v62 }
 0xa00   : > { %v1807_v6 = vpack.c.bf16 %v4599_v63, %v4599_v63 }
 0xa01   : > { %v1806_v11 = vpack.c.bf16 %v4603_v3, %v4601_v1 }
 0xa02   : > { %v1820_v46 = vrot.slane %v1807_v6, 1 }
 0xa03   : > { %v1819_v56 = vrot.slane %v1806_v11, 1 }
 0xa05   : > { %v1821_v2 = vsel %vm556_vm1, %v1819_v56, %v1820_v46 }
 0xa06   : > { %3689 = vmatprep.mubr.msk.bf16.mxu0 %vm601_vm3, %v1821_v2 }
 0xa07   : > { %3690 = vmatmul.mubr.msk.bf16.vlgmr.msra.gmra.mxu0 %vm601_vm3, %v1820_v46 }
 0xac7   : > { %v3691_v31 = vpop.f32.mrf.mxu0 }
 0xac8   : > { %v1871_v25 = vadd.f32 %v3691_v31, %v3405_v24 }
 0xac9   : > { %v1862_v17 = vpop.f32.mrf.mxu0 }
 0xaca   : > { %v1878_v20 = vmul.f32 %v1871_v25, %v1871_v25  ;;  %v1863_v27 = vadd.f32 %v3405_v24, %v1862_v17 }
 0xacb   : > { %v3692_v60 = vpop.f32.mrf.mxu0 }
 0xacc   : > { %v1881_v4 = vmul.f32 %v1878_v20, %v1871_v25  ;;  %v1876_v0 = vmul.f32 %v1863_v27, %v1863_v27 }
 0xacd   : > { %v1865_v19 = vpop.f32.mrf.mxu0 }
 0xace   : > { %v1884_v30 = vmul.f32 0.044715, %v1881_v4  ;;  %v1879_v28 = vmul.f32 %v1876_v0, %v1863_v27  ;;  %v1866_v32 = vadd.f32 %v3405_v24, %v1865_v19  ;;  %v3415_v0 = vld [vmem:[%s5012_s5 + $0x30] sm:$0xff]  ;;  %v3416_v19 = vld [vmem:[%s5012_s5 + $0x38] sm:$0xff] }
 0xad0   : > { %v1887_v29 = vadd.f32 %v1884_v30, %v1871_v25  ;;  %v1882_v33 = vmul.f32 0.044715, %v1879_v28  ;;  %v1877_v34 = vmul.f32 %v1866_v32, %v1866_v32  ;;  %v3413_v30 = vld [vmem:[%s5012_s5 + $0x20] sm:$0xff]  ;;  %v2062_v28 = vpack.c.bf16 %v3416_v19, %v3415_v0 }
 0xad2   : > { %v1890_v35 = vmul.f32 0.7978846, %v1887_v29  ;;  %v1885_v36 = vadd.f32 %v1882_v33, %v1863_v27  ;;  %v1880_v37 = vmul.f32 %v1877_v34, %v1866_v32  ;;  %3705 = vmatprep.subr.bf16.mxu0 %v2062_v28 }
 0xad3   : > { %3706 = vmatpush3.bf16.msra.mxu0 %v2062_v28 }
 0xad4   : > { %4011 = vtanh.f32 %v1890_v35  ;;  %v1888_v38 = vmul.f32 0.7978846, %v1885_v36  ;;  %v1883_v39 = vmul.f32 0.044715, %v1880_v37 }
 0xad6   : > { %4013 = vtanh.f32 %v1888_v38  ;;  %v1886_v40 = vadd.f32 %v1883_v39, %v1866_v32 }
 0xad8   : > { %v1889_v41 = vmul.f32 0.7978846, %v1886_v40 }
 0xada   : > { %4015 = vtanh.f32 %v1889_v41 }
 0xae1   : > { %v4012_v7 = vpop.eup %4011 }
 0xae2   : > { %v1896_v43 = vadd.f32 1.0, %v4012_v7 }
 0xae3   : > { %v4014_v42 = vpop.eup %4013 }
 0xae4   : > { %v1894_v44 = vadd.f32 1.0, %v4014_v42  ;;  %v1899_v9 = vmul.f32 0.5, %v1896_v43  ;;  %v3411_v43 = vld [vmem:[%s5022_s15] ss:$0 sm:$0xff] }
 0xae6   : > { %v1897_v21 = vmul.f32 0.5, %v1894_v44  ;;  %v1902_v48 = vmul.f32 %v1899_v9, %v1871_v25 }
 0xae7   : > { %v4016_v26 = vpop.eup %4015 }
 0xae8   : > { %v1895_v45 = vadd.f32 1.0, %v4016_v26  ;;  %v1900_v49 = vmul.f32 %v1897_v21, %v1863_v27  ;;  %v1912_v55 = vpack.c.bf16 %v1902_v48, %v1902_v48 }
 0xaea   : > { %v1898_v47 = vmul.f32 0.5, %v1895_v45  ;;  %v3412_v45 = vld [vmem:[%s5023_s16] ss:$0 sm:$0xff] }
 0xaec   : > { %v1901_v50 = vmul.f32 %v1898_v47, %v1866_v32  ;;  %v3414_v32 = vld [vmem:[%s5012_s5 + $0x28] sm:$0xff] }
 0xaed   : > { %v2061_v29 = vpack.c.bf16 %v3414_v32, %v3413_v30 }
 0xaee   : > { %v1911_v52 = vpack.c.bf16 %v1901_v50, %v1900_v49 }
 0xaef   : > { %3707 = vmatprep.subr.bf16.mxu0 %v2061_v29 }
 0xaf0   : > { %3701 = vmatprep.mubr.msk.bf16.mxu1 %vm605_vm4, %v1911_v52  ;;  %3708 = vmatpush3.bf16.msra.mxu0 %v2061_v29 }
 0xaf1   : > { %3702 = vmatmul.mubr.msk.bf16.vlgmr.msra.gmra.mxu1 %vm605_vm4, %v1912_v55 }
 0xbb1   : > { %v3703_v58 = vpop.f32.mrf.mxu1 }
 0xbb2   : > { %v1977_v11 = vrot.slane %v3703_v58, 6 }
 0xbb3   : > { %v1957_v59 = vpop.f32.mrf.mxu1 }
 0xbb4   : > { %v1974_v61 = vrot.slane %v1957_v59, 6 }
 0xbb5   : > { %v3704_v8 = vpop.f32.mrf.mxu1 }
 0xbb6   : > { %v1982_v62 = vadd.f32 %v1974_v61, %v4601_v1 }
 0xbb7   : > { %v1960_v6 = vpop.f32.mrf.mxu1 }
 0xbb8   : > { %v1975_v46 = vrot.slane %v1960_v6, 6  ;;  %v1992_v56 = vadd.f32 %v3410_v10, %v1982_v62  ;;  %v3418_v62 = vld [vmem:[%s5013_s6 + $0x1] ss:$0 sm:$0xff] }
 0xbba   : > { %v1976_v2 = vsel %vm724_vm7, %v1974_v61, %v1975_v46  ;;  %v1978_v12 = vsel %vm724_vm7, %v1975_v46, %v1977_v11  ;;  %v1997_v5 = vsel %vm738_vm6, %v1992_v56, 0.0 }
 0xbbb   : > { %1998 = vadd.xlane.f32.xlu1 %v1997_v5  ;;  %v1984_v13 = vadd.f32 %v1978_v12, %v4599_v63  ;;  %v1983_v14 = vadd.f32 %v1976_v2, %v4603_v3 }
 0xbbd   : > { %v1994_v15 = vadd.f32 %v3410_v10, %v1984_v13  ;;  %v1993_v16 = vadd.f32 %v3410_v10, %v1983_v14 }
 0xbbf   : > { %v2003_v18 = vsel %vm745_vm8, %v1994_v15, 0.0  ;;  %v2000_v1 = vsel %vm601_vm3, %v1993_v16, 0.0 }
 0xbc0   : > { %2004 = vadd.xlane.f32.xlu1 %v2003_v18  ;;  %2001 = vadd.xlane.f32.xlu0 %v2000_v1 }
 0xc44   : > { %v1999_v51 = vpop.xlane.xlu1 %1998 }
 0xc45   : > { %v2006_v53 = vmul.f32 0.03125, %v1999_v51 }
 0xc47   : > { %v2009_v57 = vsub.f32 %v1992_v56, %v2006_v53 }
 0xc49   : > { %v2005_v22 = vpop.xlane.xlu1 %2004  ;;  %v2002_v23 = vpop.xlane.xlu0 %2001  ;;  %v2012_v24 = vmul.f32 %v2009_v57, %v2009_v57 }
 0xc4a   : > { %v2008_v31 = vmul.f32 0.03125, %v2005_v22  ;;  %v2007_v25 = vmul.f32 0.03125, %v2002_v23 }
 0xc4b   : > { %v2015_v63 = vsel %vm738_vm6, %v2012_v24, 0.0 }
 0xc4c   : > { %v2011_v17 = vsub.f32 %v1994_v15, %v2008_v31  ;;  %v2010_v3 = vsub.f32 %v1993_v16, %v2007_v25  ;;  %2016 = vadd.xlane.f32.xlu0 %v2015_v63 }
 0xc4e   : > { %v2014_v20 = vmul.f32 %v2011_v17, %v2011_v17  ;;  %v2013_v27 = vmul.f32 %v2010_v3, %v2010_v3 }
 0xc50   : > { %v2021_v60 = vsel %vm745_vm8, %v2014_v20, 0.0  ;;  %v2018_v4 = vsel %vm601_vm3, %v2013_v27, 0.0 }
 0xc51   : > { %2022 = vadd.xlane.f32.xlu0 %v2021_v60  ;;  %2019 = vadd.xlane.f32.xlu1 %v2018_v4 }
 0xcd5   : > { %v2017_v33 = vpop.xlane.xlu0 %2016 }
 0xcd6   : > { %v2024_v34 = vmul.f32 0.03125, %v2017_v33 }
 0xcd8   : > { %v2027_v35 = vadd.f32 1e-05, %v2024_v34 }
 0xcda   : > { %4017 = vrsqrt.f32 %v2027_v35  ;;  %v2020_v36 = vpop.xlane.xlu1 %2019  ;;  %v2023_v37 = vpop.xlane.xlu0 %2022 }
 0xcdb   : > { %v2025_v38 = vmul.f32 0.03125, %v2020_v36  ;;  %v2026_v39 = vmul.f32 0.03125, %v2023_v37 }
 0xcdd   : > { %v2028_v40 = vadd.f32 1e-05, %v2025_v38  ;;  %v2029_v41 = vadd.f32 1e-05, %v2026_v39 }
 0xcdf   : > { %4019 = vrsqrt.f32 %v2028_v40 }
 0xce0   : > { %4021 = vrsqrt.f32 %v2029_v41 }
 0xce7   : > { %v4018_v7 = vpop.eup %4017 }
 0xce8   : > { %v2033_v42 = vmul.f32 %v4018_v7, %v2009_v57 }
 0xcea   : > { %v2042_v21 = vmul.f32 %v3411_v43, %v2033_v42 }
 0xcec   : > { %v4020_v44 = vpop.eup %4019  ;;  %v4673_v50 = vadd.f32 %v3412_v45, %v2042_v21 }
 0xced   : > { %v4022_v26 = vpop.eup %4021  ;;  %v2034_v9 = vmul.f32 %v4020_v44, %v2010_v3 }
 0xcee   : > { %v2035_v47 = vmul.f32 %v4022_v26, %v2011_v17 }
 0xcef   : > { %v2043_v48 = vmul.f32 %v3411_v43, %v2034_v9 }
 0xcf0   : > { %v2044_v49 = vmul.f32 %v3411_v43, %v2035_v47 }
 0xcf1   : > { %v4675_v52 = vadd.f32 %v3412_v45, %v2043_v48 }
 0xcf2   : > { %v4677_v55 = vadd.f32 %v3412_v45, %v2044_v49 }
 0xcf3   : > { %v2059_v58 = vpack.c.bf16 %v4675_v52, %v4673_v50 }
 0xcf4   : > { %v2060_v59 = vpack.c.bf16 %v4677_v55, %v4677_v55 }
 0xcf5   : > { %v2073_v61 = vrot.slane %v2059_v58, 1 }
 0xcf6   : > { %v2074_v8 = vrot.slane %v2060_v59, 1 }
 0xcf8   : > { %v2075_v10 = vsel %vm556_vm1, %v2073_v61, %v2074_v8 }
 0xcf9   : > { %3709 = vmatprep.mubr.msk.bf16.mxu0 %vm601_vm3, %v2075_v10 }
 0xcfa   : > { %3710 = vmatmul.mubr.msk.bf16.vlgmr.msra.gmra.mxu0 %vm601_vm3, %v2074_v8 }
 0xdba   : > { %v3711_v6 = vpop.f32.mrf.mxu0 }
 0xdbb   : > { %v2125_v11 = vadd.f32 %v3711_v6, %v3418_v62 }
 0xdbc   : > { %v2116_v46 = vpop.f32.mrf.mxu0 }
 0xdbd   : > { %2178 = vrot.lane.b32.xlu1 %v2125_v11, %s4100_s18  ;;  %v2117_v2 = vadd.f32 %v3418_v62, %v2116_v46  ;;  %v4696_v1 = vpack.c.bf16 %v2125_v11, %v2125_v11  ;;  %v2132_v4 = vmul.f32 0.35355338, %v2125_v11 }
 0xdbe   : > { %v3712_v56 = vpop.f32.mrf.mxu0 }
 0xdbf   : > { %v2130_v13 = vmul.f32 0.35355338, %v2117_v2  ;;  %v2164_v40 = vpack.c.bf16 %v2132_v4, %v2132_v4 }
 0xdc0   : > { %v2119_v12 = vpop.f32.mrf.mxu0 }
 0xdc1   : > { %v2120_v5 = vadd.f32 %v3418_v62, %v2119_v12  ;;  %2187 = vrot.lane.b32.xlu1 %v2125_v11, %s4101_s19 }
 0xdc3   : > { %v2131_v14 = vmul.f32 0.35355338, %v2120_v5  ;;  %v3900_v15 = vpack.i.bf16 %v2120_v5, %v2117_v2  ;;  %v4700_v51 = vpack.c.bf16 %v2120_v5, %v2117_v2 }
 0xdc5   : > { %2196 = vrot.lane.b32.xlu1 %v2125_v11, %s4102_s1  ;;  %3901 = vrot.lane.b32.xlu0 %v3900_v15, %s4100_s18  ;;  %v2163_v16 = vpack.c.bf16 %v2131_v14, %v2130_v13  ;;  %v3920_v18 = vpack.i.bf16 %v2131_v14, %v2130_v13 }
 0xdc7   : > { %3717 = vmatprep.mubr.msk.bf16.mxu0 %vm958_vm9, %v2163_v16 }
 0xdc9   : > { %3911 = vrot.lane.b32.xlu1 %v3900_v15, %s4102_s1  ;;  %3906 = vrot.lane.b32.xlu0 %v3900_v15, %s4101_s19 }
 0xdcd   : > { %2213 = vrot.lane.b32.xlu0 %v4696_v1, %s5039_s20 }
 0xdd1   : > { %2211 = vrot.lane.b32.xlu0 %v4700_v51, %s5039_s20 }
 0xdd5   : > { %3916 = vrot.lane.b32.xlu0 %v3920_v18, %s4100_s18 }
 0xe2f   : > { %v2179_v53 = vpop.permute.xlu1 %2178 }
 0xe30   : > { %v4705_v57 = vpack.c.bf16 %v2179_v53, %v2179_v53 }
 0xe32   : > { %2279 = vrot.lane.b32.xlu1 %v4705_v57, %s5039_s20 }
 0xe33   : > { %v2188_v22 = vpop.permute.xlu1 %2187 }
 0xe34   : > { %v4709_v23 = vpack.c.bf16 %v2188_v22, %v2188_v22 }
 0xe36   : > { %2345 = vrot.lane.b32.xlu0 %v4709_v23, %s5039_s20 }
 0xe37   : > { %v3902_v24 = vpop.permute.xlu0 %3901  ;;  %v2197_v63 = vpop.permute.xlu1 %2196 }
 0xe38   : > { %v3904_v31 = vunpack.i.h.bf16 %v3902_v24  ;;  %v3903_v25 = vunpack.i.l.bf16 %v3902_v24  ;;  %v4724_v28 = vpack.c.bf16 %v2197_v63, %v2197_v63 }
 0xe3a   : > { %v4713_v17 = vpack.c.bf16 %v3904_v31, %v3903_v25 }
 0xe3b   : > { %v3907_v3 = vpop.permute.xlu0 %3906  ;;  %v3912_v0 = vpop.permute.xlu1 %3911 }
 0xe3c   : > { %v3909_v20 = vunpack.i.h.bf16 %v3907_v3  ;;  %v3908_v27 = vunpack.i.l.bf16 %v3907_v3  ;;  %2277 = vrot.lane.b32.xlu1 %v4713_v17, %s5039_s20  ;;  %v3914_v32 = vunpack.i.h.bf16 %v3912_v0  ;;  %v3913_v29 = vunpack.i.l.bf16 %v3912_v0 }
 0xe3e   : > { %v4717_v60 = vpack.c.bf16 %v3909_v20, %v3908_v27  ;;  %v4730_v34 = vpack.c.bf16 %v3914_v32, %v3913_v29 }
 0xe3f   : > { %v2214_v19 = vpop.permute.xlu0 %2213 }
 0xe40   : > { %v2225_v30 = vsel %vm958_vm9, %v2214_v19, 0  ;;  %3813 = vmatprep.subr.msk.bf16.mxu0 %vm958_vm9, %v2214_v19  ;;  %2140 = vrot.lane.b32.xlu1 %v2132_v4, %s4100_s18  ;;  %s5040_s18 = smov 64  }
 0xe41   : > { %2343 = vrot.lane.b32.xlu0 %v4717_v60, %s5039_s20  ;;  %3714 = vmatpush3.bf16.xpose.msra.mxu0 %v2225_v30 }
 0xe43   : > { %v2212_v33 = vpop.permute.xlu0 %2211 }
 0xe44   : > { %2411 = vrot.lane.b32.xlu1 %v4724_v28, %s5039_s20  ;;  %3814 = vmatprep.subr.msk.bf16.mxu0 %vm958_vm9, %v2212_v33  ;;  %v2222_v36 = vsel %vm958_vm9, %v2212_v33, 0 }
 0xe45   : > { %3921 = vrot.lane.b32.xlu0 %v3920_v18, %s4101_s19 }
 0xe47   : > { %v3917_v35 = vpop.permute.xlu0 %3916 }
 0xe48   : > { %v3919_v37 = vunpack.i.h.bf16 %v3917_v35  ;;  %v3918_v38 = vunpack.i.l.bf16 %v3917_v35  ;;  %2409 = vrot.lane.b32.xlu1 %v4730_v34, %s5039_s20 }
 0xe49   : > { %3926 = vrot.lane.b32.xlu0 %v3920_v18, %s4102_s1  ;;  %3716 = vmatpush3.bf16.xpose.msra.mxu0 %v2222_v36 }
 0xe4a   : > { %v2165_v39 = vpack.c.bf16 %v3919_v37, %v3918_v38 }
 0xe4c   : > { %2149 = vrot.lane.b32.xlu1 %v2132_v4, %s4101_s19  ;;  %3725 = vmatprep.mubr.msk.bf16.mxu1 %vm958_vm9, %v2165_v39  ;;  %s5041_s19 = smov 8  }
 0xe50   : > { %2158 = vrot.lane.b32.xlu1 %v2132_v4, %s4102_s1  ;;  %3718 = vmatmul.mubr.msk.bf16.vlgmr.msra.gmra.mxu0 %vm958_vm9, %v2164_v40 }
 0xea4   : > { %v2280_v41 = vpop.permute.xlu1 %2279 }
 0xea5   : > { %v2291_v7 = vsel %vm958_vm9, %v2280_v41, 0  ;;  %3815 = vmatprep.subr.msk.bf16.mxu1 %vm958_vm9, %v2280_v41 }
 0xea6   : > { %3722 = vmatpush3.bf16.xpose.msra.mxu1 %v2291_v7 }
 0xea8   : > { %v2346_v42 = vpop.permute.xlu0 %2345 }
 0xea9   : > { %v2357_v43 = vsel %vm958_vm9, %v2346_v42, 0  ;;  %3817 = vmatprep.subr.msk.bf16.mxu0 %vm958_vm9, %v2346_v42 }
 0xeaa   : > { %3730 = vmatpush3.bf16.xpose.msra.mxu0 %v2357_v43 }
 0xeae   : > { %v2278_v44 = vpop.permute.xlu1 %2277 }
 0xeaf   : > { %v2288_v26 = vsel %vm958_vm9, %v2278_v44, 0  ;;  %3816 = vmatprep.subr.msk.bf16.mxu1 %vm958_vm9, %v2278_v44 }
 0xeb0   : > { %3724 = vmatpush3.bf16.xpose.msra.mxu1 %v2288_v26 }
 0xeb2   : > { %v2141_v9 = vpop.permute.xlu1 %2140 }
 0xeb3   : > { %v2344_v21 = vpop.permute.xlu0 %2343  ;;  %v2166_v47 = vpack.c.bf16 %v2141_v9, %v2141_v9 }
 0xeb4   : > { %v2354_v45 = vsel %vm958_vm9, %v2344_v21, 0  ;;  %3818 = vmatprep.subr.msk.bf16.mxu0 %vm958_vm9, %v2344_v21 }
 0xeb5   : > { %3732 = vmatpush3.bf16.xpose.msra.mxu0 %v2354_v45 }
 0xeb6   : > { %v2412_v48 = vpop.permute.xlu1 %2411 }
 0xeb7   : > { %v2423_v49 = vsel %vm958_vm9, %v2412_v48, 0  ;;  %v3922_v58 = vpop.permute.xlu0 %3921  ;;  %3726 = vmatmul.mubr.msk.bf16.vlgmr.msra.gmra.mxu1 %vm958_vm9, %v2166_v47  ;;  %3819 = vmatprep.subr.msk.bf16.mxu1 %vm958_vm9, %v2412_v48 }
 0xeb8   : > { %v3924_v59 = vunpack.i.h.bf16 %v3922_v58  ;;  %v3923_v61 = vunpack.i.l.bf16 %v3922_v58  ;;  %3738 = vmatpush3.bf16.xpose.msra.mxu1 %v2423_v49 }
 0xeba   : > { %v2167_v8 = vpack.c.bf16 %v3924_v59, %v3923_v61  ;;  %v2410_v10 = vpop.permute.xlu1 %2409 }
 0xebb   : > { %v3927_v62 = vpop.permute.xlu0 %3926  ;;  %3820 = vmatprep.subr.msk.bf16.mxu1 %vm958_vm9, %v2410_v10  ;;  %v2420_v2 = vsel %vm958_vm9, %v2410_v10, 0 }
 0xebc   : > { %v3929_v6 = vunpack.i.h.bf16 %v3927_v62  ;;  %v3928_v11 = vunpack.i.l.bf16 %v3927_v62  ;;  %3733 = vmatprep.mubr.msk.bf16.mxu0 %vm958_vm9, %v2167_v8 }
 0xebe   : > { %v2169_v46 = vpack.c.bf16 %v3929_v6, %v3928_v11  ;;  %v2150_v56 = vpop.permute.xlu1 %2149 }
 0xebf   : > { %v2168_v12 = vpack.c.bf16 %v2150_v56, %v2150_v56 }
 0xec0   : > { %3741 = vmatprep.mubr.msk.bf16.mxu1 %vm958_vm9, %v2169_v46  ;;  %3740 = vmatpush3.bf16.xpose.msra.mxu1 %v2420_v2 }
 0xec1   : > { %3734 = vmatmul.mubr.msk.bf16.vlgmr.msra.gmra.mxu0 %vm958_vm9, %v2168_v12 }
 0xec2   : > { %v2159_v5 = vpop.permute.xlu1 %2158 }
 0xec3   : > { %v2170_v13 = vpack.c.bf16 %v2159_v5, %v2159_v5 }
 0xec7   : > { %3742 = vmatmul.mubr.msk.bf16.vlgmr.msra.gmra.mxu1 %vm958_vm9, %v2170_v13 }
 0xf10   : > { %v3719_v14 = vpop.f32.mrf.mxu0 }
 0xf11   : > { %v2479_v15 = vsel %vm1224_vm10, %v3719_v14, -inf }
 0xf12   : > { %2480 = vmax.xlane.f32.xlu0 %v2479_v15  ;;  %v2261_v16 = vpop.f32.mrf.mxu0 }
 0xf13   : > { %v2473_v53 = vsel %vm1217_vm11, %v2261_v16, -inf }
 0xf14   : > { %v3720_v18 = vpop.f32.mrf.mxu0 }
 0xf16   : > { %2474 = vmax.xlane.f32.xlu0 %v2473_v53  ;;  %v2264_v22 = vpop.f32.mrf.mxu0 }
 0xf17   : > { %v2476_v24 = vsel %vm1217_vm11, %v2264_v22, -inf }
 0xf18   : > { %2477 = vmax.xlane.f32.xlu1 %v2476_v24 }
 0xf77   : > { %v3727_v31 = vpop.f32.mrf.mxu1 }
 0xf78   : > { %v2488_v25 = vsel %vm1224_vm10, %v3727_v31, -inf }
 0xf79   : > { %v2327_v63 = vpop.f32.mrf.mxu1  ;;  %2489 = vmax.xlane.f32.xlu0 %v2488_v25 }
 0xf7a   : > { %v2482_v20 = vsel %vm1217_vm11, %v2327_v63, -inf }
 0xf7b   : > { %v3728_v3 = vpop.f32.mrf.mxu1 }
 0xf7d   : > { %2483 = vmax.xlane.f32.xlu0 %v2482_v20  ;;  %v4763_v19 = vpop.f32.mrf.mxu1 }
 0xf7e   : > { %v2485_v37 = vsel %vm1217_vm11, %v4763_v19, -inf }
 0xf81   : > { %v3735_v27 = vpop.f32.mrf.mxu0 }
 0xf82   : > { %v2497_v4 = vsel %vm1224_vm10, %v3735_v27, -inf }
 0xf83   : > { %2498 = vmax.xlane.f32.xlu1 %v2497_v4  ;;  %v2393_v0 = vpop.f32.mrf.mxu0 }
 0xf84   : > { %v2491_v32 = vsel %vm1217_vm11, %v2393_v0, -inf }
 0xf85   : > { %v3736_v30 = vpop.f32.mrf.mxu0 }
 0xf87   : > { %v4766_v29 = vpop.f32.mrf.mxu1  ;;  %2492 = vmax.xlane.f32.xlu1 %v2491_v32  ;;  %v2396_v33 = vpop.f32.mrf.mxu0 }
 0xf88   : > { %v2494_v35 = vsel %vm1217_vm11, %v2396_v33, -inf  ;;  %v2506_v40 = vsel %vm1224_vm10, %v4766_v29, -inf }
 0xf89   : > { %v4769_v36 = vpop.f32.mrf.mxu1  ;;  %2495 = vmax.xlane.f32.xlu0 %v2494_v35 }
 0xf8a   : > { %v2500_v39 = vsel %vm1217_vm11, %v4769_v36, -inf }
 0xf8b   : > { %v3744_v38 = vpop.f32.mrf.mxu1  ;;  %2486 = vmax.xlane.f32.xlu1 %v2485_v37 }
 0xf8d   : > { %2501 = vmax.xlane.f32.xlu0 %v2500_v39  ;;  %v4783_v43 = vpop.f32.mrf.mxu1 }
 0xf8e   : > { %v2503_v44 = vsel %vm1217_vm11, %v4783_v43, -inf }
 0xf91   : > { %2507 = vmax.xlane.f32.xlu0 %v2506_v40 }
 0xf9c   : > { %2615 = vrot.lane.b32.xlu1 %v4696_v1, %s5040_s18 }
 0xfa1   : > { %v2478_v41 = vpop.xlane.xlu1 %2477 }
 0xfa2   : > { %v2510_v7 = vsub.f32 %v2264_v22, %v2478_v41 }
 0xfa4   : > { %v2523_v42 = vmul.f32 1.442695, %v2510_v7 }
 0xfa6   : > { %4023 = vpow2.f32 %v2523_v42 }
 0xfa7   : > { %2677 = vrot.lane.b32.xlu0 %v4705_v57, %s5040_s18  ;;  %v2481_v57 = vpop.xlane.xlu0 %2480 }
 0xfab   : > { %2739 = vrot.lane.b32.xlu0 %v4709_v23, %s5040_s18  ;;  %v2511_v23 = vsub.f32 %v3719_v14, %v2481_v57  ;;  %v2475_v9 = vpop.xlane.xlu0 %2474 }
 0xfac   : > { %v2509_v45 = vsub.f32 %v2261_v16, %v2475_v9 }
 0xfad   : > { %v2525_v21 = vmul.f32 1.442695, %v2511_v23 }
 0xfae   : > { %v2521_v47 = vmul.f32 1.442695, %v2509_v45 }
 0xfaf   : > { %4025 = vpow2.f32 %v2525_v21 }
 0xfb0   : > { %4027 = vpow2.f32 %v2521_v47 }
 0xfb3   : > { %v4787_v26 = vpop.eup %4023 }
 0xfb4   : > { %v2548_v1 = vsel %vm1217_vm11, %v4787_v26, 0.0 }
 0xfbc   : > { %v4797_v48 = vpop.eup %4025 }
 0xfbd   : > { %v2551_v49 = vsel %vm1224_vm10, %v4797_v48, 0.0 }
 0xfc0   : > { %2504 = vmax.xlane.f32.xlu1 %v2503_v44 }
 0xfca   : > { %2549 = vadd.xlane.f32.xlu0 %v2548_v1 }
 0xfd1   : > { %2613 = vrot.lane.b32.xlu1 %v4700_v51, %s5040_s18  ;;  %v4801_v51 = vpop.eup %4027 }
 0xfd5   : > { %2675 = vrot.lane.b32.xlu1 %v4713_v17, %s5040_s18  ;;  %v2545_v17 = vsel %vm1217_vm11, %v4801_v51, 0.0 }
 0xfd9   : > { %2801 = vrot.lane.b32.xlu1 %v4724_v28, %s5040_s18 }
 0xffd   : > { %2552 = vadd.xlane.f32.xlu1 %v2551_v49 }
0x1001   : > { %2546 = vadd.xlane.f32.xlu1 %v2545_v17 }
0x1002   : > { %v2490_v28 = vpop.xlane.xlu0 %2489 }
0x1003   : > { %v2514_v58 = vsub.f32 %v3727_v31, %v2490_v28 }
0x1005   : > { %v2531_v59 = vmul.f32 1.442695, %v2514_v58 }
0x1006   : > { %v2484_v61 = vpop.xlane.xlu0 %2483 }
0x1007   : > { %4029 = vpow2.f32 %v2531_v59  ;;  %v2512_v8 = vsub.f32 %v2327_v63, %v2484_v61 }
0x1009   : > { %v2527_v10 = vmul.f32 1.442695, %v2512_v8 }
0x100b   : > { %4031 = vpow2.f32 %v2527_v10 }
0x100c   : > { %v2499_v62 = vpop.xlane.xlu1 %2498 }
0x100d   : > { %v2517_v6 = vsub.f32 %v3735_v27, %v2499_v62 }
0x100f   : > { %v2537_v11 = vmul.f32 1.442695, %v2517_v6 }
0x1010   : > { %v2493_v46 = vpop.xlane.xlu1 %2492 }
0x1011   : > { %4033 = vpow2.f32 %v2537_v11  ;;  %v2515_v56 = vsub.f32 %v2393_v0, %v2493_v46 }
0x1012   : > { %v2496_v2 = vpop.xlane.xlu0 %2495 }
0x1013   : > { %v2533_v12 = vmul.f32 1.442695, %v2515_v56  ;;  %v2516_v5 = vsub.f32 %v2396_v33, %v2496_v2 }
0x1014   : > { %v4805_v13 = vpop.eup %4029  ;;  %v2487_v14 = vpop.xlane.xlu1 %2486 }
0x1015   : > { %4035 = vpow2.f32 %v2533_v12  ;;  %v2535_v15 = vmul.f32 1.442695, %v2516_v5  ;;  %v2513_v16 = vsub.f32 %v4763_v19, %v2487_v14  ;;  %v2560_v18 = vsel %vm1224_vm10, %v4805_v13, 0.0 }
0x1016   : > { %2561 = vadd.xlane.f32.xlu0 %v2560_v18  ;;  %v2502_v53 = vpop.xlane.xlu0 %2501 }
0x1017   : > { %4037 = vpow2.f32 %v2535_v15  ;;  %v2529_v22 = vmul.f32 1.442695, %v2513_v16  ;;  %v2518_v25 = vsub.f32 %v4769_v36, %v2502_v53 }
0x1018   : > { %v4810_v24 = vpop.eup %4031  ;;  %v2616_v31 = vpop.permute.xlu1 %2615 }
0x1019   : > { %4039 = vpow2.f32 %v2529_v22  ;;  %v2625_v63 = vand.u32 %v2616_v31, %v4473_v54  ;;  %v2554_v3 = vsel %vm1217_vm11, %v4810_v24, 0.0  ;;  %v2539_v4 = vmul.f32 1.442695, %v2518_v25 }
0x101a   : > { %2555 = vadd.xlane.f32.xlu0 %v2554_v3  ;;  %v2508_v20 = vpop.xlane.xlu0 %2507 }
0x101b   : > { %v2520_v27 = vsub.f32 %v4766_v29, %v2508_v20  ;;  %3745 = vmatprep.subr.bf16.mxu0 %v2625_v63 }
0x101c   : > { %3746 = vmatpush3.bf16.msra.mxu0 %v2625_v63 }
0x101d   : > { %v2543_v0 = vmul.f32 1.442695, %v2520_v27 }
0x101e   : > { %v4817_v19 = vpop.eup %4033  ;;  %v2678_v30 = vpop.permute.xlu0 %2677 }
0x101f   : > { %4041 = vpow2.f32 %v2543_v0  ;;  %v2687_v32 = vand.u32 %v2678_v30, %v4473_v54  ;;  %v2569_v33 = vsel %vm1224_vm10, %v4817_v19, 0.0 }
0x1020   : > { %2570 = vadd.xlane.f32.xlu1 %v2569_v33  ;;  %4043 = vpow2.f32 %v2539_v4 }
0x1021   : > { %3753 = vmatprep.subr.bf16.mxu1 %v2687_v32 }
0x1022   : > { %v4822_v35 = vpop.eup %4035  ;;  %3754 = vmatpush3.bf16.msra.mxu1 %v2687_v32  ;;  %v2740_v57 = vpop.permute.xlu0 %2739 }
0x1023   : > { %v2563_v29 = vsel %vm1217_vm11, %v4822_v35, 0.0  ;;  %v2749_v21 = vand.u32 %v2740_v57, %v4473_v54 }
0x1024   : > { %v4826_v36 = vpop.eup %4037  ;;  %2564 = vadd.xlane.f32.xlu1 %v2563_v29 }
0x1025   : > { %v2566_v37 = vsel %vm1217_vm11, %v4826_v36, 0.0 }
0x1026   : > { %v4830_v38 = vpop.eup %4039  ;;  %2567 = vadd.xlane.f32.xlu0 %v2566_v37 }
0x1027   : > { %v2557_v39 = vsel %vm1217_vm11, %v4830_v38, 0.0 }
0x1028   : > { %2558 = vadd.xlane.f32.xlu1 %v2557_v39 }
0x102c   : > { %v4834_v40 = vpop.eup %4041 }
0x102d   : > { %v2578_v41 = vsel %vm1224_vm10, %v4834_v40, 0.0  ;;  %v4838_v7 = vpop.eup %4043 }
0x102e   : > { %2579 = vadd.xlane.f32.xlu0 %v2578_v41  ;;  %v2572_v42 = vsel %vm1217_vm11, %v4838_v7, 0.0 }
0x1032   : > { %2573 = vadd.xlane.f32.xlu0 %v2572_v42 }
0x1048   : > { %2737 = vrot.lane.b32.xlu0 %v4717_v60, %s5040_s18 }
0x1049   : > { %v2505_v44 = vpop.xlane.xlu1 %2504 }
0x104a   : > { %v2519_v1 = vsub.f32 %v4783_v43, %v2505_v44 }
0x104c   : > { %v2541_v23 = vmul.f32 1.442695, %v2519_v1 }
0x104d   : > { %v2614_v9 = vpop.permute.xlu1 %2613 }
0x104e   : > { %4045 = vpow2.f32 %v2541_v23  ;;  %3747 = vmatprep.subr.bf16.mxu0 %v2614_v9 }
0x104f   : > { %3748 = vmatpush3.bf16.msra.mxu0 %v2614_v9 }
0x1050   : > { %3761 = vmatprep.subr.bf16.mxu0 %v2749_v21 }
0x1051   : > { %v2676_v45 = vpop.permute.xlu1 %2675 }
0x1052   : > { %3755 = vmatprep.subr.bf16.mxu1 %v2676_v45 }
0x1053   : > { %3756 = vmatpush3.bf16.msra.mxu1 %v2676_v45  ;;  %v2550_v17 = vpop.xlane.xlu0 %2549 }
0x1055   : > { %v2802_v47 = vpop.permute.xlu1 %2801 }
0x1056   : > { %v2811_v49 = vand.u32 %v2802_v47, %v4473_v54 }
0x1058   : > { %3769 = vmatprep.subr.bf16.mxu1 %v2811_v49 }
0x105b   : > { %v4847_v60 = vpop.eup %4045 }
0x105c   : > { %v2575_v43 = vsel %vm1217_vm11, %v4847_v60, 0.0 }
0x105d   : > { %2576 = vadd.xlane.f32.xlu1 %v2575_v43  ;;  %v3439_v43 = vld [vmem:[%s5014_s7 + $0x30] sm:$0xff] }
0x106e   : > { %2799 = vrot.lane.b32.xlu1 %v4730_v34, %s5040_s18 }
0x1086   : > { %v2553_v28 = vpop.xlane.xlu1 %2552 }
0x1087   : > { %4047 = vrcp.f32 %v2553_v28 }
0x1088   : > { %4049 = vrcp.f32 %v2550_v17  ;;  %v3440_v17 = vld [vmem:[%s5014_s7 + $0x38] sm:$0xff] }
0x1089   : > { %v2914_v28 = vpack.c.bf16 %v3440_v17, %v3439_v43 }
0x108a   : > { %v2547_v58 = vpop.xlane.xlu1 %2546 }
0x108b   : > { %4051 = vrcp.f32 %v2547_v58  ;;  %v3437_v58 = vld [vmem:[%s5014_s7 + $0x20] sm:$0xff] }
0x1094   : > { %v4048_v59 = vpop.eup %4047 }
0x1095   : > { %v4050_v61 = vpop.eup %4049  ;;  %v2595_v54 = vmul.f32 %v4048_v59, %v4797_v48  ;;  %v3438_v59 = vld [vmem:[%s5014_s7 + $0x28] sm:$0xff] }
0x1096   : > { %v2594_v62 = vmul.f32 %v4050_v61, %v4787_v26  ;;  %v2913_v61 = vpack.c.bf16 %v3438_v59, %v3437_v58  ;;  %v3451_v59 = vld [vmem:[%s5018_s11 + $0x30] sm:$0xff] }
0x1097   : > { %v2606_v11 = vpack.c.bf16 %v2595_v54, %v2595_v54 }
0x1098   : > { %v4052_v8 = vpop.eup %4051 }
0x1099   : > { %v2593_v10 = vmul.f32 %v4052_v8, %v4801_v51 }
0x109b   : > { %v2605_v6 = vpack.c.bf16 %v2594_v62, %v2593_v10 }
0x109d   : > { %3749 = vmatprep.mubr.msk.bf16.mxu0 %vm1217_vm11, %v2605_v6 }
0x109e   : > { %3750 = vmatmul.mubr.msk.bf16.vlgmr.msra.gmra.mxu0 %vm1217_vm11, %v2606_v11 }
0x109f   : > { %3762 = vmatpush3.bf16.msra.mxu0 %v2749_v21  ;;  %v2562_v34 = vpop.xlane.xlu0 %2561 }
0x10a0   : > { %4053 = vrcp.f32 %v2562_v34 }
0x10a3   : > { %v2556_v56 = vpop.xlane.xlu0 %2555 }
0x10a9   : > { %v2571_v46 = vpop.xlane.xlu1 %2570 }
0x10aa   : > { %4055 = vrcp.f32 %v2571_v46 }
0x10ad   : > { %v2565_v2 = vpop.xlane.xlu1 %2564  ;;  %v4054_v12 = vpop.eup %4053 }
0x10ae   : > { %4057 = vrcp.f32 %v2565_v2  ;;  %v2598_v3 = vmul.f32 %v4054_v12, %v4805_v13 }
0x10af   : > { %4059 = vrcp.f32 %v2556_v56  ;;  %v2568_v48 = vpop.xlane.xlu0 %2567 }
0x10b0   : > { %4061 = vrcp.f32 %v2568_v48  ;;  %v2608_v32 = vpack.c.bf16 %v2598_v3, %v2598_v3 }
0x10b1   : > { %v2559_v51 = vpop.xlane.xlu1 %2558 }
0x10b2   : > { %4063 = vrcp.f32 %v2559_v51 }
0x10b7   : > { %v2580_v26 = vpop.xlane.xlu0 %2579  ;;  %v4056_v5 = vpop.eup %4055 }
0x10b8   : > { %v2601_v31 = vmul.f32 %v4056_v5, %v4817_v19  ;;  %4065 = vrcp.f32 %v2580_v26 }
0x10ba   : > { %v2610_v30 = vpack.c.bf16 %v2601_v31, %v2601_v31 }
0x10bb   : > { %v4058_v14 = vpop.eup %4057  ;;  %v2574_v15 = vpop.xlane.xlu0 %2573 }
0x10bc   : > { %v4060_v16 = vpop.eup %4059  ;;  %v2599_v53 = vmul.f32 %v4058_v14, %v4822_v35  ;;  %4067 = vrcp.f32 %v2574_v15 }
0x10bd   : > { %v4062_v18 = vpop.eup %4061  ;;  %v2596_v27 = vmul.f32 %v4060_v16, %v4810_v24 }
0x10be   : > { %v2600_v22 = vmul.f32 %v4062_v18, %v4826_v36 }
0x10bf   : > { %v4064_v25 = vpop.eup %4063  ;;  %v2738_v63 = vpop.permute.xlu0 %2737 }
0x10c0   : > { %3763 = vmatprep.subr.bf16.mxu0 %v2738_v63  ;;  %v2609_v20 = vpack.c.bf16 %v2600_v22, %v2599_v53  ;;  %v2597_v4 = vmul.f32 %v4064_v25, %v4830_v38 }
0x10c1   : > { %3764 = vmatpush3.bf16.msra.mxu0 %v2738_v63 }
0x10c2   : > { %3765 = vmatprep.mubr.msk.bf16.mxu0 %vm1217_vm11, %v2609_v20  ;;  %v2607_v0 = vpack.c.bf16 %v2597_v4, %v2596_v27  ;;  %3777 = vmatprep.subr.bf16.mxu0 %v2914_v28 }
0x10c4   : > { %3757 = vmatprep.mubr.msk.bf16.mxu1 %vm1217_vm11, %v2607_v0  ;;  %3766 = vmatmul.mubr.msk.bf16.vlgmr.msra.gmra.mxu0 %vm1217_vm11, %v2610_v30 }
0x10c5   : > { %3758 = vmatmul.mubr.msk.bf16.vlgmr.msra.gmra.mxu1 %vm1217_vm11, %v2608_v32  ;;  %v4066_v19 = vpop.eup %4065  ;;  %3778 = vmatpush3.bf16.msra.mxu0 %v2914_v28 }
0x10c6   : > { %3770 = vmatpush3.bf16.msra.mxu1 %v2811_v49  ;;  %v2604_v29 = vmul.f32 %v4066_v19, %v4834_v40  ;;  %3779 = vmatprep.subr.bf16.mxu0 %v2913_v61 }
0x10c8   : > { %v2612_v39 = vpack.c.bf16 %v2604_v29, %v2604_v29 }
0x10c9   : > { %v4068_v33 = vpop.eup %4067  ;;  %3780 = vmatpush3.bf16.msra.mxu0 %v2913_v61  ;;  %v3452_v61 = vld [vmem:[%s5018_s11 + $0x38] sm:$0xff] }
0x10ca   : > { %v2602_v36 = vmul.f32 %v4068_v33, %v4838_v7 }
0x10e6   : > { %v2577_v13 = vpop.xlane.xlu1 %2576 }
0x10e7   : > { %4069 = vrcp.f32 %v2577_v13 }
0x10ea   : > { %v2800_v24 = vpop.permute.xlu1 %2799 }
0x10eb   : > { %3771 = vmatprep.subr.bf16.mxu1 %v2800_v24 }
0x10ec   : > { %3772 = vmatpush3.bf16.msra.mxu1 %v2800_v24  ;;  %v3444_v24 = vld [vmem:[%s5015_s8 + $0x1] ss:$0 sm:$0xff] }
0x10f4   : > { %v4070_v35 = vpop.eup %4069 }
0x10f5   : > { %v2603_v37 = vmul.f32 %v4070_v35, %v4847_v60 }
0x10f7   : > { %v2611_v38 = vpack.c.bf16 %v2603_v37, %v2602_v36 }
0x10f9   : > { %3773 = vmatprep.mubr.msk.bf16.mxu1 %vm1217_vm11, %v2611_v38 }
0x10fa   : > { %3774 = vmatmul.mubr.msk.bf16.vlgmr.msra.gmra.mxu1 %vm1217_vm11, %v2612_v39 }
0x115e   : > { %v3751_v41 = vpop.f32.mrf.mxu0 }
0x1160   : > { %v2661_v42 = vpop.f32.mrf.mxu0 }
0x1162   : > { %v3752_v44 = vpop.f32.mrf.mxu0 }
0x1164   : > { %v2664_v1 = vpop.f32.mrf.mxu0 }
0x1184   : > { %v3767_v57 = vpop.f32.mrf.mxu0 }
0x1185   : > { %v3759_v23 = vpop.f32.mrf.mxu1 }
0x1186   : > { %2868 = vrot.lane.b32.xlu1 %v3759_v23, %s5041_s19  ;;  %v2785_v9 = vpop.f32.mrf.mxu0 }
0x1187   : > { %v2723_v40 = vpop.f32.mrf.mxu1 }
0x1188   : > { %v3768_v21 = vpop.f32.mrf.mxu0 }
0x1189   : > { %v3760_v7 = vpop.f32.mrf.mxu1 }
0x118a   : > { %2880 = vrot.lane.b32.xlu1 %v3767_v57, %s4105_s26  ;;  %v2788_v49 = vpop.f32.mrf.mxu0 }
0x118b   : > { %v2726_v45 = vpop.f32.mrf.mxu1  ;;  %v3935_v60 = vpack.i.bf16 %v2788_v49, %v2785_v9 }
0x118c   : > { %v3930_v47 = vpack.i.bf16 %v2726_v45, %v2723_v40 }
0x118e   : > { %3931 = vrot.lane.b32.xlu0 %v3930_v47, %s5041_s19  ;;  %s5043_s19 = smul.u32 24, %s5045_s25 }
0x1190   : > { %s548_s27 = scalar_lea.vmem %s5024_s17, %s5043_s19 }
0x1192   : > { %3936 = vrot.lane.b32.xlu0 %v3935_v60, %s4105_s26  ;;  %s5042_s26 = smov 24  }
0x11ba   : > { %v3775_v8 = vpop.f32.mrf.mxu1 }
0x11bb   : > { %2892 = vrot.lane.b32.xlu1 %v3775_v8, %s5042_s26  ;;  %v3449_v8 = vld [vmem:[%s5018_s11 + $0x20] sm:$0xff] }
0x11bc   : > { %v2847_v54 = vpop.f32.mrf.mxu1 }
0x11be   : > { %v3776_v10 = vpop.f32.mrf.mxu1 }
0x11bf   : > { %v3450_v10 = vld [vmem:[%s5018_s11 + $0x28] sm:$0xff] }
0x11c0   : > { %v2850_v62 = vpop.f32.mrf.mxu1 }
0x11c1   : > { %v3940_v6 = vpack.i.bf16 %v2850_v62, %v2847_v54  ;;  %v3063_v54 = vpack.c.bf16 %v3452_v61, %v3451_v59  ;;  %v3062_v62 = vpack.c.bf16 %v3450_v10, %v3449_v8 }
0x11c3   : > { %3941 = vrot.lane.b32.xlu0 %v3940_v6, %s5042_s26  ;;  %3785 = vmatprep.subr.bf16.mxu1 %v3063_v54 }
0x11c4   : > { %3786 = vmatpush3.bf16.msra.mxu1 %v3063_v54 }
0x11c5   : > { %3787 = vmatprep.subr.bf16.mxu1 %v3062_v62 }
0x11c8   : > { %3788 = vmatpush3.bf16.msra.mxu1 %v3062_v62 }
0x11f8   : > { %v2869_v11 = vpop.permute.xlu1 %2868 }
0x11f9   : > { %v2899_v12 = vsel %vm958_vm9, %v3751_v41, %v2869_v11 }
0x11fc   : > { %v2881_v46 = vpop.permute.xlu1 %2880 }
0x11fd   : > { %v2902_v14 = vsel %vm1649_vm13, %v2899_v12, %v2881_v46 }
0x1200   : > { %v3932_v34 = vpop.permute.xlu0 %3931 }
0x1201   : > { %v3934_v2 = vunpack.i.h.bf16 %v3932_v34  ;;  %v3933_v48 = vunpack.i.l.bf16 %v3932_v34 }
0x1203   : > { %v2898_v16 = vsel %vm958_vm9, %v2664_v1, %v3934_v2  ;;  %v2897_v18 = vsel %vm958_vm9, %v2661_v42, %v3933_v48 }
0x1204   : > { %v3937_v56 = vpop.permute.xlu0 %3936 }
0x1205   : > { %v3939_v51 = vunpack.i.h.bf16 %v3937_v56  ;;  %v3938_v26 = vunpack.i.l.bf16 %v3937_v56 }
0x1207   : > { %v2900_v31 = vsel %vm1649_vm13, %v2897_v18, %v3938_v26  ;;  %v2901_v25 = vsel %vm1649_vm13, %v2898_v16, %v3939_v51 }
0x122d   : > { %v2893_v5 = vpop.permute.xlu1 %2892 }
0x122e   : > { %v2905_v63 = vsel %vm1653_vm14, %v2902_v14, %v2893_v5  ;;  %v3447_v14 = vld [vmem:[%s5016_s9 + $0x1] ss:$0 sm:$0xff] }
0x122f   : > { %v2912_v4 = vpack.c.bf16 %v2905_v63, %v2905_v63 }
0x1235   : > { %v3942_v15 = vpop.permute.xlu0 %3941 }
0x1236   : > { %v3944_v53 = vunpack.i.h.bf16 %v3942_v15  ;;  %v3943_v22 = vunpack.i.l.bf16 %v3942_v15 }
0x1238   : > { %v2903_v3 = vsel %vm1653_vm14, %v2900_v31, %v3943_v22  ;;  %v2904_v20 = vsel %vm1653_vm14, %v2901_v25, %v3944_v53  ;;  %v3448_v31 = vld [vmem:[%s5017_s10 + $0x1] ss:$0 sm:$0xff] }
0x1239   : > { %v2911_v27 = vpack.c.bf16 %v2904_v20, %v2903_v3 }
0x123b   : > { %3781 = vmatprep.mubr.msk.bf16.mxu0 %vm601_vm3, %v2911_v27 }
0x123c   : > { %3782 = vmatmul.mubr.msk.bf16.vlgmr.msra.gmra.mxu0 %vm601_vm3, %v2912_v4 }
0x12fc   : > { %v3783_v0 = vpop.f32.mrf.mxu0 }
0x12fd   : > { %v2975_v35 = vrot.slane %v3783_v0, 6 }
0x12fe   : > { %v2955_v30 = vpop.f32.mrf.mxu0 }
0x12ff   : > { %v2972_v32 = vrot.slane %v2955_v30, 6 }
0x1300   : > { %v3784_v13 = vpop.f32.mrf.mxu0 }
0x1301   : > { %v2980_v19 = vadd.f32 %v2972_v32, %v4673_v50 }
0x1302   : > { %v2958_v33 = vpop.f32.mrf.mxu0 }
0x1303   : > { %v2973_v29 = vrot.slane %v2958_v33, 6  ;;  %v2991_v36 = vadd.f32 %v3444_v24, %v2980_v19  ;;  %v3464_v19 = vld [vmem:[%s5020_s13 + $0x78] sm:$0xff] }
0x1305   : > { %v2974_v37 = vsel %vm724_vm7, %v2972_v32, %v2973_v29  ;;  %v2976_v38 = vsel %vm724_vm7, %v2973_v29, %v2975_v35  ;;  %v2998_v39 = vsel %vm738_vm6, %v2991_v36, 0.0  ;;  %v3461_v35 = vld [vmem:[%s5020_s13 + $0x60] sm:$0xff]  ;;  %v3462_v29 = vld [vmem:[%s5020_s13 + $0x68] sm:$0xff] }
0x1306   : > { %2999 = vadd.xlane.f32.xlu0 %v2998_v39  ;;  %v2982_v41 = vadd.f32 %v2976_v38, %v4677_v55  ;;  %v2981_v42 = vadd.f32 %v2974_v37, %v4675_v52  ;;  %v3459_v37 = vld [vmem:[%s5020_s13 + $0x50] sm:$0xff]  ;;  %v3460_v38 = vld [vmem:[%s5020_s13 + $0x58] sm:$0xff] }
0x1307   : > { %v3170_v39 = vpack.c.bf16 %v3460_v38, %v3459_v37 }
0x1308   : > { %v2993_v44 = vadd.f32 %v3444_v24, %v2982_v41  ;;  %v2992_v1 = vadd.f32 %v3444_v24, %v2981_v42  ;;  %v3463_v24 = vld [vmem:[%s5020_s13 + $0x70] sm:$0xff]  ;;  %v3457_v41 = vld [vmem:[%s5020_s13 + $0x40] sm:$0xff]  ;;  %v3458_v42 = vld [vmem:[%s5020_s13 + $0x48] sm:$0xff] }
0x1309   : > { %v3172_v33 = vpack.c.bf16 %v3464_v19, %v3463_v24 }
0x130a   : > { %v3004_v57 = vsel %vm745_vm8, %v2993_v44, 0.0  ;;  %v3001_v50 = vsel %vm601_vm3, %v2992_v1, 0.0 }
0x130b   : > { %3005 = vadd.xlane.f32.xlu0 %v3004_v57  ;;  %3002 = vadd.xlane.f32.xlu1 %v3001_v50 }
0x130c   : > { %3793 = vmatprep.subr.bf16.mxu0 %v3172_v33 }
0x130d   : > { %3794 = vmatpush3.bf16.msra.mxu0 %v3172_v33 }
0x138f   : > { %v3000_v23 = vpop.xlane.xlu0 %2999 }
0x1390   : > { %v3007_v9 = vmul.f32 0.03125, %v3000_v23 }
0x1392   : > { %v3010_v40 = vsub.f32 %v2991_v36, %v3007_v9  ;;  %v3171_v36 = vpack.c.bf16 %v3462_v29, %v3461_v35 }
0x1394   : > { %v3006_v21 = vpop.xlane.xlu0 %3005  ;;  %v3003_v7 = vpop.xlane.xlu1 %3002  ;;  %v3013_v45 = vmul.f32 %v3010_v40, %v3010_v40  ;;  %3795 = vmatprep.subr.bf16.mxu0 %v3171_v36 }
0x1395   : > { %v3009_v47 = vmul.f32 0.03125, %v3006_v21  ;;  %v3008_v49 = vmul.f32 0.03125, %v3003_v7  ;;  %3796 = vmatpush3.bf16.msra.mxu0 %v3171_v36 }
0x1396   : > { %v3016_v55 = vsel %vm738_vm6, %v3013_v45, 0.0  ;;  %3797 = vmatprep.subr.bf16.mxu0 %v3170_v39 }
0x1397   : > { %v3012_v60 = vsub.f32 %v2993_v44, %v3009_v47  ;;  %v3011_v52 = vsub.f32 %v2992_v1, %v3008_v49  ;;  %3017 = vadd.xlane.f32.xlu0 %v3016_v55  ;;  %v3169_v44 = vpack.c.bf16 %v3458_v42, %v3457_v41  ;;  %v3454_v1 = vld [vmem:[%s5019_s12 + $0x1] ss:$0 sm:$0xff] }
0x1399   : > { %v3015_v43 = vmul.f32 %v3012_v60, %v3012_v60  ;;  %v3014_v17 = vmul.f32 %v3011_v52, %v3011_v52  ;;  %3798 = vmatpush3.bf16.msra.mxu0 %v3170_v39 }
0x139a   : > { %3799 = vmatprep.subr.bf16.mxu0 %v3169_v44 }
0x139b   : > { %v3022_v28 = vsel %vm745_vm8, %v3015_v43, 0.0  ;;  %v3019_v58 = vsel %vm601_vm3, %v3014_v17, 0.0 }
0x139c   : > { %3023 = vadd.xlane.f32.xlu0 %v3022_v28  ;;  %3020 = vadd.xlane.f32.xlu1 %v3019_v58 }
0x139d   : > { %3800 = vmatpush3.bf16.msra.mxu0 %v3169_v44 }
0x1420   : > { %v3018_v6 = vpop.xlane.xlu0 %3017 }
0x1421   : > { %v3025_v11 = vmul.f32 0.03125, %v3018_v6 }
0x1423   : > { %v3028_v34 = vadd.f32 1e-05, %v3025_v11 }
0x1425   : > { %4071 = vrsqrt.f32 %v3028_v34  ;;  %v3024_v46 = vpop.xlane.xlu0 %3023  ;;  %v3021_v56 = vpop.xlane.xlu1 %3020 }
0x1426   : > { %v3027_v2 = vmul.f32 0.03125, %v3024_v46  ;;  %v3026_v48 = vmul.f32 0.03125, %v3021_v56 }
0x1428   : > { %v3030_v51 = vadd.f32 1e-05, %v3027_v2  ;;  %v3029_v26 = vadd.f32 1e-05, %v3026_v48 }
0x142a   : > { %4073 = vrsqrt.f32 %v3030_v51 }
0x142b   : > { %4075 = vrsqrt.f32 %v3029_v26 }
0x1432   : > { %v4072_v12 = vpop.eup %4071 }
0x1433   : > { %v3034_v5 = vmul.f32 %v4072_v12, %v3010_v40 }
0x1435   : > { %v3043_v22 = vmul.f32 %v3447_v14, %v3034_v5 }
0x1437   : > { %v4074_v15 = vpop.eup %4073  ;;  %v4936_v20 = vadd.f32 %v3448_v31, %v3043_v22 }
0x1438   : > { %v4076_v16 = vpop.eup %4075  ;;  %v3036_v18 = vmul.f32 %v4074_v15, %v3012_v60 }
0x1439   : > { %v3035_v53 = vmul.f32 %v4076_v16, %v3011_v52 }
0x143a   : > { %v3045_v25 = vmul.f32 %v3447_v14, %v3036_v18 }
0x143b   : > { %v3044_v63 = vmul.f32 %v3447_v14, %v3035_v53 }
0x143c   : > { %v4934_v3 = vadd.f32 %v3448_v31, %v3045_v25 }
0x143d   : > { %v4938_v27 = vadd.f32 %v3448_v31, %v3044_v63  ;;  %v3468_v31 = vld [vmem:[%s5021_s14 + $0x1] ss:$0 sm:$0xff] }
0x143e   : > { %v3061_v4 = vpack.c.bf16 %v4934_v3, %v4934_v3 }
0x143f   : > { %v3060_v0 = vpack.c.bf16 %v4938_v27, %v4936_v20 }
0x1440   : > { %v3075_v30 = vrot.slane %v3061_v4, 1 }
0x1441   : > { %v3074_v32 = vrot.slane %v3060_v0, 1 }
0x1443   : > { %v3076_v13 = vsel %vm556_vm1, %v3074_v32, %v3075_v30 }
0x1444   : > { %3789 = vmatprep.mubr.msk.bf16.mxu1 %vm601_vm3, %v3076_v13 }
0x1445   : > { %3790 = vmatmul.mubr.msk.bf16.vlgmr.msra.gmra.mxu1 %vm601_vm3, %v3075_v30 }
0x1505   : > { %v3791_v57 = vpop.f32.mrf.mxu1 }
0x1506   : > { %v3126_v50 = vadd.f32 %v3791_v57, %v3454_v1 }
0x1507   : > { %v3117_v23 = vpop.f32.mrf.mxu1 }
0x1508   : > { %v3133_v9 = vmul.f32 %v3126_v50, %v3126_v50  ;;  %v3118_v40 = vadd.f32 %v3454_v1, %v3117_v23 }
0x1509   : > { %v3792_v21 = vpop.f32.mrf.mxu1 }
0x150a   : > { %v3136_v7 = vmul.f32 %v3133_v9, %v3126_v50  ;;  %v3131_v45 = vmul.f32 %v3118_v40, %v3118_v40 }
0x150b   : > { %v3120_v47 = vpop.f32.mrf.mxu1 }
0x150c   : > { %v3139_v49 = vmul.f32 0.044715, %v3136_v7  ;;  %v3134_v55 = vmul.f32 %v3131_v45, %v3118_v40  ;;  %v3121_v60 = vadd.f32 %v3454_v1, %v3120_v47 }
0x150e   : > { %v3142_v52 = vadd.f32 %v3139_v49, %v3126_v50  ;;  %v3137_v43 = vmul.f32 0.044715, %v3134_v55  ;;  %v3132_v17 = vmul.f32 %v3121_v60, %v3121_v60 }
0x1510   : > { %v3145_v28 = vmul.f32 0.7978846, %v3142_v52  ;;  %v3140_v58 = vadd.f32 %v3137_v43, %v3118_v40  ;;  %v3135_v59 = vmul.f32 %v3132_v17, %v3121_v60 }
0x1512   : > { %4077 = vtanh.f32 %v3145_v28  ;;  %v3143_v61 = vmul.f32 0.7978846, %v3140_v58  ;;  %v3138_v8 = vmul.f32 0.044715, %v3135_v59  ;;  %v3471_v58 = vld [vmem:[%s5022_s15 + $0x1] ss:$0 sm:$0xff] }
0x1514   : > { %4079 = vtanh.f32 %v3143_v61  ;;  %v3141_v54 = vadd.f32 %v3138_v8, %v3121_v60  ;;  %v3472_v61 = vld [vmem:[%s5023_s16 + $0x1] ss:$0 sm:$0xff] }
0x1516   : > { %v3144_v10 = vmul.f32 0.7978846, %v3141_v54 }
0x1518   : > { %4081 = vtanh.f32 %v3144_v10 }
0x151f   : > { %v4078_v62 = vpop.eup %4077 }
0x1520   : > { %v3151_v11 = vadd.f32 1.0, %v4078_v62 }
0x1521   : > { %v4080_v6 = vpop.eup %4079 }
0x1522   : > { %v3149_v34 = vadd.f32 1.0, %v4080_v6  ;;  %v3154_v56 = vmul.f32 0.5, %v3151_v11 }
0x1524   : > { %v3152_v2 = vmul.f32 0.5, %v3149_v34  ;;  %v3157_v26 = vmul.f32 %v3154_v56, %v3126_v50 }
0x1525   : > { %v4082_v46 = vpop.eup %4081 }
0x1526   : > { %v3150_v48 = vadd.f32 1.0, %v4082_v46  ;;  %v3155_v12 = vmul.f32 %v3152_v2, %v3118_v40  ;;  %v3168_v15 = vpack.c.bf16 %v3157_v26, %v3157_v26 }
0x1528   : > { %v3153_v51 = vmul.f32 0.5, %v3150_v48 }
0x152a   : > { %v3156_v5 = vmul.f32 %v3153_v51, %v3121_v60 }
0x152c   : > { %v3167_v14 = vpack.c.bf16 %v3156_v5, %v3155_v12 }
0x152e   : > { %3801 = vmatprep.mubr.msk.bf16.mxu0 %vm605_vm4, %v3167_v14 }
0x152f   : > { %3802 = vmatmul.mubr.msk.bf16.vlgmr.msra.gmra.mxu0 %vm605_vm4, %v3168_v15 }
0x15ef   : > { %v3803_v16 = vpop.f32.mrf.mxu0 }
0x15f0   : > { %v3233_v4 = vrot.slane %v3803_v16, 6 }
0x15f1   : > { %v3213_v18 = vpop.f32.mrf.mxu0 }
0x15f2   : > { %v3230_v53 = vrot.slane %v3213_v18, 6 }
0x15f3   : > { %v3804_v22 = vpop.f32.mrf.mxu0 }
0x15f4   : > { %v3238_v25 = vadd.f32 %v3230_v53, %v4936_v20 }
0x15f5   : > { %v3216_v63 = vpop.f32.mrf.mxu0 }
0x15f6   : > { %v3231_v0 = vrot.slane %v3216_v63, 6  ;;  %v3249_v30 = vadd.f32 %v3468_v31, %v3238_v25 }
0x15f8   : > { %v3232_v32 = vsel %vm724_vm7, %v3230_v53, %v3231_v0  ;;  %v3234_v13 = vsel %vm724_vm7, %v3231_v0, %v3233_v4  ;;  %v3256_v24 = vsel %vm738_vm6, %v3249_v30, 0.0 }
0x15f9   : > { %v3239_v19 = vadd.f32 %v3232_v32, %v4938_v27  ;;  %v3240_v33 = vadd.f32 %v3234_v13, %v4934_v3  ;;  %3257 = vadd.xlane.f32.xlu1 %v3256_v24 }
0x15fb   : > { %v3251_v35 = vadd.f32 %v3468_v31, %v3240_v33  ;;  %v3250_v29 = vadd.f32 %v3468_v31, %v3239_v19 }
0x15fd   : > { %v3262_v36 = vsel %vm745_vm8, %v3251_v35, 0.0  ;;  %v3259_v20 = vsel %vm601_vm3, %v3250_v29, 0.0 }
0x15fe   : > { %3263 = vadd.xlane.f32.xlu1 %v3262_v36  ;;  %3260 = vadd.xlane.f32.xlu0 %v3259_v20 }
0x1682   : > { %v3258_v37 = vpop.xlane.xlu1 %3257 }
0x1683   : > { %v3265_v38 = vmul.f32 0.03125, %v3258_v37 }
0x1685   : > { %v3268_v39 = vsub.f32 %v3249_v30, %v3265_v38 }
0x1687   : > { %v3264_v41 = vpop.xlane.xlu1 %3263  ;;  %v3261_v42 = vpop.xlane.xlu0 %3260  ;;  %v3271_v44 = vmul.f32 %v3268_v39, %v3268_v39 }
0x1688   : > { %v3267_v1 = vmul.f32 0.03125, %v3264_v41  ;;  %v3266_v57 = vmul.f32 0.03125, %v3261_v42 }
0x1689   : > { %v3274_v27 = vsel %vm738_vm6, %v3271_v44, 0.0 }
0x168a   : > { %v3270_v3 = vsub.f32 %v3251_v35, %v3267_v1  ;;  %v3269_v50 = vsub.f32 %v3250_v29, %v3266_v57  ;;  %3275 = vadd.xlane.f32.xlu0 %v3274_v27 }
0x168c   : > { %v3273_v23 = vmul.f32 %v3270_v3, %v3270_v3  ;;  %v3272_v9 = vmul.f32 %v3269_v50, %v3269_v50 }
0x168e   : > { %v3280_v40 = vsel %vm745_vm8, %v3273_v23, 0.0  ;;  %v3277_v21 = vsel %vm601_vm3, %v3272_v9, 0.0 }
0x168f   : > { %3281 = vadd.xlane.f32.xlu0 %v3280_v40  ;;  %3278 = vadd.xlane.f32.xlu1 %v3277_v21 }
0x1713   : > { %v3276_v7 = vpop.xlane.xlu0 %3275 }
0x1714   : > { %v3283_v45 = vmul.f32 0.03125, %v3276_v7 }
0x1716   : > { %v3286_v47 = vadd.f32 1e-05, %v3283_v45 }
0x1718   : > { %4083 = vrsqrt.f32 %v3286_v47  ;;  %v3279_v49 = vpop.xlane.xlu1 %3278  ;;  %v3282_v55 = vpop.xlane.xlu0 %3281 }
0x1719   : > { %v3284_v60 = vmul.f32 0.03125, %v3279_v49  ;;  %v3285_v52 = vmul.f32 0.03125, %v3282_v55 }
0x171b   : > { %v3287_v43 = vadd.f32 1e-05, %v3284_v60  ;;  %v3288_v17 = vadd.f32 1e-05, %v3285_v52 }
0x171d   : > { %4085 = vrsqrt.f32 %v3287_v43 }
0x171e   : > { %4087 = vrsqrt.f32 %v3288_v17 }
0x1725   : > { %v4084_v28 = vpop.eup %4083 }
0x1726   : > { %v3292_v59 = vmul.f32 %v4084_v28, %v3268_v39 }
0x1728   : > { %v3301_v8 = vmul.f32 %v3471_v58, %v3292_v59 }
0x172a   : > { %v4086_v54 = vpop.eup %4085  ;;  %v3310_v10 = vadd.f32 %v3472_v61, %v3301_v8 }
0x172b   : > { %v4088_v62 = vpop.eup %4087  ;;  %v3293_v6 = vmul.f32 %v4086_v54, %v3269_v50 }
0x172c   : > { %3313 = vst.msk [vmem:[%s548_s27 - $0x2] sm:$0xfc] %vm738_vm6, %v3310_v10  ;;  %v3294_v11 = vmul.f32 %v4088_v62, %v3270_v3 }
0x172d   : > { %v3302_v34 = vmul.f32 %v3471_v58, %v3293_v6 }
0x172e   : > { %v3303_v46 = vmul.f32 %v3471_v58, %v3294_v11 }
0x172f   : > { %v3311_v56 = vadd.f32 %v3472_v61, %v3302_v34 }
0x1730   : > { %v3312_v2 = vadd.f32 %v3472_v61, %v3303_v46 }
0x1731   : > { %3314 = vst.msk [vmem:[%s548_s27 + $0x6] sm:$0xff] %vm601_vm3, %v3311_v56 }
0x1732   : > { %3315 = vst.msk [vmem:[%s548_s27 + $0xe] sm:$0x1f] %vm745_vm8, %v3312_v2 }
0x1733 PF: > { %s27_s24 = sadd.s32 1, %s4095_s24  }
0x1734   : > { %p24_p4 = scmp.ge.s32.totalorder %s27_s24, 4  }
0x1736   :  { %26 = sbr.rel (!%p24_p4) target bundleno = 3 (0x3), region = 130 }

</bundles_post_ra>
